<compile_context>
chip_gen: v7x
topology: tpu7x:2x2x1
jax: 0.10.0
libtpu: 0.0.40
codegen_flags: <defaults>
</compile_context>

<pallas_src>
import jax
import jax.numpy as jnp
from jax import lax
from jax.experimental import pallas as pl
from jax.experimental.pallas import tpu as pltpu  # noqa: F401  (TPU backend assumed)

# ---------------------------------------------------------------------------
# Small-model configuration (shapes scaled down from ViT-B/16 + CODA-Prompt)
# ---------------------------------------------------------------------------
B = 2            # batch
C_IN = 3         # image channels
IMG = 32         # image size  (original 224)
PATCH = 16       # patch size  -> 2x2 = 4 patches
D = 32           # embed dim   (original 768)
HEADS = 4        # attention heads (original 12)
DH = D // HEADS  # head dim
DEPTH = 2        # transformer depth (original 12)
MLP_H = 4 * D    # MLP hidden
NB_CLASSES = 10  # args['nb_classes']
LN_EPS = 1e-6

# CodaPrompt config: prompt_param = [pool_size, prompt_length, ortho_mu]
POOL = 8         # e_pool_size
N_TASKS = 2      # args['nb_tasks']
E_P_LEN = 4      # prompt length (split in half -> Ek, Ev prefixes)
TASK_COUNT = 0   # current task index
E_LAYERS = (0, 1)  # layers that receive prompts (original: 0..4)

NUM_PATCHES = (IMG // PATCH) ** 2
SEQ = NUM_PATCHES + 1          # + CLS token
CPP = C_IN * PATCH * PATCH     # flattened patch length
HALF = E_P_LEN // 2
NE = len(E_LAYERS)
F_PROMPTS = (TASK_COUNT + 1) * (POOL // N_TASKS)
ATTN_SCALE = DH ** -0.5

BSEQ = B * SEQ                 # batch-folded token rows
BHALF = B * HALF               # batch-folded prefix rows
OUT_LANES = 128                # lane-dense output slab width
NEG_INF = -1e30

# MXU operand dtype (accumulation is always f32 via preferred_element_type).
MXU_DTYPE = jnp.bfloat16


# ---------------------------------------------------------------------------
# In-kernel helpers (operate on values held in vregs)
# ---------------------------------------------------------------------------
def _mm(a, b):
    return jnp.dot(a.astype(MXU_DTYPE), b.astype(MXU_DTYPE),
                   preferred_element_type=jnp.float32)


def _mm_t(a, b):
    # a @ b.T  (contract the last dim of both operands; no explicit transpose)
    return lax.dot_general(a.astype(MXU_DTYPE), b.astype(MXU_DTYPE),
                           (((1,), (1,)), ((), ())),
                           preferred_element_type=jnp.float32)


def _mm32(a, b):
    # exact f32 matmul (tiny 0/1-selector dots where rounding is unwanted)
    return jnp.dot(a, b, preferred_element_type=jnp.float32)


def _layernorm(x, g, b):
    mu = jnp.mean(x, axis=-1, keepdims=True)
    xc = x - mu
    var = jnp.mean(xc * xc, axis=-1, keepdims=True)
    return xc * lax.rsqrt(var + LN_EPS) * g + b


def _gelu(x):
    # exact erf-based GELU (matches torch.nn.GELU default)
    return 0.5 * x * (1.0 + lax.erf(x * 0.7071067811865476))


# ---------------------------------------------------------------------------
# The fused kernel: whole batch, whole model, one invocation
# ---------------------------------------------------------------------------
def _fused_forward_kernel(
    patches_ref, patch_w_ref, patch_b_ref, pos_ref,
    ln1_g_ref, ln1_b_ref, wq_ref, bq_ref, wk_ref, bk_ref, wv_ref, bv_ref,
    proj_w_ref, proj_b_ref, ln2_g_ref, ln2_b_ref,
    fc1_w_ref, fc1_b_ref, fc2_w_ref, fc2_b_ref,
    norm_g_ref, norm_b_ref, head_w_ref, head_b_ref,
    ep_ref, ekey_ref, ea_ref,
    tok_mask_ref, pfx_mask_ref, cls_sel_ref,
    out_ref,
):
    f32 = jnp.float32

    # Per-head lane masks, built once and reused by every block of both passes.
    lane = lax.broadcasted_iota(jnp.int32, (1, D), 1)
    head_masks = [((lane >= h * DH) & (lane < (h + 1) * DH)).astype(f32)
                  for h in range(HEADS)]

    # Host-precomputed constants (block-diagonal batch masks, CLS selector).
    tok_mask = tok_mask_ref[...]     # (BSEQ, BSEQ)   additive, -1e30 cross-batch
    pfx_mask = pfx_mask_ref[...]     # (BSEQ, BHALF)  additive, -1e30 cross-batch
    cls_sel = cls_sel_ref[...]       # (B, BSEQ)      0/1 CLS-row selector

    # --- shared patch-embed + CLS + positional embedding (one aligned dot) ---
    # Row 0 of each sample is a zero patch; pos_ref row 0 already carries
    # cls + pos[0] - patch_b, so the result is exactly [CLS | patch tokens]+pos.
    tok0 = _mm(patches_ref[...], patch_w_ref[...]) + patch_b_ref[...] + pos_ref[...]

    def block(x, l, k_pfx, v_pfx):
        # x: (BSEQ, D); k_pfx/v_pfx: (BHALF, D) prefix tokens or None.
        h = _layernorm(x, ln1_g_ref[l], ln1_b_ref[l])
        q = _mm(h, wq_ref[l]) + bq_ref[l]
        k = _mm(h, wk_ref[l]) + bk_ref[l]
        v = _mm(h, wv_ref[l]) + bv_ref[l]

        # Multi-head attention via lane masks: each head's score matmul zeroes
        # the other heads' lanes of q; each head's output lands in its own
        # lanes of o, so summing heads reproduces the concatenated output.
        o = jnp.zeros((BSEQ, D), f32)
        for hm in head_masks:
            qh = q * hm
            s_t = _mm_t(qh, k) * ATTN_SCALE + tok_mask          # (BSEQ, BSEQ)
            if k_pfx is None:
                m = jnp.max(s_t, axis=-1, keepdims=True)
                p_t = jnp.exp(s_t - m)
                inv = pl.reciprocal(jnp.sum(p_t, axis=-1, keepdims=True),
                                    approx=True)
                o = o + _mm(p_t, v * hm) * inv
            else:
                s_p = _mm_t(qh, k_pfx) * ATTN_SCALE + pfx_mask  # (BSEQ, BHALF)
                m = jnp.maximum(jnp.max(s_t, axis=-1, keepdims=True),
                                jnp.max(s_p, axis=-1, keepdims=True))
                p_t = jnp.exp(s_t - m)
                p_p = jnp.exp(s_p - m)
                inv = pl.reciprocal(jnp.sum(p_t, axis=-1, keepdims=True)
                                    + jnp.sum(p_p, axis=-1, keepdims=True),
                                    approx=True)
                o = o + (_mm(p_t, v * hm) + _mm(p_p, v_pfx * hm)) * inv
        x = x + _mm(o, proj_w_ref[l]) + proj_b_ref[l]

        h = _layernorm(x, ln2_g_ref[l], ln2_b_ref[l])
        h = _gelu(_mm(h, fc1_w_ref[l]) + fc1_b_ref[l])
        return x + _mm(h, fc2_w_ref[l]) + fc2_b_ref[l]

    # --- pass 1: frozen query pass (no prompt); q = CLS after final LN -------
    tok = tok0
    for l in range(DEPTH):
        tok = block(tok, l, None, None)
    tok = _layernorm(tok, norm_g_ref[...], norm_b_ref[...])
    q_cls = _mm32(cls_sel, tok)                                   # (B, D), exact f32

    # --- pass 2: CODA-prompt-conditioned pass ---------------------------------
    tok = tok0
    for l in range(DEPTH):
        if l in E_LAYERS:
            li = E_LAYERS.index(l)
            Kp = ekey_ref[li]                                     # (F, D)
            Ap = ea_ref[li]                                       # (F, D)
            # n_K = F.normalize(K, dim=1);  q_n = F.normalize(q * A, dim=-1)
            nK = Kp * lax.rsqrt(
                jnp.maximum(jnp.sum(Kp * Kp, axis=1, keepdims=True), 1e-24))
            numer = _mm_t(q_cls, Ap * nK)                         # (B, F)
            den = jnp.sqrt(_mm_t(q_cls * q_cls, Ap * Ap))         # (B, F) = ||q*A_k||
            w = numer / jnp.maximum(den, 1e-12)                   # cosine weights
            # One lane-dense matmul produces all prefix rows: (B, E_P_LEN*D).
            pfx = _mm(w, ep_ref[li])                              # (B, 128)
            # p-major row order (j outer, b inner): prefix batch id = row % B.
            k_pfx = jnp.concatenate(
                [pfx[:, j * D:(j + 1) * D] for j in range(HALF)], axis=0)
            v_pfx = jnp.concatenate(
                [pfx[:, (HALF + j) * D:(HALF + j + 1) * D] for j in range(HALF)],
                axis=0)
            tok = block(tok, l, k_pfx, v_pfx)
        else:
            tok = block(tok, l, None, None)
    tok = _layernorm(tok, norm_g_ref[...], norm_b_ref[...])
    cls_out = _mm32(cls_sel, tok)                                 # (B, D), exact f32

    # Lane-dense output slab: logits in lanes [0:NB], f32 features in [NB:NB+D].
    out_ref[...] = _mm(cls_out, head_w_ref[...]) + head_b_ref[...]
    out_ref[:, NB_CLASSES:NB_CLASSES + D] = cls_out


# ---------------------------------------------------------------------------
# Wrapper: host-side layout plumbing + the single pallas_call
# ---------------------------------------------------------------------------
def coda_prompt_vit_forward(x, params, prompt_params, pen=False):
    Bn = x.shape[0]
    assert Bn == B, "kernel is specialised for the configured batch size"
    Hp = Wp = IMG // PATCH
    wdt = MXU_DTYPE

    # Patch extraction (layout-only; inner (c, p, q) order matches the conv W).
    patches = (
        x.reshape(Bn, C_IN, Hp, PATCH, Wp, PATCH)
        .transpose(0, 2, 4, 1, 3, 5)
        .reshape(Bn, NUM_PATCHES, CPP)
    )
    # Prepend a zero "patch" per sample so CLS is row 0 of each sample block.
    patches_all = jnp.concatenate(
        [jnp.zeros((Bn, 1, CPP), jnp.float32), patches], axis=1
    ).reshape(BSEQ, CPP)

    patch_b = params["patch_b"].reshape(1, D)
    pos = params["pos"].reshape(SEQ, D)
    cls = params["cls"].reshape(1, D)
    # Effective positional table: row 0 folds cls + pos[0] - patch_b so the
    # kernel's single  patches @ W + patch_b + pos  reproduces [CLS|tokens]+pos.
    pos_eff = jnp.concatenate([cls + pos[0:1] - patch_b, pos[1:]], axis=0)
    pos_all = jnp.tile(pos_eff, (Bn, 1))                          # (BSEQ, D)

    blocks = params["blocks"]
    stack = lambda name: jnp.stack([blk[name] for blk in blocks], axis=0)
    qkv_w = stack("qkv_w")                     # (DEPTH, D, 3D)
    qkv_b = stack("qkv_b")                     # (DEPTH, 3D)

    # Padded, lane-dense head: fc weights in lanes [0:NB], zeros elsewhere.
    head_w = jnp.zeros((D, OUT_LANES), jnp.float32).at[:, :NB_CLASSES].set(
        params["fc_w"])
    head_b = jnp.zeros((1, OUT_LANES), jnp.float32).at[0, :NB_CLASSES].set(
        params["fc_b"])

    # CODA prompt pools, truncated to eval-visible prompts.  p is flattened to
    # (F, E_P_LEN*D) per layer so one matmul yields all prefix rows lane-dense.
    ep_flat = jnp.stack(
        [prompt_params[l]["p"][:F_PROMPTS].reshape(F_PROMPTS, E_P_LEN * D)
         for l in E_LAYERS], axis=0).astype(wdt)                  # (NE, F, 128)
    ekey = jnp.stack([prompt_params[l]["k"][:F_PROMPTS] for l in E_LAYERS], 0)
    ea = jnp.stack([prompt_params[l]["a"][:F_PROMPTS] for l in E_LAYERS], 0)

    # Block-diagonal batch masks + CLS selector (host-side constants).
    q_bid = jnp.arange(BSEQ) // SEQ
    tok_mask = jnp.where(q_bid[:, None] == q_bid[None, :], 0.0, NEG_INF
                         ).astype(jnp.float32)
    p_bid = jnp.arange(BHALF) % B          # prefix rows are p-major, b inner
    pfx_mask = jnp.where(q_bid[:, None] == p_bid[None, :], 0.0, NEG_INF
                         ).astype(jnp.float32)
    cls_sel = (jnp.arange(BSEQ)[None, :] == (jnp.arange(B) * SEQ)[:, None]
               ).astype(jnp.float32)

    inputs = (
        patches_all,
        params["patch_w"].reshape(D, CPP).T.astype(wdt),          # (CPP, D)
        patch_b, pos_all,
        stack("ln1_g").reshape(DEPTH, 1, D), stack("ln1_b").reshape(DEPTH, 1, D),
        qkv_w[:, :, 0:D].astype(wdt),         qkv_b[:, 0:D].reshape(DEPTH, 1, D),
        qkv_w[:, :, D:2 * D].astype(wdt),     qkv_b[:, D:2 * D].reshape(DEPTH, 1, D),
        qkv_w[:, :, 2 * D:3 * D].astype(wdt), qkv_b[:, 2 * D:3 * D].reshape(DEPTH, 1, D),
        stack("proj_w").astype(wdt), stack("proj_b").reshape(DEPTH, 1, D),
        stack("ln2_g").reshape(DEPTH, 1, D), stack("ln2_b").reshape(DEPTH, 1, D),
        stack("fc1_w").astype(wdt), stack("fc1_b").reshape(DEPTH, 1, MLP_H),
        stack("fc2_w").astype(wdt), stack("fc2_b").reshape(DEPTH, 1, D),
        params["norm_g"].reshape(1, D), params["norm_b"].reshape(1, D),
        head_w.astype(wdt), head_b,
        ep_flat, ekey, ea,
        tok_mask, pfx_mask, cls_sel,
    )

    # Advisory cost hint for XLA's scheduler (rough).
    per_layer_mm = (4 * 2 * BSEQ * D * D
                    + 2 * 2 * BSEQ * D * MLP_H
                    + HEADS * 2 * 2 * BSEQ * (BSEQ + BHALF) * D)
    flops = (2 * BSEQ * CPP * D + 2 * DEPTH * per_layer_mm
             + 2 * B * D * OUT_LANES)
    transcendentals = 2 * DEPTH * (HEADS * BSEQ * (BSEQ + BHALF) + BSEQ * MLP_H)
    bytes_accessed = int(sum(int(a.size) * a.dtype.itemsize for a in inputs)
                         + B * OUT_LANES * 4)

    # Single invocation (no grid): everything is VMEM/vreg resident, one launch,
    # one lane-dense (B, 128) HBM write.  On v7x this intentionally runs on one
    # TensorCore — duplicating the weight DMA across both TCs for ~1 us of
    # compute would be a net loss at this size.
    out = pl.pallas_call(
        _fused_forward_kernel,
        out_shape=jax.ShapeDtypeStruct((Bn, OUT_LANES), jnp.float32),
        cost_estimate=pl.CostEstimate(
            flops=int(flops),
            transcendentals=int(transcendentals),
            bytes_accessed=bytes_accessed),
    )(*inputs)

    feats = out[:, NB_CLASSES:NB_CLASSES + D]      # pen=True features (exact f32)
    logits = out[:, :NB_CLASSES]
    return feats if pen else logits


# ---------------------------------------------------------------------------
# Deterministic parameter init (mirrors the nn.Module's parameter structure)
# ---------------------------------------------------------------------------
def init_params(key):
    ks = iter(jax.random.split(key, 64))

    def rnd(shape, scale=0.02):
        return (scale * jax.random.normal(next(ks), shape)).astype(jnp.float32)

    params = {
        "patch_w": rnd((D, C_IN, PATCH, PATCH)),
        "patch_b": rnd((D,)),
        "cls": rnd((1, 1, D)),
        "pos": rnd((1, SEQ, D)),
        "norm_g": jnp.ones((D,), jnp.float32),
        "norm_b": jnp.zeros((D,), jnp.float32),
        "fc_w": rnd((D, NB_CLASSES)),
        "fc_b": jnp.zeros((NB_CLASSES,), jnp.float32),
        "blocks": [],
    }
    for _ in range(DEPTH):
        params["blocks"].append({
            "ln1_g": jnp.ones((D,), jnp.float32), "ln1_b": jnp.zeros((D,), jnp.float32),
            "qkv_w": rnd((D, 3 * D)), "qkv_b": jnp.zeros((3 * D,), jnp.float32),
            "proj_w": rnd((D, D)), "proj_b": jnp.zeros((D,), jnp.float32),
            "ln2_g": jnp.ones((D,), jnp.float32), "ln2_b": jnp.zeros((D,), jnp.float32),
            "fc1_w": rnd((D, MLP_H)), "fc1_b": jnp.zeros((MLP_H,), jnp.float32),
            "fc2_w": rnd((MLP_H, D)), "fc2_b": jnp.zeros((D,), jnp.float32),
        })

    prompt_params = {}
    for l in E_LAYERS:
        prompt_params[l] = {
            "p": rnd((POOL, E_P_LEN, D), scale=0.5),  # e_p_{l}
            "k": rnd((POOL, D), scale=0.5),           # e_k_{l}
            "a": rnd((POOL, D), scale=0.5),           # e_a_{l}
        }
    return params, prompt_params


# ---------------------------------------------------------------------------
if __name__ == "__main__":
    key = jax.random.PRNGKey(0)
    pkey, xkey = jax.random.split(key)
    params, prompt_params = init_params(pkey)

    x = jax.random.normal(xkey, (B, C_IN, IMG, IMG), dtype=jnp.float32)  # NCHW

    fwd = jax.jit(lambda xx: coda_prompt_vit_forward(xx, params, prompt_params,
                                                     pen=False))
    out = fwd(x)
    jax.block_until_ready(out)
    assert out.shape == (B, NB_CLASSES), out.shape
    assert bool(jnp.all(jnp.isfinite(out)))
    print("KERNEL_OK")
</pallas_src>

<mosaic_0001>
module attributes {stable_mosaic.version = 11 : i64} {
  func.func @_fused_forward_kernel(%arg0: memref<10x768xf32, #tpu.memory_space<vmem>>, %arg1: memref<768x32xbf16, #tpu.memory_space<vmem>>, %arg2: memref<1x32xf32, #tpu.memory_space<vmem>>, %arg3: memref<10x32xf32, #tpu.memory_space<vmem>>, %arg4: memref<2x1x32xf32, #tpu.memory_space<vmem>>, %arg5: memref<2x1x32xf32, #tpu.memory_space<vmem>>, %arg6: memref<2x32x32xbf16, #tpu.memory_space<vmem>>, %arg7: memref<2x1x32xf32, #tpu.memory_space<vmem>>, %arg8: memref<2x32x32xbf16, #tpu.memory_space<vmem>>, %arg9: memref<2x1x32xf32, #tpu.memory_space<vmem>>, %arg10: memref<2x32x32xbf16, #tpu.memory_space<vmem>>, %arg11: memref<2x1x32xf32, #tpu.memory_space<vmem>>, %arg12: memref<2x32x32xbf16, #tpu.memory_space<vmem>>, %arg13: memref<2x1x32xf32, #tpu.memory_space<vmem>>, %arg14: memref<2x1x32xf32, #tpu.memory_space<vmem>>, %arg15: memref<2x1x32xf32, #tpu.memory_space<vmem>>, %arg16: memref<2x32x128xbf16, #tpu.memory_space<vmem>>, %arg17: memref<2x1x128xf32, #tpu.memory_space<vmem>>, %arg18: memref<2x128x32xbf16, #tpu.memory_space<vmem>>, %arg19: memref<2x1x32xf32, #tpu.memory_space<vmem>>, %arg20: memref<1x32xf32, #tpu.memory_space<vmem>>, %arg21: memref<1x32xf32, #tpu.memory_space<vmem>>, %arg22: memref<32x128xbf16, #tpu.memory_space<vmem>>, %arg23: memref<1x128xf32, #tpu.memory_space<vmem>>, %arg24: memref<2x4x128xbf16, #tpu.memory_space<vmem>>, %arg25: memref<2x4x32xf32, #tpu.memory_space<vmem>>, %arg26: memref<2x4x32xf32, #tpu.memory_space<vmem>>, %arg27: memref<10x10xf32, #tpu.memory_space<vmem>>, %arg28: memref<10x4xf32, #tpu.memory_space<vmem>>, %arg29: memref<2x10xf32, #tpu.memory_space<vmem>>, %arg30: memref<2x128xf32, #tpu.memory_space<vmem>>) attributes {dimension_semantics = [], scalar_prefetch = 0 : i64, scratch_operands = 0 : i64, tpu.core_type = #tpu.core_type<tc>} {
    %0 = tpu.iota {dimensions = array<i32: 1>} : vector<1x32xi32>
    %c0_i32 = arith.constant 0 : i32
    %1 = vector.broadcast %c0_i32 : i32 to vector<1x32xi32>
    %2 = arith.cmpi sge, %0, %1 : vector<1x32xi32>
    %c8_i32 = arith.constant 8 : i32
    %3 = vector.broadcast %c8_i32 : i32 to vector<1x32xi32>
    %4 = arith.cmpi slt, %0, %3 : vector<1x32xi32>
    %5 = arith.andi %2, %4 : vector<1x32xi1>
    %6 = arith.extui %5 : vector<1x32xi1> to vector<1x32xi32>
    %7 = arith.sitofp %6 : vector<1x32xi32> to vector<1x32xf32>
    %c8_i32_0 = arith.constant 8 : i32
    %8 = vector.broadcast %c8_i32_0 : i32 to vector<1x32xi32>
    %9 = arith.cmpi sge, %0, %8 : vector<1x32xi32>
    %c16_i32 = arith.constant 16 : i32
    %10 = vector.broadcast %c16_i32 : i32 to vector<1x32xi32>
    %11 = arith.cmpi slt, %0, %10 : vector<1x32xi32>
    %12 = arith.andi %9, %11 : vector<1x32xi1>
    %13 = arith.extui %12 : vector<1x32xi1> to vector<1x32xi32>
    %14 = arith.sitofp %13 : vector<1x32xi32> to vector<1x32xf32>
    %c16_i32_1 = arith.constant 16 : i32
    %15 = vector.broadcast %c16_i32_1 : i32 to vector<1x32xi32>
    %16 = arith.cmpi sge, %0, %15 : vector<1x32xi32>
    %c24_i32 = arith.constant 24 : i32
    %17 = vector.broadcast %c24_i32 : i32 to vector<1x32xi32>
    %18 = arith.cmpi slt, %0, %17 : vector<1x32xi32>
    %19 = arith.andi %16, %18 : vector<1x32xi1>
    %20 = arith.extui %19 : vector<1x32xi1> to vector<1x32xi32>
    %21 = arith.sitofp %20 : vector<1x32xi32> to vector<1x32xf32>
    %c24_i32_2 = arith.constant 24 : i32
    %22 = vector.broadcast %c24_i32_2 : i32 to vector<1x32xi32>
    %23 = arith.cmpi sge, %0, %22 : vector<1x32xi32>
    %c32_i32 = arith.constant 32 : i32
    %24 = vector.broadcast %c32_i32 : i32 to vector<1x32xi32>
    %25 = arith.cmpi slt, %0, %24 : vector<1x32xi32>
    %26 = arith.andi %23, %25 : vector<1x32xi1>
    %27 = arith.extui %26 : vector<1x32xi1> to vector<1x32xi32>
    %28 = arith.sitofp %27 : vector<1x32xi32> to vector<1x32xf32>
    %c0 = arith.constant 0 : index
    %c0_3 = arith.constant 0 : index
    %29 = vector.load %arg27[%c0, %c0_3] : memref<10x10xf32, #tpu.memory_space<vmem>>, vector<10x10xf32>
    %c0_4 = arith.constant 0 : index
    %c0_5 = arith.constant 0 : index
    %30 = vector.load %arg28[%c0_4, %c0_5] : memref<10x4xf32, #tpu.memory_space<vmem>>, vector<10x4xf32>
    %c0_6 = arith.constant 0 : index
    %c0_7 = arith.constant 0 : index
    %31 = vector.load %arg29[%c0_6, %c0_7] : memref<2x10xf32, #tpu.memory_space<vmem>>, vector<2x10xf32>
    %c0_8 = arith.constant 0 : index
    %c0_9 = arith.constant 0 : index
    %32 = vector.load %arg0[%c0_8, %c0_9] : memref<10x768xf32, #tpu.memory_space<vmem>>, vector<10x768xf32>
    %c0_10 = arith.constant 0 : index
    %c0_11 = arith.constant 0 : index
    %33 = vector.load %arg1[%c0_10, %c0_11] : memref<768x32xbf16, #tpu.memory_space<vmem>>, vector<768x32xbf16>
    %34 = arith.truncf %32 : vector<10x768xf32> to vector<10x768xbf16>
    %cst = arith.constant dense<0.000000e+00> : vector<10x32xf32>
    %35 = tpu.matmul %34, %33, %cst {dimension_numbers = #tpu.dot_dimension_numbers<[1], [0], [0], [1], [0, 0, 1, 1], [], []>} : vector<10x768xbf16>, vector<768x32xbf16>, vector<10x32xf32> -> vector<10x32xf32>
    %c0_12 = arith.constant 0 : index
    %c0_13 = arith.constant 0 : index
    %36 = vector.load %arg2[%c0_12, %c0_13] : memref<1x32xf32, #tpu.memory_space<vmem>>, vector<1x32xf32>
    %37 = vector.broadcast %36 : vector<1x32xf32> to vector<10x32xf32>
    %38 = arith.addf %35, %37 : vector<10x32xf32>
    %c0_14 = arith.constant 0 : index
    %c0_15 = arith.constant 0 : index
    %39 = vector.load %arg3[%c0_14, %c0_15] : memref<10x32xf32, #tpu.memory_space<vmem>>, vector<10x32xf32>
    %40 = arith.addf %38, %39 : vector<10x32xf32>
    %c0_16 = arith.constant 0 : index
    %c0_17 = arith.constant 0 : index
    %c0_18 = arith.constant 0 : index
    %41 = vector.load %arg4[%c0_16, %c0_17, %c0_18] : memref<2x1x32xf32, #tpu.memory_space<vmem>>, vector<1x1x32xf32>
    %42 = vector.shape_cast %41 : vector<1x1x32xf32> to vector<1x32xf32>
    %c0_19 = arith.constant 0 : index
    %c0_20 = arith.constant 0 : index
    %c0_21 = arith.constant 0 : index
    %43 = vector.load %arg5[%c0_19, %c0_20, %c0_21] : memref<2x1x32xf32, #tpu.memory_space<vmem>>, vector<1x1x32xf32>
    %44 = vector.shape_cast %43 : vector<1x1x32xf32> to vector<1x32xf32>
    %cst_22 = arith.constant dense<0.000000e+00> : vector<10xf32>
    %45 = vector.multi_reduction <add>, %40, %cst_22 [1] : vector<10x32xf32> to vector<10xf32>
    %46 = vector.shape_cast %45 : vector<10xf32> to vector<10x1xf32>
    %cst_23 = arith.constant 3.200000e+01 : f32
    %47 = vector.broadcast %cst_23 : f32 to vector<10x1xf32>
    %48 = arith.divf %46, %47 : vector<10x1xf32>
    %49 = vector.broadcast %48 : vector<10x1xf32> to vector<10x32xf32>
    %50 = arith.subf %40, %49 : vector<10x32xf32>
    %51 = arith.mulf %50, %50 : vector<10x32xf32>
    %cst_24 = arith.constant dense<0.000000e+00> : vector<10xf32>
    %52 = vector.multi_reduction <add>, %51, %cst_24 [1] : vector<10x32xf32> to vector<10xf32>
    %53 = vector.shape_cast %52 : vector<10xf32> to vector<10x1xf32>
    %cst_25 = arith.constant 3.200000e+01 : f32
    %54 = vector.broadcast %cst_25 : f32 to vector<10x1xf32>
    %55 = arith.divf %53, %54 : vector<10x1xf32>
    %cst_26 = arith.constant 9.99999997E-7 : f32
    %56 = vector.broadcast %cst_26 : f32 to vector<10x1xf32>
    %57 = arith.addf %55, %56 : vector<10x1xf32>
    %58 = math.rsqrt %57 : vector<10x1xf32>
    %59 = vector.broadcast %58 : vector<10x1xf32> to vector<10x32xf32>
    %60 = arith.mulf %50, %59 : vector<10x32xf32>
    %61 = vector.broadcast %42 : vector<1x32xf32> to vector<10x32xf32>
    %62 = arith.mulf %60, %61 : vector<10x32xf32>
    %63 = vector.broadcast %44 : vector<1x32xf32> to vector<10x32xf32>
    %64 = arith.addf %62, %63 : vector<10x32xf32>
    %c0_27 = arith.constant 0 : index
    %c0_28 = arith.constant 0 : index
    %c0_29 = arith.constant 0 : index
    %65 = vector.load %arg6[%c0_27, %c0_28, %c0_29] : memref<2x32x32xbf16, #tpu.memory_space<vmem>>, vector<1x32x32xbf16>
    %66 = vector.shape_cast %65 : vector<1x32x32xbf16> to vector<32x32xbf16>
    %67 = arith.truncf %64 : vector<10x32xf32> to vector<10x32xbf16>
    %cst_30 = arith.constant dense<0.000000e+00> : vector<10x32xf32>
    %68 = tpu.matmul %67, %66, %cst_30 {dimension_numbers = #tpu.dot_dimension_numbers<[1], [0], [0], [1], [0, 0, 1, 1], [], []>} : vector<10x32xbf16>, vector<32x32xbf16>, vector<10x32xf32> -> vector<10x32xf32>
    %c0_31 = arith.constant 0 : index
    %c0_32 = arith.constant 0 : index
    %c0_33 = arith.constant 0 : index
    %69 = vector.load %arg7[%c0_31, %c0_32, %c0_33] : memref<2x1x32xf32, #tpu.memory_space<vmem>>, vector<1x1x32xf32>
    %70 = vector.shape_cast %69 : vector<1x1x32xf32> to vector<1x32xf32>
    %71 = vector.broadcast %70 : vector<1x32xf32> to vector<10x32xf32>
    %72 = arith.addf %68, %71 : vector<10x32xf32>
    %c0_34 = arith.constant 0 : index
    %c0_35 = arith.constant 0 : index
    %c0_36 = arith.constant 0 : index
    %73 = vector.load %arg8[%c0_34, %c0_35, %c0_36] : memref<2x32x32xbf16, #tpu.memory_space<vmem>>, vector<1x32x32xbf16>
    %74 = vector.shape_cast %73 : vector<1x32x32xbf16> to vector<32x32xbf16>
    %75 = arith.truncf %64 : vector<10x32xf32> to vector<10x32xbf16>
    %cst_37 = arith.constant dense<0.000000e+00> : vector<10x32xf32>
    %76 = tpu.matmul %75, %74, %cst_37 {dimension_numbers = #tpu.dot_dimension_numbers<[1], [0], [0], [1], [0, 0, 1, 1], [], []>} : vector<10x32xbf16>, vector<32x32xbf16>, vector<10x32xf32> -> vector<10x32xf32>
    %c0_38 = arith.constant 0 : index
    %c0_39 = arith.constant 0 : index
    %c0_40 = arith.constant 0 : index
    %77 = vector.load %arg9[%c0_38, %c0_39, %c0_40] : memref<2x1x32xf32, #tpu.memory_space<vmem>>, vector<1x1x32xf32>
    %78 = vector.shape_cast %77 : vector<1x1x32xf32> to vector<1x32xf32>
    %79 = vector.broadcast %78 : vector<1x32xf32> to vector<10x32xf32>
    %80 = arith.addf %76, %79 : vector<10x32xf32>
    %c0_41 = arith.constant 0 : index
    %c0_42 = arith.constant 0 : index
    %c0_43 = arith.constant 0 : index
    %81 = vector.load %arg10[%c0_41, %c0_42, %c0_43] : memref<2x32x32xbf16, #tpu.memory_space<vmem>>, vector<1x32x32xbf16>
    %82 = vector.shape_cast %81 : vector<1x32x32xbf16> to vector<32x32xbf16>
    %83 = arith.truncf %64 : vector<10x32xf32> to vector<10x32xbf16>
    %cst_44 = arith.constant dense<0.000000e+00> : vector<10x32xf32>
    %84 = tpu.matmul %83, %82, %cst_44 {dimension_numbers = #tpu.dot_dimension_numbers<[1], [0], [0], [1], [0, 0, 1, 1], [], []>} : vector<10x32xbf16>, vector<32x32xbf16>, vector<10x32xf32> -> vector<10x32xf32>
    %c0_45 = arith.constant 0 : index
    %c0_46 = arith.constant 0 : index
    %c0_47 = arith.constant 0 : index
    %85 = vector.load %arg11[%c0_45, %c0_46, %c0_47] : memref<2x1x32xf32, #tpu.memory_space<vmem>>, vector<1x1x32xf32>
    %86 = vector.shape_cast %85 : vector<1x1x32xf32> to vector<1x32xf32>
    %87 = vector.broadcast %86 : vector<1x32xf32> to vector<10x32xf32>
    %88 = arith.addf %84, %87 : vector<10x32xf32>
    %cst_48 = arith.constant 0.000000e+00 : f32
    %89 = vector.broadcast %cst_48 : f32 to vector<10x32xf32>
    %90 = vector.broadcast %7 : vector<1x32xf32> to vector<10x32xf32>
    %91 = arith.mulf %72, %90 : vector<10x32xf32>
    %92 = arith.truncf %91 : vector<10x32xf32> to vector<10x32xbf16>
    %93 = arith.truncf %80 : vector<10x32xf32> to vector<10x32xbf16>
    %cst_49 = arith.constant dense<0.000000e+00> : vector<10x10xf32>
    %94 = tpu.matmul %92, %93, %cst_49 {dimension_numbers = #tpu.dot_dimension_numbers<[1], [1], [0], [0], [0, 0, 1, 0], [], []>} : vector<10x32xbf16>, vector<10x32xbf16>, vector<10x10xf32> -> vector<10x10xf32>
    %cst_50 = arith.constant 0.353553385 : f32
    %95 = vector.broadcast %cst_50 : f32 to vector<10x10xf32>
    %96 = arith.mulf %94, %95 : vector<10x10xf32>
    %97 = arith.addf %96, %29 : vector<10x10xf32>
    %cst_51 = arith.constant dense<0xFF800000> : vector<10xf32>
    %98 = vector.multi_reduction <maximumf>, %97, %cst_51 [1] : vector<10x10xf32> to vector<10xf32>
    %99 = vector.shape_cast %98 : vector<10xf32> to vector<10x1xf32>
    %100 = vector.broadcast %99 : vector<10x1xf32> to vector<10x10xf32>
    %101 = arith.subf %97, %100 : vector<10x10xf32>
    %102 = math.exp %101 : vector<10x10xf32>
    %cst_52 = arith.constant dense<0.000000e+00> : vector<10xf32>
    %103 = vector.multi_reduction <add>, %102, %cst_52 [1] : vector<10x10xf32> to vector<10xf32>
    %104 = vector.shape_cast %103 : vector<10xf32> to vector<10x1xf32>
    %105 = tpu.reciprocal %104 {approx = true} : vector<10x1xf32> -> vector<10x1xf32>
    %106 = vector.broadcast %7 : vector<1x32xf32> to vector<10x32xf32>
    %107 = arith.mulf %88, %106 : vector<10x32xf32>
    %108 = arith.truncf %102 : vector<10x10xf32> to vector<10x10xbf16>
    %109 = arith.truncf %107 : vector<10x32xf32> to vector<10x32xbf16>
    %cst_53 = arith.constant dense<0.000000e+00> : vector<10x32xf32>
    %110 = tpu.matmul %108, %109, %cst_53 {dimension_numbers = #tpu.dot_dimension_numbers<[1], [0], [0], [1], [0, 0, 1, 1], [], []>} : vector<10x10xbf16>, vector<10x32xbf16>, vector<10x32xf32> -> vector<10x32xf32>
    %111 = vector.broadcast %105 : vector<10x1xf32> to vector<10x32xf32>
    %112 = arith.mulf %110, %111 : vector<10x32xf32>
    %113 = arith.addf %89, %112 : vector<10x32xf32>
    %114 = vector.broadcast %14 : vector<1x32xf32> to vector<10x32xf32>
    %115 = arith.mulf %72, %114 : vector<10x32xf32>
    %116 = arith.truncf %115 : vector<10x32xf32> to vector<10x32xbf16>
    %117 = arith.truncf %80 : vector<10x32xf32> to vector<10x32xbf16>
    %cst_54 = arith.constant dense<0.000000e+00> : vector<10x10xf32>
    %118 = tpu.matmul %116, %117, %cst_54 {dimension_numbers = #tpu.dot_dimension_numbers<[1], [1], [0], [0], [0, 0, 1, 0], [], []>} : vector<10x32xbf16>, vector<10x32xbf16>, vector<10x10xf32> -> vector<10x10xf32>
    %cst_55 = arith.constant 0.353553385 : f32
    %119 = vector.broadcast %cst_55 : f32 to vector<10x10xf32>
    %120 = arith.mulf %118, %119 : vector<10x10xf32>
    %121 = arith.addf %120, %29 : vector<10x10xf32>
    %cst_56 = arith.constant dense<0xFF800000> : vector<10xf32>
    %122 = vector.multi_reduction <maximumf>, %121, %cst_56 [1] : vector<10x10xf32> to vector<10xf32>
    %123 = vector.shape_cast %122 : vector<10xf32> to vector<10x1xf32>
    %124 = vector.broadcast %123 : vector<10x1xf32> to vector<10x10xf32>
    %125 = arith.subf %121, %124 : vector<10x10xf32>
    %126 = math.exp %125 : vector<10x10xf32>
    %cst_57 = arith.constant dense<0.000000e+00> : vector<10xf32>
    %127 = vector.multi_reduction <add>, %126, %cst_57 [1] : vector<10x10xf32> to vector<10xf32>
    %128 = vector.shape_cast %127 : vector<10xf32> to vector<10x1xf32>
    %129 = tpu.reciprocal %128 {approx = true} : vector<10x1xf32> -> vector<10x1xf32>
    %130 = vector.broadcast %14 : vector<1x32xf32> to vector<10x32xf32>
    %131 = arith.mulf %88, %130 : vector<10x32xf32>
    %132 = arith.truncf %126 : vector<10x10xf32> to vector<10x10xbf16>
    %133 = arith.truncf %131 : vector<10x32xf32> to vector<10x32xbf16>
    %cst_58 = arith.constant dense<0.000000e+00> : vector<10x32xf32>
    %134 = tpu.matmul %132, %133, %cst_58 {dimension_numbers = #tpu.dot_dimension_numbers<[1], [0], [0], [1], [0, 0, 1, 1], [], []>} : vector<10x10xbf16>, vector<10x32xbf16>, vector<10x32xf32> -> vector<10x32xf32>
    %135 = vector.broadcast %129 : vector<10x1xf32> to vector<10x32xf32>
    %136 = arith.mulf %134, %135 : vector<10x32xf32>
    %137 = arith.addf %113, %136 : vector<10x32xf32>
    %138 = vector.broadcast %21 : vector<1x32xf32> to vector<10x32xf32>
    %139 = arith.mulf %72, %138 : vector<10x32xf32>
    %140 = arith.truncf %139 : vector<10x32xf32> to vector<10x32xbf16>
    %141 = arith.truncf %80 : vector<10x32xf32> to vector<10x32xbf16>
    %cst_59 = arith.constant dense<0.000000e+00> : vector<10x10xf32>
    %142 = tpu.matmul %140, %141, %cst_59 {dimension_numbers = #tpu.dot_dimension_numbers<[1], [1], [0], [0], [0, 0, 1, 0], [], []>} : vector<10x32xbf16>, vector<10x32xbf16>, vector<10x10xf32> -> vector<10x10xf32>
    %cst_60 = arith.constant 0.353553385 : f32
    %143 = vector.broadcast %cst_60 : f32 to vector<10x10xf32>
    %144 = arith.mulf %142, %143 : vector<10x10xf32>
    %145 = arith.addf %144, %29 : vector<10x10xf32>
    %cst_61 = arith.constant dense<0xFF800000> : vector<10xf32>
    %146 = vector.multi_reduction <maximumf>, %145, %cst_61 [1] : vector<10x10xf32> to vector<10xf32>
    %147 = vector.shape_cast %146 : vector<10xf32> to vector<10x1xf32>
    %148 = vector.broadcast %147 : vector<10x1xf32> to vector<10x10xf32>
    %149 = arith.subf %145, %148 : vector<10x10xf32>
    %150 = math.exp %149 : vector<10x10xf32>
    %cst_62 = arith.constant dense<0.000000e+00> : vector<10xf32>
    %151 = vector.multi_reduction <add>, %150, %cst_62 [1] : vector<10x10xf32> to vector<10xf32>
    %152 = vector.shape_cast %151 : vector<10xf32> to vector<10x1xf32>
    %153 = tpu.reciprocal %152 {approx = true} : vector<10x1xf32> -> vector<10x1xf32>
    %154 = vector.broadcast %21 : vector<1x32xf32> to vector<10x32xf32>
    %155 = arith.mulf %88, %154 : vector<10x32xf32>
    %156 = arith.truncf %150 : vector<10x10xf32> to vector<10x10xbf16>
    %157 = arith.truncf %155 : vector<10x32xf32> to vector<10x32xbf16>
    %cst_63 = arith.constant dense<0.000000e+00> : vector<10x32xf32>
    %158 = tpu.matmul %156, %157, %cst_63 {dimension_numbers = #tpu.dot_dimension_numbers<[1], [0], [0], [1], [0, 0, 1, 1], [], []>} : vector<10x10xbf16>, vector<10x32xbf16>, vector<10x32xf32> -> vector<10x32xf32>
    %159 = vector.broadcast %153 : vector<10x1xf32> to vector<10x32xf32>
    %160 = arith.mulf %158, %159 : vector<10x32xf32>
    %161 = arith.addf %137, %160 : vector<10x32xf32>
    %162 = vector.broadcast %28 : vector<1x32xf32> to vector<10x32xf32>
    %163 = arith.mulf %72, %162 : vector<10x32xf32>
    %164 = arith.truncf %163 : vector<10x32xf32> to vector<10x32xbf16>
    %165 = arith.truncf %80 : vector<10x32xf32> to vector<10x32xbf16>
    %cst_64 = arith.constant dense<0.000000e+00> : vector<10x10xf32>
    %166 = tpu.matmul %164, %165, %cst_64 {dimension_numbers = #tpu.dot_dimension_numbers<[1], [1], [0], [0], [0, 0, 1, 0], [], []>} : vector<10x32xbf16>, vector<10x32xbf16>, vector<10x10xf32> -> vector<10x10xf32>
    %cst_65 = arith.constant 0.353553385 : f32
    %167 = vector.broadcast %cst_65 : f32 to vector<10x10xf32>
    %168 = arith.mulf %166, %167 : vector<10x10xf32>
    %169 = arith.addf %168, %29 : vector<10x10xf32>
    %cst_66 = arith.constant dense<0xFF800000> : vector<10xf32>
    %170 = vector.multi_reduction <maximumf>, %169, %cst_66 [1] : vector<10x10xf32> to vector<10xf32>
    %171 = vector.shape_cast %170 : vector<10xf32> to vector<10x1xf32>
    %172 = vector.broadcast %171 : vector<10x1xf32> to vector<10x10xf32>
    %173 = arith.subf %169, %172 : vector<10x10xf32>
    %174 = math.exp %173 : vector<10x10xf32>
    %cst_67 = arith.constant dense<0.000000e+00> : vector<10xf32>
    %175 = vector.multi_reduction <add>, %174, %cst_67 [1] : vector<10x10xf32> to vector<10xf32>
    %176 = vector.shape_cast %175 : vector<10xf32> to vector<10x1xf32>
    %177 = tpu.reciprocal %176 {approx = true} : vector<10x1xf32> -> vector<10x1xf32>
    %178 = vector.broadcast %28 : vector<1x32xf32> to vector<10x32xf32>
    %179 = arith.mulf %88, %178 : vector<10x32xf32>
    %180 = arith.truncf %174 : vector<10x10xf32> to vector<10x10xbf16>
    %181 = arith.truncf %179 : vector<10x32xf32> to vector<10x32xbf16>
    %cst_68 = arith.constant dense<0.000000e+00> : vector<10x32xf32>
    %182 = tpu.matmul %180, %181, %cst_68 {dimension_numbers = #tpu.dot_dimension_numbers<[1], [0], [0], [1], [0, 0, 1, 1], [], []>} : vector<10x10xbf16>, vector<10x32xbf16>, vector<10x32xf32> -> vector<10x32xf32>
    %183 = vector.broadcast %177 : vector<10x1xf32> to vector<10x32xf32>
    %184 = arith.mulf %182, %183 : vector<10x32xf32>
    %185 = arith.addf %161, %184 : vector<10x32xf32>
    %c0_69 = arith.constant 0 : index
    %c0_70 = arith.constant 0 : index
    %c0_71 = arith.constant 0 : index
    %186 = vector.load %arg12[%c0_69, %c0_70, %c0_71] : memref<2x32x32xbf16, #tpu.memory_space<vmem>>, vector<1x32x32xbf16>
    %187 = vector.shape_cast %186 : vector<1x32x32xbf16> to vector<32x32xbf16>
    %188 = arith.truncf %185 : vector<10x32xf32> to vector<10x32xbf16>
    %cst_72 = arith.constant dense<0.000000e+00> : vector<10x32xf32>
    %189 = tpu.matmul %188, %187, %cst_72 {dimension_numbers = #tpu.dot_dimension_numbers<[1], [0], [0], [1], [0, 0, 1, 1], [], []>} : vector<10x32xbf16>, vector<32x32xbf16>, vector<10x32xf32> -> vector<10x32xf32>
    %190 = arith.addf %40, %189 : vector<10x32xf32>
    %c0_73 = arith.constant 0 : index
    %c0_74 = arith.constant 0 : index
    %c0_75 = arith.constant 0 : index
    %191 = vector.load %arg13[%c0_73, %c0_74, %c0_75] : memref<2x1x32xf32, #tpu.memory_space<vmem>>, vector<1x1x32xf32>
    %192 = vector.shape_cast %191 : vector<1x1x32xf32> to vector<1x32xf32>
    %193 = vector.broadcast %192 : vector<1x32xf32> to vector<10x32xf32>
    %194 = arith.addf %190, %193 : vector<10x32xf32>
    %c0_76 = arith.constant 0 : index
    %c0_77 = arith.constant 0 : index
    %c0_78 = arith.constant 0 : index
    %195 = vector.load %arg14[%c0_76, %c0_77, %c0_78] : memref<2x1x32xf32, #tpu.memory_space<vmem>>, vector<1x1x32xf32>
    %196 = vector.shape_cast %195 : vector<1x1x32xf32> to vector<1x32xf32>
    %c0_79 = arith.constant 0 : index
    %c0_80 = arith.constant 0 : index
    %c0_81 = arith.constant 0 : index
    %197 = vector.load %arg15[%c0_79, %c0_80, %c0_81] : memref<2x1x32xf32, #tpu.memory_space<vmem>>, vector<1x1x32xf32>
    %198 = vector.shape_cast %197 : vector<1x1x32xf32> to vector<1x32xf32>
    %cst_82 = arith.constant dense<0.000000e+00> : vector<10xf32>
    %199 = vector.multi_reduction <add>, %194, %cst_82 [1] : vector<10x32xf32> to vector<10xf32>
    %200 = vector.shape_cast %199 : vector<10xf32> to vector<10x1xf32>
    %cst_83 = arith.constant 3.200000e+01 : f32
    %201 = vector.broadcast %cst_83 : f32 to vector<10x1xf32>
    %202 = arith.divf %200, %201 : vector<10x1xf32>
    %203 = vector.broadcast %202 : vector<10x1xf32> to vector<10x32xf32>
    %204 = arith.subf %194, %203 : vector<10x32xf32>
    %205 = arith.mulf %204, %204 : vector<10x32xf32>
    %cst_84 = arith.constant dense<0.000000e+00> : vector<10xf32>
    %206 = vector.multi_reduction <add>, %205, %cst_84 [1] : vector<10x32xf32> to vector<10xf32>
    %207 = vector.shape_cast %206 : vector<10xf32> to vector<10x1xf32>
    %cst_85 = arith.constant 3.200000e+01 : f32
    %208 = vector.broadcast %cst_85 : f32 to vector<10x1xf32>
    %209 = arith.divf %207, %208 : vector<10x1xf32>
    %cst_86 = arith.constant 9.99999997E-7 : f32
    %210 = vector.broadcast %cst_86 : f32 to vector<10x1xf32>
    %211 = arith.addf %209, %210 : vector<10x1xf32>
    %212 = math.rsqrt %211 : vector<10x1xf32>
    %213 = vector.broadcast %212 : vector<10x1xf32> to vector<10x32xf32>
    %214 = arith.mulf %204, %213 : vector<10x32xf32>
    %215 = vector.broadcast %196 : vector<1x32xf32> to vector<10x32xf32>
    %216 = arith.mulf %214, %215 : vector<10x32xf32>
    %217 = vector.broadcast %198 : vector<1x32xf32> to vector<10x32xf32>
    %218 = arith.addf %216, %217 : vector<10x32xf32>
    %c0_87 = arith.constant 0 : index
    %c0_88 = arith.constant 0 : index
    %c0_89 = arith.constant 0 : index
    %219 = vector.load %arg16[%c0_87, %c0_88, %c0_89] : memref<2x32x128xbf16, #tpu.memory_space<vmem>>, vector<1x32x128xbf16>
    %220 = vector.shape_cast %219 : vector<1x32x128xbf16> to vector<32x128xbf16>
    %221 = arith.truncf %218 : vector<10x32xf32> to vector<10x32xbf16>
    %cst_90 = arith.constant dense<0.000000e+00> : vector<10x128xf32>
    %222 = tpu.matmul %221, %220, %cst_90 {dimension_numbers = #tpu.dot_dimension_numbers<[1], [0], [0], [1], [0, 0, 1, 1], [], []>} : vector<10x32xbf16>, vector<32x128xbf16>, vector<10x128xf32> -> vector<10x128xf32>
    %c0_91 = arith.constant 0 : index
    %c0_92 = arith.constant 0 : index
    %c0_93 = arith.constant 0 : index
    %223 = vector.load %arg17[%c0_91, %c0_92, %c0_93] : memref<2x1x128xf32, #tpu.memory_space<vmem>>, vector<1x1x128xf32>
    %224 = vector.shape_cast %223 : vector<1x1x128xf32> to vector<1x128xf32>
    %225 = vector.broadcast %224 : vector<1x128xf32> to vector<10x128xf32>
    %226 = arith.addf %222, %225 : vector<10x128xf32>
    %cst_94 = arith.constant 5.000000e-01 : f32
    %227 = vector.broadcast %cst_94 : f32 to vector<10x128xf32>
    %228 = arith.mulf %227, %226 : vector<10x128xf32>
    %cst_95 = arith.constant 0.707106769 : f32
    %229 = vector.broadcast %cst_95 : f32 to vector<10x128xf32>
    %230 = arith.mulf %226, %229 : vector<10x128xf32>
    %231 = math.erf %230 : vector<10x128xf32>
    %cst_96 = arith.constant 1.000000e+00 : f32
    %232 = vector.broadcast %cst_96 : f32 to vector<10x128xf32>
    %233 = arith.addf %232, %231 : vector<10x128xf32>
    %234 = arith.mulf %228, %233 : vector<10x128xf32>
    %c0_97 = arith.constant 0 : index
    %c0_98 = arith.constant 0 : index
    %c0_99 = arith.constant 0 : index
    %235 = vector.load %arg18[%c0_97, %c0_98, %c0_99] : memref<2x128x32xbf16, #tpu.memory_space<vmem>>, vector<1x128x32xbf16>
    %236 = vector.shape_cast %235 : vector<1x128x32xbf16> to vector<128x32xbf16>
    %237 = arith.truncf %234 : vector<10x128xf32> to vector<10x128xbf16>
    %cst_100 = arith.constant dense<0.000000e+00> : vector<10x32xf32>
    %238 = tpu.matmul %237, %236, %cst_100 {dimension_numbers = #tpu.dot_dimension_numbers<[1], [0], [0], [1], [0, 0, 1, 1], [], []>} : vector<10x128xbf16>, vector<128x32xbf16>, vector<10x32xf32> -> vector<10x32xf32>
    %239 = arith.addf %194, %238 : vector<10x32xf32>
    %c0_101 = arith.constant 0 : index
    %c0_102 = arith.constant 0 : index
    %c0_103 = arith.constant 0 : index
    %240 = vector.load %arg19[%c0_101, %c0_102, %c0_103] : memref<2x1x32xf32, #tpu.memory_space<vmem>>, vector<1x1x32xf32>
    %241 = vector.shape_cast %240 : vector<1x1x32xf32> to vector<1x32xf32>
    %242 = vector.broadcast %241 : vector<1x32xf32> to vector<10x32xf32>
    %243 = arith.addf %239, %242 : vector<10x32xf32>
    %c1 = arith.constant 1 : index
    %c0_104 = arith.constant 0 : index
    %c0_105 = arith.constant 0 : index
    %244 = vector.load %arg4[%c1, %c0_104, %c0_105] : memref<2x1x32xf32, #tpu.memory_space<vmem>>, vector<1x1x32xf32>
    %245 = vector.shape_cast %244 : vector<1x1x32xf32> to vector<1x32xf32>
    %c1_106 = arith.constant 1 : index
    %c0_107 = arith.constant 0 : index
    %c0_108 = arith.constant 0 : index
    %246 = vector.load %arg5[%c1_106, %c0_107, %c0_108] : memref<2x1x32xf32, #tpu.memory_space<vmem>>, vector<1x1x32xf32>
    %247 = vector.shape_cast %246 : vector<1x1x32xf32> to vector<1x32xf32>
    %cst_109 = arith.constant dense<0.000000e+00> : vector<10xf32>
    %248 = vector.multi_reduction <add>, %243, %cst_109 [1] : vector<10x32xf32> to vector<10xf32>
    %249 = vector.shape_cast %248 : vector<10xf32> to vector<10x1xf32>
    %cst_110 = arith.constant 3.200000e+01 : f32
    %250 = vector.broadcast %cst_110 : f32 to vector<10x1xf32>
    %251 = arith.divf %249, %250 : vector<10x1xf32>
    %252 = vector.broadcast %251 : vector<10x1xf32> to vector<10x32xf32>
    %253 = arith.subf %243, %252 : vector<10x32xf32>
    %254 = arith.mulf %253, %253 : vector<10x32xf32>
    %cst_111 = arith.constant dense<0.000000e+00> : vector<10xf32>
    %255 = vector.multi_reduction <add>, %254, %cst_111 [1] : vector<10x32xf32> to vector<10xf32>
    %256 = vector.shape_cast %255 : vector<10xf32> to vector<10x1xf32>
    %cst_112 = arith.constant 3.200000e+01 : f32
    %257 = vector.broadcast %cst_112 : f32 to vector<10x1xf32>
    %258 = arith.divf %256, %257 : vector<10x1xf32>
    %cst_113 = arith.constant 9.99999997E-7 : f32
    %259 = vector.broadcast %cst_113 : f32 to vector<10x1xf32>
    %260 = arith.addf %258, %259 : vector<10x1xf32>
    %261 = math.rsqrt %260 : vector<10x1xf32>
    %262 = vector.broadcast %261 : vector<10x1xf32> to vector<10x32xf32>
    %263 = arith.mulf %253, %262 : vector<10x32xf32>
    %264 = vector.broadcast %245 : vector<1x32xf32> to vector<10x32xf32>
    %265 = arith.mulf %263, %264 : vector<10x32xf32>
    %266 = vector.broadcast %247 : vector<1x32xf32> to vector<10x32xf32>
    %267 = arith.addf %265, %266 : vector<10x32xf32>
    %c1_114 = arith.constant 1 : index
    %c0_115 = arith.constant 0 : index
    %c0_116 = arith.constant 0 : index
    %268 = vector.load %arg6[%c1_114, %c0_115, %c0_116] : memref<2x32x32xbf16, #tpu.memory_space<vmem>>, vector<1x32x32xbf16>
    %269 = vector.shape_cast %268 : vector<1x32x32xbf16> to vector<32x32xbf16>
    %270 = arith.truncf %267 : vector<10x32xf32> to vector<10x32xbf16>
    %cst_117 = arith.constant dense<0.000000e+00> : vector<10x32xf32>
    %271 = tpu.matmul %270, %269, %cst_117 {dimension_numbers = #tpu.dot_dimension_numbers<[1], [0], [0], [1], [0, 0, 1, 1], [], []>} : vector<10x32xbf16>, vector<32x32xbf16>, vector<10x32xf32> -> vector<10x32xf32>
    %c1_118 = arith.constant 1 : index
    %c0_119 = arith.constant 0 : index
    %c0_120 = arith.constant 0 : index
    %272 = vector.load %arg7[%c1_118, %c0_119, %c0_120] : memref<2x1x32xf32, #tpu.memory_space<vmem>>, vector<1x1x32xf32>
    %273 = vector.shape_cast %272 : vector<1x1x32xf32> to vector<1x32xf32>
    %274 = vector.broadcast %273 : vector<1x32xf32> to vector<10x32xf32>
    %275 = arith.addf %271, %274 : vector<10x32xf32>
    %c1_121 = arith.constant 1 : index
    %c0_122 = arith.constant 0 : index
    %c0_123 = arith.constant 0 : index
    %276 = vector.load %arg8[%c1_121, %c0_122, %c0_123] : memref<2x32x32xbf16, #tpu.memory_space<vmem>>, vector<1x32x32xbf16>
    %277 = vector.shape_cast %276 : vector<1x32x32xbf16> to vector<32x32xbf16>
    %278 = arith.truncf %267 : vector<10x32xf32> to vector<10x32xbf16>
    %cst_124 = arith.constant dense<0.000000e+00> : vector<10x32xf32>
    %279 = tpu.matmul %278, %277, %cst_124 {dimension_numbers = #tpu.dot_dimension_numbers<[1], [0], [0], [1], [0, 0, 1, 1], [], []>} : vector<10x32xbf16>, vector<32x32xbf16>, vector<10x32xf32> -> vector<10x32xf32>
    %c1_125 = arith.constant 1 : index
    %c0_126 = arith.constant 0 : index
    %c0_127 = arith.constant 0 : index
    %280 = vector.load %arg9[%c1_125, %c0_126, %c0_127] : memref<2x1x32xf32, #tpu.memory_space<vmem>>, vector<1x1x32xf32>
    %281 = vector.shape_cast %280 : vector<1x1x32xf32> to vector<1x32xf32>
    %282 = vector.broadcast %281 : vector<1x32xf32> to vector<10x32xf32>
    %283 = arith.addf %279, %282 : vector<10x32xf32>
    %c1_128 = arith.constant 1 : index
    %c0_129 = arith.constant 0 : index
    %c0_130 = arith.constant 0 : index
    %284 = vector.load %arg10[%c1_128, %c0_129, %c0_130] : memref<2x32x32xbf16, #tpu.memory_space<vmem>>, vector<1x32x32xbf16>
    %285 = vector.shape_cast %284 : vector<1x32x32xbf16> to vector<32x32xbf16>
    %286 = arith.truncf %267 : vector<10x32xf32> to vector<10x32xbf16>
    %cst_131 = arith.constant dense<0.000000e+00> : vector<10x32xf32>
    %287 = tpu.matmul %286, %285, %cst_131 {dimension_numbers = #tpu.dot_dimension_numbers<[1], [0], [0], [1], [0, 0, 1, 1], [], []>} : vector<10x32xbf16>, vector<32x32xbf16>, vector<10x32xf32> -> vector<10x32xf32>
    %c1_132 = arith.constant 1 : index
    %c0_133 = arith.constant 0 : index
    %c0_134 = arith.constant 0 : index
    %288 = vector.load %arg11[%c1_132, %c0_133, %c0_134] : memref<2x1x32xf32, #tpu.memory_space<vmem>>, vector<1x1x32xf32>
    %289 = vector.shape_cast %288 : vector<1x1x32xf32> to vector<1x32xf32>
    %290 = vector.broadcast %289 : vector<1x32xf32> to vector<10x32xf32>
    %291 = arith.addf %287, %290 : vector<10x32xf32>
    %cst_135 = arith.constant 0.000000e+00 : f32
    %292 = vector.broadcast %cst_135 : f32 to vector<10x32xf32>
    %293 = vector.broadcast %7 : vector<1x32xf32> to vector<10x32xf32>
    %294 = arith.mulf %275, %293 : vector<10x32xf32>
    %295 = arith.truncf %294 : vector<10x32xf32> to vector<10x32xbf16>
    %296 = arith.truncf %283 : vector<10x32xf32> to vector<10x32xbf16>
    %cst_136 = arith.constant dense<0.000000e+00> : vector<10x10xf32>
    %297 = tpu.matmul %295, %296, %cst_136 {dimension_numbers = #tpu.dot_dimension_numbers<[1], [1], [0], [0], [0, 0, 1, 0], [], []>} : vector<10x32xbf16>, vector<10x32xbf16>, vector<10x10xf32> -> vector<10x10xf32>
    %cst_137 = arith.constant 0.353553385 : f32
    %298 = vector.broadcast %cst_137 : f32 to vector<10x10xf32>
    %299 = arith.mulf %297, %298 : vector<10x10xf32>
    %300 = arith.addf %299, %29 : vector<10x10xf32>
    %cst_138 = arith.constant dense<0xFF800000> : vector<10xf32>
    %301 = vector.multi_reduction <maximumf>, %300, %cst_138 [1] : vector<10x10xf32> to vector<10xf32>
    %302 = vector.shape_cast %301 : vector<10xf32> to vector<10x1xf32>
    %303 = vector.broadcast %302 : vector<10x1xf32> to vector<10x10xf32>
    %304 = arith.subf %300, %303 : vector<10x10xf32>
    %305 = math.exp %304 : vector<10x10xf32>
    %cst_139 = arith.constant dense<0.000000e+00> : vector<10xf32>
    %306 = vector.multi_reduction <add>, %305, %cst_139 [1] : vector<10x10xf32> to vector<10xf32>
    %307 = vector.shape_cast %306 : vector<10xf32> to vector<10x1xf32>
    %308 = tpu.reciprocal %307 {approx = true} : vector<10x1xf32> -> vector<10x1xf32>
    %309 = vector.broadcast %7 : vector<1x32xf32> to vector<10x32xf32>
    %310 = arith.mulf %291, %309 : vector<10x32xf32>
    %311 = arith.truncf %305 : vector<10x10xf32> to vector<10x10xbf16>
    %312 = arith.truncf %310 : vector<10x32xf32> to vector<10x32xbf16>
    %cst_140 = arith.constant dense<0.000000e+00> : vector<10x32xf32>
    %313 = tpu.matmul %311, %312, %cst_140 {dimension_numbers = #tpu.dot_dimension_numbers<[1], [0], [0], [1], [0, 0, 1, 1], [], []>} : vector<10x10xbf16>, vector<10x32xbf16>, vector<10x32xf32> -> vector<10x32xf32>
    %314 = vector.broadcast %308 : vector<10x1xf32> to vector<10x32xf32>
    %315 = arith.mulf %313, %314 : vector<10x32xf32>
    %316 = arith.addf %292, %315 : vector<10x32xf32>
    %317 = vector.broadcast %14 : vector<1x32xf32> to vector<10x32xf32>
    %318 = arith.mulf %275, %317 : vector<10x32xf32>
    %319 = arith.truncf %318 : vector<10x32xf32> to vector<10x32xbf16>
    %320 = arith.truncf %283 : vector<10x32xf32> to vector<10x32xbf16>
    %cst_141 = arith.constant dense<0.000000e+00> : vector<10x10xf32>
    %321 = tpu.matmul %319, %320, %cst_141 {dimension_numbers = #tpu.dot_dimension_numbers<[1], [1], [0], [0], [0, 0, 1, 0], [], []>} : vector<10x32xbf16>, vector<10x32xbf16>, vector<10x10xf32> -> vector<10x10xf32>
    %cst_142 = arith.constant 0.353553385 : f32
    %322 = vector.broadcast %cst_142 : f32 to vector<10x10xf32>
    %323 = arith.mulf %321, %322 : vector<10x10xf32>
    %324 = arith.addf %323, %29 : vector<10x10xf32>
    %cst_143 = arith.constant dense<0xFF800000> : vector<10xf32>
    %325 = vector.multi_reduction <maximumf>, %324, %cst_143 [1] : vector<10x10xf32> to vector<10xf32>
    %326 = vector.shape_cast %325 : vector<10xf32> to vector<10x1xf32>
    %327 = vector.broadcast %326 : vector<10x1xf32> to vector<10x10xf32>
    %328 = arith.subf %324, %327 : vector<10x10xf32>
    %329 = math.exp %328 : vector<10x10xf32>
    %cst_144 = arith.constant dense<0.000000e+00> : vector<10xf32>
    %330 = vector.multi_reduction <add>, %329, %cst_144 [1] : vector<10x10xf32> to vector<10xf32>
    %331 = vector.shape_cast %330 : vector<10xf32> to vector<10x1xf32>
    %332 = tpu.reciprocal %331 {approx = true} : vector<10x1xf32> -> vector<10x1xf32>
    %333 = vector.broadcast %14 : vector<1x32xf32> to vector<10x32xf32>
    %334 = arith.mulf %291, %333 : vector<10x32xf32>
    %335 = arith.truncf %329 : vector<10x10xf32> to vector<10x10xbf16>
    %336 = arith.truncf %334 : vector<10x32xf32> to vector<10x32xbf16>
    %cst_145 = arith.constant dense<0.000000e+00> : vector<10x32xf32>
    %337 = tpu.matmul %335, %336, %cst_145 {dimension_numbers = #tpu.dot_dimension_numbers<[1], [0], [0], [1], [0, 0, 1, 1], [], []>} : vector<10x10xbf16>, vector<10x32xbf16>, vector<10x32xf32> -> vector<10x32xf32>
    %338 = vector.broadcast %332 : vector<10x1xf32> to vector<10x32xf32>
    %339 = arith.mulf %337, %338 : vector<10x32xf32>
    %340 = arith.addf %316, %339 : vector<10x32xf32>
    %341 = vector.broadcast %21 : vector<1x32xf32> to vector<10x32xf32>
    %342 = arith.mulf %275, %341 : vector<10x32xf32>
    %343 = arith.truncf %342 : vector<10x32xf32> to vector<10x32xbf16>
    %344 = arith.truncf %283 : vector<10x32xf32> to vector<10x32xbf16>
    %cst_146 = arith.constant dense<0.000000e+00> : vector<10x10xf32>
    %345 = tpu.matmul %343, %344, %cst_146 {dimension_numbers = #tpu.dot_dimension_numbers<[1], [1], [0], [0], [0, 0, 1, 0], [], []>} : vector<10x32xbf16>, vector<10x32xbf16>, vector<10x10xf32> -> vector<10x10xf32>
    %cst_147 = arith.constant 0.353553385 : f32
    %346 = vector.broadcast %cst_147 : f32 to vector<10x10xf32>
    %347 = arith.mulf %345, %346 : vector<10x10xf32>
    %348 = arith.addf %347, %29 : vector<10x10xf32>
    %cst_148 = arith.constant dense<0xFF800000> : vector<10xf32>
    %349 = vector.multi_reduction <maximumf>, %348, %cst_148 [1] : vector<10x10xf32> to vector<10xf32>
    %350 = vector.shape_cast %349 : vector<10xf32> to vector<10x1xf32>
    %351 = vector.broadcast %350 : vector<10x1xf32> to vector<10x10xf32>
    %352 = arith.subf %348, %351 : vector<10x10xf32>
    %353 = math.exp %352 : vector<10x10xf32>
    %cst_149 = arith.constant dense<0.000000e+00> : vector<10xf32>
    %354 = vector.multi_reduction <add>, %353, %cst_149 [1] : vector<10x10xf32> to vector<10xf32>
    %355 = vector.shape_cast %354 : vector<10xf32> to vector<10x1xf32>
    %356 = tpu.reciprocal %355 {approx = true} : vector<10x1xf32> -> vector<10x1xf32>
    %357 = vector.broadcast %21 : vector<1x32xf32> to vector<10x32xf32>
    %358 = arith.mulf %291, %357 : vector<10x32xf32>
    %359 = arith.truncf %353 : vector<10x10xf32> to vector<10x10xbf16>
    %360 = arith.truncf %358 : vector<10x32xf32> to vector<10x32xbf16>
    %cst_150 = arith.constant dense<0.000000e+00> : vector<10x32xf32>
    %361 = tpu.matmul %359, %360, %cst_150 {dimension_numbers = #tpu.dot_dimension_numbers<[1], [0], [0], [1], [0, 0, 1, 1], [], []>} : vector<10x10xbf16>, vector<10x32xbf16>, vector<10x32xf32> -> vector<10x32xf32>
    %362 = vector.broadcast %356 : vector<10x1xf32> to vector<10x32xf32>
    %363 = arith.mulf %361, %362 : vector<10x32xf32>
    %364 = arith.addf %340, %363 : vector<10x32xf32>
    %365 = vector.broadcast %28 : vector<1x32xf32> to vector<10x32xf32>
    %366 = arith.mulf %275, %365 : vector<10x32xf32>
    %367 = arith.truncf %366 : vector<10x32xf32> to vector<10x32xbf16>
    %368 = arith.truncf %283 : vector<10x32xf32> to vector<10x32xbf16>
    %cst_151 = arith.constant dense<0.000000e+00> : vector<10x10xf32>
    %369 = tpu.matmul %367, %368, %cst_151 {dimension_numbers = #tpu.dot_dimension_numbers<[1], [1], [0], [0], [0, 0, 1, 0], [], []>} : vector<10x32xbf16>, vector<10x32xbf16>, vector<10x10xf32> -> vector<10x10xf32>
    %cst_152 = arith.constant 0.353553385 : f32
    %370 = vector.broadcast %cst_152 : f32 to vector<10x10xf32>
    %371 = arith.mulf %369, %370 : vector<10x10xf32>
    %372 = arith.addf %371, %29 : vector<10x10xf32>
    %cst_153 = arith.constant dense<0xFF800000> : vector<10xf32>
    %373 = vector.multi_reduction <maximumf>, %372, %cst_153 [1] : vector<10x10xf32> to vector<10xf32>
    %374 = vector.shape_cast %373 : vector<10xf32> to vector<10x1xf32>
    %375 = vector.broadcast %374 : vector<10x1xf32> to vector<10x10xf32>
    %376 = arith.subf %372, %375 : vector<10x10xf32>
    %377 = math.exp %376 : vector<10x10xf32>
    %cst_154 = arith.constant dense<0.000000e+00> : vector<10xf32>
    %378 = vector.multi_reduction <add>, %377, %cst_154 [1] : vector<10x10xf32> to vector<10xf32>
    %379 = vector.shape_cast %378 : vector<10xf32> to vector<10x1xf32>
    %380 = tpu.reciprocal %379 {approx = true} : vector<10x1xf32> -> vector<10x1xf32>
    %381 = vector.broadcast %28 : vector<1x32xf32> to vector<10x32xf32>
    %382 = arith.mulf %291, %381 : vector<10x32xf32>
    %383 = arith.truncf %377 : vector<10x10xf32> to vector<10x10xbf16>
    %384 = arith.truncf %382 : vector<10x32xf32> to vector<10x32xbf16>
    %cst_155 = arith.constant dense<0.000000e+00> : vector<10x32xf32>
    %385 = tpu.matmul %383, %384, %cst_155 {dimension_numbers = #tpu.dot_dimension_numbers<[1], [0], [0], [1], [0, 0, 1, 1], [], []>} : vector<10x10xbf16>, vector<10x32xbf16>, vector<10x32xf32> -> vector<10x32xf32>
    %386 = vector.broadcast %380 : vector<10x1xf32> to vector<10x32xf32>
    %387 = arith.mulf %385, %386 : vector<10x32xf32>
    %388 = arith.addf %364, %387 : vector<10x32xf32>
    %c1_156 = arith.constant 1 : index
    %c0_157 = arith.constant 0 : index
    %c0_158 = arith.constant 0 : index
    %389 = vector.load %arg12[%c1_156, %c0_157, %c0_158] : memref<2x32x32xbf16, #tpu.memory_space<vmem>>, vector<1x32x32xbf16>
    %390 = vector.shape_cast %389 : vector<1x32x32xbf16> to vector<32x32xbf16>
    %391 = arith.truncf %388 : vector<10x32xf32> to vector<10x32xbf16>
    %cst_159 = arith.constant dense<0.000000e+00> : vector<10x32xf32>
    %392 = tpu.matmul %391, %390, %cst_159 {dimension_numbers = #tpu.dot_dimension_numbers<[1], [0], [0], [1], [0, 0, 1, 1], [], []>} : vector<10x32xbf16>, vector<32x32xbf16>, vector<10x32xf32> -> vector<10x32xf32>
    %393 = arith.addf %243, %392 : vector<10x32xf32>
    %c1_160 = arith.constant 1 : index
    %c0_161 = arith.constant 0 : index
    %c0_162 = arith.constant 0 : index
    %394 = vector.load %arg13[%c1_160, %c0_161, %c0_162] : memref<2x1x32xf32, #tpu.memory_space<vmem>>, vector<1x1x32xf32>
    %395 = vector.shape_cast %394 : vector<1x1x32xf32> to vector<1x32xf32>
    %396 = vector.broadcast %395 : vector<1x32xf32> to vector<10x32xf32>
    %397 = arith.addf %393, %396 : vector<10x32xf32>
    %c1_163 = arith.constant 1 : index
    %c0_164 = arith.constant 0 : index
    %c0_165 = arith.constant 0 : index
    %398 = vector.load %arg14[%c1_163, %c0_164, %c0_165] : memref<2x1x32xf32, #tpu.memory_space<vmem>>, vector<1x1x32xf32>
    %399 = vector.shape_cast %398 : vector<1x1x32xf32> to vector<1x32xf32>
    %c1_166 = arith.constant 1 : index
    %c0_167 = arith.constant 0 : index
    %c0_168 = arith.constant 0 : index
    %400 = vector.load %arg15[%c1_166, %c0_167, %c0_168] : memref<2x1x32xf32, #tpu.memory_space<vmem>>, vector<1x1x32xf32>
    %401 = vector.shape_cast %400 : vector<1x1x32xf32> to vector<1x32xf32>
    %cst_169 = arith.constant dense<0.000000e+00> : vector<10xf32>
    %402 = vector.multi_reduction <add>, %397, %cst_169 [1] : vector<10x32xf32> to vector<10xf32>
    %403 = vector.shape_cast %402 : vector<10xf32> to vector<10x1xf32>
    %cst_170 = arith.constant 3.200000e+01 : f32
    %404 = vector.broadcast %cst_170 : f32 to vector<10x1xf32>
    %405 = arith.divf %403, %404 : vector<10x1xf32>
    %406 = vector.broadcast %405 : vector<10x1xf32> to vector<10x32xf32>
    %407 = arith.subf %397, %406 : vector<10x32xf32>
    %408 = arith.mulf %407, %407 : vector<10x32xf32>
    %cst_171 = arith.constant dense<0.000000e+00> : vector<10xf32>
    %409 = vector.multi_reduction <add>, %408, %cst_171 [1] : vector<10x32xf32> to vector<10xf32>
    %410 = vector.shape_cast %409 : vector<10xf32> to vector<10x1xf32>
    %cst_172 = arith.constant 3.200000e+01 : f32
    %411 = vector.broadcast %cst_172 : f32 to vector<10x1xf32>
    %412 = arith.divf %410, %411 : vector<10x1xf32>
    %cst_173 = arith.constant 9.99999997E-7 : f32
    %413 = vector.broadcast %cst_173 : f32 to vector<10x1xf32>
    %414 = arith.addf %412, %413 : vector<10x1xf32>
    %415 = math.rsqrt %414 : vector<10x1xf32>
    %416 = vector.broadcast %415 : vector<10x1xf32> to vector<10x32xf32>
    %417 = arith.mulf %407, %416 : vector<10x32xf32>
    %418 = vector.broadcast %399 : vector<1x32xf32> to vector<10x32xf32>
    %419 = arith.mulf %417, %418 : vector<10x32xf32>
    %420 = vector.broadcast %401 : vector<1x32xf32> to vector<10x32xf32>
    %421 = arith.addf %419, %420 : vector<10x32xf32>
    %c1_174 = arith.constant 1 : index
    %c0_175 = arith.constant 0 : index
    %c0_176 = arith.constant 0 : index
    %422 = vector.load %arg16[%c1_174, %c0_175, %c0_176] : memref<2x32x128xbf16, #tpu.memory_space<vmem>>, vector<1x32x128xbf16>
    %423 = vector.shape_cast %422 : vector<1x32x128xbf16> to vector<32x128xbf16>
    %424 = arith.truncf %421 : vector<10x32xf32> to vector<10x32xbf16>
    %cst_177 = arith.constant dense<0.000000e+00> : vector<10x128xf32>
    %425 = tpu.matmul %424, %423, %cst_177 {dimension_numbers = #tpu.dot_dimension_numbers<[1], [0], [0], [1], [0, 0, 1, 1], [], []>} : vector<10x32xbf16>, vector<32x128xbf16>, vector<10x128xf32> -> vector<10x128xf32>
    %c1_178 = arith.constant 1 : index
    %c0_179 = arith.constant 0 : index
    %c0_180 = arith.constant 0 : index
    %426 = vector.load %arg17[%c1_178, %c0_179, %c0_180] : memref<2x1x128xf32, #tpu.memory_space<vmem>>, vector<1x1x128xf32>
    %427 = vector.shape_cast %426 : vector<1x1x128xf32> to vector<1x128xf32>
    %428 = vector.broadcast %427 : vector<1x128xf32> to vector<10x128xf32>
    %429 = arith.addf %425, %428 : vector<10x128xf32>
    %cst_181 = arith.constant 5.000000e-01 : f32
    %430 = vector.broadcast %cst_181 : f32 to vector<10x128xf32>
    %431 = arith.mulf %430, %429 : vector<10x128xf32>
    %cst_182 = arith.constant 0.707106769 : f32
    %432 = vector.broadcast %cst_182 : f32 to vector<10x128xf32>
    %433 = arith.mulf %429, %432 : vector<10x128xf32>
    %434 = math.erf %433 : vector<10x128xf32>
    %cst_183 = arith.constant 1.000000e+00 : f32
    %435 = vector.broadcast %cst_183 : f32 to vector<10x128xf32>
    %436 = arith.addf %435, %434 : vector<10x128xf32>
    %437 = arith.mulf %431, %436 : vector<10x128xf32>
    %c1_184 = arith.constant 1 : index
    %c0_185 = arith.constant 0 : index
    %c0_186 = arith.constant 0 : index
    %438 = vector.load %arg18[%c1_184, %c0_185, %c0_186] : memref<2x128x32xbf16, #tpu.memory_space<vmem>>, vector<1x128x32xbf16>
    %439 = vector.shape_cast %438 : vector<1x128x32xbf16> to vector<128x32xbf16>
    %440 = arith.truncf %437 : vector<10x128xf32> to vector<10x128xbf16>
    %cst_187 = arith.constant dense<0.000000e+00> : vector<10x32xf32>
    %441 = tpu.matmul %440, %439, %cst_187 {dimension_numbers = #tpu.dot_dimension_numbers<[1], [0], [0], [1], [0, 0, 1, 1], [], []>} : vector<10x128xbf16>, vector<128x32xbf16>, vector<10x32xf32> -> vector<10x32xf32>
    %442 = arith.addf %397, %441 : vector<10x32xf32>
    %c1_188 = arith.constant 1 : index
    %c0_189 = arith.constant 0 : index
    %c0_190 = arith.constant 0 : index
    %443 = vector.load %arg19[%c1_188, %c0_189, %c0_190] : memref<2x1x32xf32, #tpu.memory_space<vmem>>, vector<1x1x32xf32>
    %444 = vector.shape_cast %443 : vector<1x1x32xf32> to vector<1x32xf32>
    %445 = vector.broadcast %444 : vector<1x32xf32> to vector<10x32xf32>
    %446 = arith.addf %442, %445 : vector<10x32xf32>
    %c0_191 = arith.constant 0 : index
    %c0_192 = arith.constant 0 : index
    %447 = vector.load %arg20[%c0_191, %c0_192] : memref<1x32xf32, #tpu.memory_space<vmem>>, vector<1x32xf32>
    %c0_193 = arith.constant 0 : index
    %c0_194 = arith.constant 0 : index
    %448 = vector.load %arg21[%c0_193, %c0_194] : memref<1x32xf32, #tpu.memory_space<vmem>>, vector<1x32xf32>
    %cst_195 = arith.constant dense<0.000000e+00> : vector<10xf32>
    %449 = vector.multi_reduction <add>, %446, %cst_195 [1] : vector<10x32xf32> to vector<10xf32>
    %450 = vector.shape_cast %449 : vector<10xf32> to vector<10x1xf32>
    %cst_196 = arith.constant 3.200000e+01 : f32
    %451 = vector.broadcast %cst_196 : f32 to vector<10x1xf32>
    %452 = arith.divf %450, %451 : vector<10x1xf32>
    %453 = vector.broadcast %452 : vector<10x1xf32> to vector<10x32xf32>
    %454 = arith.subf %446, %453 : vector<10x32xf32>
    %455 = arith.mulf %454, %454 : vector<10x32xf32>
    %cst_197 = arith.constant dense<0.000000e+00> : vector<10xf32>
    %456 = vector.multi_reduction <add>, %455, %cst_197 [1] : vector<10x32xf32> to vector<10xf32>
    %457 = vector.shape_cast %456 : vector<10xf32> to vector<10x1xf32>
    %cst_198 = arith.constant 3.200000e+01 : f32
    %458 = vector.broadcast %cst_198 : f32 to vector<10x1xf32>
    %459 = arith.divf %457, %458 : vector<10x1xf32>
    %cst_199 = arith.constant 9.99999997E-7 : f32
    %460 = vector.broadcast %cst_199 : f32 to vector<10x1xf32>
    %461 = arith.addf %459, %460 : vector<10x1xf32>
    %462 = math.rsqrt %461 : vector<10x1xf32>
    %463 = vector.broadcast %462 : vector<10x1xf32> to vector<10x32xf32>
    %464 = arith.mulf %454, %463 : vector<10x32xf32>
    %465 = vector.broadcast %447 : vector<1x32xf32> to vector<10x32xf32>
    %466 = arith.mulf %464, %465 : vector<10x32xf32>
    %467 = vector.broadcast %448 : vector<1x32xf32> to vector<10x32xf32>
    %468 = arith.addf %466, %467 : vector<10x32xf32>
    %cst_200 = arith.constant dense<0.000000e+00> : vector<2x32xf32>
    %469 = tpu.matmul %31, %468, %cst_200 {dimension_numbers = #tpu.dot_dimension_numbers<[1], [0], [0], [1], [0, 0, 1, 1], [], []>} : vector<2x10xf32>, vector<10x32xf32>, vector<2x32xf32> -> vector<2x32xf32>
    %c0_201 = arith.constant 0 : index
    %c0_202 = arith.constant 0 : index
    %c0_203 = arith.constant 0 : index
    %470 = vector.load %arg25[%c0_201, %c0_202, %c0_203] : memref<2x4x32xf32, #tpu.memory_space<vmem>>, vector<1x4x32xf32>
    %471 = vector.shape_cast %470 : vector<1x4x32xf32> to vector<4x32xf32>
    %c0_204 = arith.constant 0 : index
    %c0_205 = arith.constant 0 : index
    %c0_206 = arith.constant 0 : index
    %472 = vector.load %arg26[%c0_204, %c0_205, %c0_206] : memref<2x4x32xf32, #tpu.memory_space<vmem>>, vector<1x4x32xf32>
    %473 = vector.shape_cast %472 : vector<1x4x32xf32> to vector<4x32xf32>
    %474 = arith.mulf %471, %471 : vector<4x32xf32>
    %cst_207 = arith.constant dense<0.000000e+00> : vector<4xf32>
    %475 = vector.multi_reduction <add>, %474, %cst_207 [1] : vector<4x32xf32> to vector<4xf32>
    %476 = vector.shape_cast %475 : vector<4xf32> to vector<4x1xf32>
    %cst_208 = arith.constant 1.000000e-24 : f32
    %477 = vector.broadcast %cst_208 : f32 to vector<4x1xf32>
    %478 = arith.maximumf %476, %477 : vector<4x1xf32>
    %479 = math.rsqrt %478 : vector<4x1xf32>
    %480 = vector.broadcast %479 : vector<4x1xf32> to vector<4x32xf32>
    %481 = arith.mulf %471, %480 : vector<4x32xf32>
    %482 = arith.mulf %473, %481 : vector<4x32xf32>
    %483 = arith.truncf %469 : vector<2x32xf32> to vector<2x32xbf16>
    %484 = arith.truncf %482 : vector<4x32xf32> to vector<4x32xbf16>
    %cst_209 = arith.constant dense<0.000000e+00> : vector<2x4xf32>
    %485 = tpu.matmul %483, %484, %cst_209 {dimension_numbers = #tpu.dot_dimension_numbers<[1], [1], [0], [0], [0, 0, 1, 0], [], []>} : vector<2x32xbf16>, vector<4x32xbf16>, vector<2x4xf32> -> vector<2x4xf32>
    %486 = arith.mulf %469, %469 : vector<2x32xf32>
    %487 = arith.mulf %473, %473 : vector<4x32xf32>
    %488 = arith.truncf %486 : vector<2x32xf32> to vector<2x32xbf16>
    %489 = arith.truncf %487 : vector<4x32xf32> to vector<4x32xbf16>
    %cst_210 = arith.constant dense<0.000000e+00> : vector<2x4xf32>
    %490 = tpu.matmul %488, %489, %cst_210 {dimension_numbers = #tpu.dot_dimension_numbers<[1], [1], [0], [0], [0, 0, 1, 0], [], []>} : vector<2x32xbf16>, vector<4x32xbf16>, vector<2x4xf32> -> vector<2x4xf32>
    %491 = math.sqrt %490 : vector<2x4xf32>
    %cst_211 = arith.constant 9.99999996E-13 : f32
    %492 = vector.broadcast %cst_211 : f32 to vector<2x4xf32>
    %493 = arith.maximumf %491, %492 : vector<2x4xf32>
    %494 = arith.divf %485, %493 : vector<2x4xf32>
    %c0_212 = arith.constant 0 : index
    %c0_213 = arith.constant 0 : index
    %c0_214 = arith.constant 0 : index
    %495 = vector.load %arg24[%c0_212, %c0_213, %c0_214] : memref<2x4x128xbf16, #tpu.memory_space<vmem>>, vector<1x4x128xbf16>
    %496 = vector.shape_cast %495 : vector<1x4x128xbf16> to vector<4x128xbf16>
    %497 = arith.truncf %494 : vector<2x4xf32> to vector<2x4xbf16>
    %cst_215 = arith.constant dense<0.000000e+00> : vector<2x128xf32>
    %498 = tpu.matmul %497, %496, %cst_215 {dimension_numbers = #tpu.dot_dimension_numbers<[1], [0], [0], [1], [0, 0, 1, 1], [], []>} : vector<2x4xbf16>, vector<4x128xbf16>, vector<2x128xf32> -> vector<2x128xf32>
    %499 = vector.extract_strided_slice %498 {offsets = [0, 0], sizes = [2, 32], strides = [1, 1]} : vector<2x128xf32> to vector<2x32xf32>
    %500 = vector.extract_strided_slice %498 {offsets = [0, 32], sizes = [2, 32], strides = [1, 1]} : vector<2x128xf32> to vector<2x32xf32>
    %501 = tpu.concatenate %499, %500 in 0 : vector<2x32xf32>, vector<2x32xf32> -> vector<4x32xf32>
    %502 = vector.extract_strided_slice %498 {offsets = [0, 64], sizes = [2, 32], strides = [1, 1]} : vector<2x128xf32> to vector<2x32xf32>
    %503 = vector.extract_strided_slice %498 {offsets = [0, 96], sizes = [2, 32], strides = [1, 1]} : vector<2x128xf32> to vector<2x32xf32>
    %504 = tpu.concatenate %502, %503 in 0 : vector<2x32xf32>, vector<2x32xf32> -> vector<4x32xf32>
    %c0_216 = arith.constant 0 : index
    %c0_217 = arith.constant 0 : index
    %c0_218 = arith.constant 0 : index
    %505 = vector.load %arg4[%c0_216, %c0_217, %c0_218] : memref<2x1x32xf32, #tpu.memory_space<vmem>>, vector<1x1x32xf32>
    %506 = vector.shape_cast %505 : vector<1x1x32xf32> to vector<1x32xf32>
    %c0_219 = arith.constant 0 : index
    %c0_220 = arith.constant 0 : index
    %c0_221 = arith.constant 0 : index
    %507 = vector.load %arg5[%c0_219, %c0_220, %c0_221] : memref<2x1x32xf32, #tpu.memory_space<vmem>>, vector<1x1x32xf32>
    %508 = vector.shape_cast %507 : vector<1x1x32xf32> to vector<1x32xf32>
    %cst_222 = arith.constant dense<0.000000e+00> : vector<10xf32>
    %509 = vector.multi_reduction <add>, %40, %cst_222 [1] : vector<10x32xf32> to vector<10xf32>
    %510 = vector.shape_cast %509 : vector<10xf32> to vector<10x1xf32>
    %cst_223 = arith.constant 3.200000e+01 : f32
    %511 = vector.broadcast %cst_223 : f32 to vector<10x1xf32>
    %512 = arith.divf %510, %511 : vector<10x1xf32>
    %513 = vector.broadcast %512 : vector<10x1xf32> to vector<10x32xf32>
    %514 = arith.subf %40, %513 : vector<10x32xf32>
    %515 = arith.mulf %514, %514 : vector<10x32xf32>
    %cst_224 = arith.constant dense<0.000000e+00> : vector<10xf32>
    %516 = vector.multi_reduction <add>, %515, %cst_224 [1] : vector<10x32xf32> to vector<10xf32>
    %517 = vector.shape_cast %516 : vector<10xf32> to vector<10x1xf32>
    %cst_225 = arith.constant 3.200000e+01 : f32
    %518 = vector.broadcast %cst_225 : f32 to vector<10x1xf32>
    %519 = arith.divf %517, %518 : vector<10x1xf32>
    %cst_226 = arith.constant 9.99999997E-7 : f32
    %520 = vector.broadcast %cst_226 : f32 to vector<10x1xf32>
    %521 = arith.addf %519, %520 : vector<10x1xf32>
    %522 = math.rsqrt %521 : vector<10x1xf32>
    %523 = vector.broadcast %522 : vector<10x1xf32> to vector<10x32xf32>
    %524 = arith.mulf %514, %523 : vector<10x32xf32>
    %525 = vector.broadcast %506 : vector<1x32xf32> to vector<10x32xf32>
    %526 = arith.mulf %524, %525 : vector<10x32xf32>
    %527 = vector.broadcast %508 : vector<1x32xf32> to vector<10x32xf32>
    %528 = arith.addf %526, %527 : vector<10x32xf32>
    %c0_227 = arith.constant 0 : index
    %c0_228 = arith.constant 0 : index
    %c0_229 = arith.constant 0 : index
    %529 = vector.load %arg6[%c0_227, %c0_228, %c0_229] : memref<2x32x32xbf16, #tpu.memory_space<vmem>>, vector<1x32x32xbf16>
    %530 = vector.shape_cast %529 : vector<1x32x32xbf16> to vector<32x32xbf16>
    %531 = arith.truncf %528 : vector<10x32xf32> to vector<10x32xbf16>
    %cst_230 = arith.constant dense<0.000000e+00> : vector<10x32xf32>
    %532 = tpu.matmul %531, %530, %cst_230 {dimension_numbers = #tpu.dot_dimension_numbers<[1], [0], [0], [1], [0, 0, 1, 1], [], []>} : vector<10x32xbf16>, vector<32x32xbf16>, vector<10x32xf32> -> vector<10x32xf32>
    %c0_231 = arith.constant 0 : index
    %c0_232 = arith.constant 0 : index
    %c0_233 = arith.constant 0 : index
    %533 = vector.load %arg7[%c0_231, %c0_232, %c0_233] : memref<2x1x32xf32, #tpu.memory_space<vmem>>, vector<1x1x32xf32>
    %534 = vector.shape_cast %533 : vector<1x1x32xf32> to vector<1x32xf32>
    %535 = vector.broadcast %534 : vector<1x32xf32> to vector<10x32xf32>
    %536 = arith.addf %532, %535 : vector<10x32xf32>
    %c0_234 = arith.constant 0 : index
    %c0_235 = arith.constant 0 : index
    %c0_236 = arith.constant 0 : index
    %537 = vector.load %arg8[%c0_234, %c0_235, %c0_236] : memref<2x32x32xbf16, #tpu.memory_space<vmem>>, vector<1x32x32xbf16>
    %538 = vector.shape_cast %537 : vector<1x32x32xbf16> to vector<32x32xbf16>
    %539 = arith.truncf %528 : vector<10x32xf32> to vector<10x32xbf16>
    %cst_237 = arith.constant dense<0.000000e+00> : vector<10x32xf32>
    %540 = tpu.matmul %539, %538, %cst_237 {dimension_numbers = #tpu.dot_dimension_numbers<[1], [0], [0], [1], [0, 0, 1, 1], [], []>} : vector<10x32xbf16>, vector<32x32xbf16>, vector<10x32xf32> -> vector<10x32xf32>
    %c0_238 = arith.constant 0 : index
    %c0_239 = arith.constant 0 : index
    %c0_240 = arith.constant 0 : index
    %541 = vector.load %arg9[%c0_238, %c0_239, %c0_240] : memref<2x1x32xf32, #tpu.memory_space<vmem>>, vector<1x1x32xf32>
    %542 = vector.shape_cast %541 : vector<1x1x32xf32> to vector<1x32xf32>
    %543 = vector.broadcast %542 : vector<1x32xf32> to vector<10x32xf32>
    %544 = arith.addf %540, %543 : vector<10x32xf32>
    %c0_241 = arith.constant 0 : index
    %c0_242 = arith.constant 0 : index
    %c0_243 = arith.constant 0 : index
    %545 = vector.load %arg10[%c0_241, %c0_242, %c0_243] : memref<2x32x32xbf16, #tpu.memory_space<vmem>>, vector<1x32x32xbf16>
    %546 = vector.shape_cast %545 : vector<1x32x32xbf16> to vector<32x32xbf16>
    %547 = arith.truncf %528 : vector<10x32xf32> to vector<10x32xbf16>
    %cst_244 = arith.constant dense<0.000000e+00> : vector<10x32xf32>
    %548 = tpu.matmul %547, %546, %cst_244 {dimension_numbers = #tpu.dot_dimension_numbers<[1], [0], [0], [1], [0, 0, 1, 1], [], []>} : vector<10x32xbf16>, vector<32x32xbf16>, vector<10x32xf32> -> vector<10x32xf32>
    %c0_245 = arith.constant 0 : index
    %c0_246 = arith.constant 0 : index
    %c0_247 = arith.constant 0 : index
    %549 = vector.load %arg11[%c0_245, %c0_246, %c0_247] : memref<2x1x32xf32, #tpu.memory_space<vmem>>, vector<1x1x32xf32>
    %550 = vector.shape_cast %549 : vector<1x1x32xf32> to vector<1x32xf32>
    %551 = vector.broadcast %550 : vector<1x32xf32> to vector<10x32xf32>
    %552 = arith.addf %548, %551 : vector<10x32xf32>
    %cst_248 = arith.constant 0.000000e+00 : f32
    %553 = vector.broadcast %cst_248 : f32 to vector<10x32xf32>
    %554 = vector.broadcast %7 : vector<1x32xf32> to vector<10x32xf32>
    %555 = arith.mulf %536, %554 : vector<10x32xf32>
    %556 = arith.truncf %555 : vector<10x32xf32> to vector<10x32xbf16>
    %557 = arith.truncf %544 : vector<10x32xf32> to vector<10x32xbf16>
    %cst_249 = arith.constant dense<0.000000e+00> : vector<10x10xf32>
    %558 = tpu.matmul %556, %557, %cst_249 {dimension_numbers = #tpu.dot_dimension_numbers<[1], [1], [0], [0], [0, 0, 1, 0], [], []>} : vector<10x32xbf16>, vector<10x32xbf16>, vector<10x10xf32> -> vector<10x10xf32>
    %cst_250 = arith.constant 0.353553385 : f32
    %559 = vector.broadcast %cst_250 : f32 to vector<10x10xf32>
    %560 = arith.mulf %558, %559 : vector<10x10xf32>
    %561 = arith.addf %560, %29 : vector<10x10xf32>
    %562 = arith.truncf %555 : vector<10x32xf32> to vector<10x32xbf16>
    %563 = arith.truncf %501 : vector<4x32xf32> to vector<4x32xbf16>
    %cst_251 = arith.constant dense<0.000000e+00> : vector<10x4xf32>
    %564 = tpu.matmul %562, %563, %cst_251 {dimension_numbers = #tpu.dot_dimension_numbers<[1], [1], [0], [0], [0, 0, 1, 0], [], []>} : vector<10x32xbf16>, vector<4x32xbf16>, vector<10x4xf32> -> vector<10x4xf32>
    %cst_252 = arith.constant 0.353553385 : f32
    %565 = vector.broadcast %cst_252 : f32 to vector<10x4xf32>
    %566 = arith.mulf %564, %565 : vector<10x4xf32>
    %567 = arith.addf %566, %30 : vector<10x4xf32>
    %cst_253 = arith.constant dense<0xFF800000> : vector<10xf32>
    %568 = vector.multi_reduction <maximumf>, %561, %cst_253 [1] : vector<10x10xf32> to vector<10xf32>
    %569 = vector.shape_cast %568 : vector<10xf32> to vector<10x1xf32>
    %cst_254 = arith.constant dense<0xFF800000> : vector<10xf32>
    %570 = vector.multi_reduction <maximumf>, %567, %cst_254 [1] : vector<10x4xf32> to vector<10xf32>
    %571 = vector.shape_cast %570 : vector<10xf32> to vector<10x1xf32>
    %572 = arith.maximumf %569, %571 : vector<10x1xf32>
    %573 = vector.broadcast %572 : vector<10x1xf32> to vector<10x10xf32>
    %574 = arith.subf %561, %573 : vector<10x10xf32>
    %575 = math.exp %574 : vector<10x10xf32>
    %576 = vector.broadcast %572 : vector<10x1xf32> to vector<10x4xf32>
    %577 = arith.subf %567, %576 : vector<10x4xf32>
    %578 = math.exp %577 : vector<10x4xf32>
    %cst_255 = arith.constant dense<0.000000e+00> : vector<10xf32>
    %579 = vector.multi_reduction <add>, %575, %cst_255 [1] : vector<10x10xf32> to vector<10xf32>
    %580 = vector.shape_cast %579 : vector<10xf32> to vector<10x1xf32>
    %cst_256 = arith.constant dense<0.000000e+00> : vector<10xf32>
    %581 = vector.multi_reduction <add>, %578, %cst_256 [1] : vector<10x4xf32> to vector<10xf32>
    %582 = vector.shape_cast %581 : vector<10xf32> to vector<10x1xf32>
    %583 = arith.addf %580, %582 : vector<10x1xf32>
    %584 = tpu.reciprocal %583 {approx = true} : vector<10x1xf32> -> vector<10x1xf32>
    %585 = vector.broadcast %7 : vector<1x32xf32> to vector<10x32xf32>
    %586 = arith.mulf %552, %585 : vector<10x32xf32>
    %587 = arith.truncf %575 : vector<10x10xf32> to vector<10x10xbf16>
    %588 = arith.truncf %586 : vector<10x32xf32> to vector<10x32xbf16>
    %cst_257 = arith.constant dense<0.000000e+00> : vector<10x32xf32>
    %589 = tpu.matmul %587, %588, %cst_257 {dimension_numbers = #tpu.dot_dimension_numbers<[1], [0], [0], [1], [0, 0, 1, 1], [], []>} : vector<10x10xbf16>, vector<10x32xbf16>, vector<10x32xf32> -> vector<10x32xf32>
    %590 = vector.broadcast %7 : vector<1x32xf32> to vector<4x32xf32>
    %591 = arith.mulf %504, %590 : vector<4x32xf32>
    %592 = arith.truncf %578 : vector<10x4xf32> to vector<10x4xbf16>
    %593 = arith.truncf %591 : vector<4x32xf32> to vector<4x32xbf16>
    %cst_258 = arith.constant dense<0.000000e+00> : vector<10x32xf32>
    %594 = tpu.matmul %592, %593, %cst_258 {dimension_numbers = #tpu.dot_dimension_numbers<[1], [0], [0], [1], [0, 0, 1, 1], [], []>} : vector<10x4xbf16>, vector<4x32xbf16>, vector<10x32xf32> -> vector<10x32xf32>
    %595 = arith.addf %589, %594 : vector<10x32xf32>
    %596 = vector.broadcast %584 : vector<10x1xf32> to vector<10x32xf32>
    %597 = arith.mulf %595, %596 : vector<10x32xf32>
    %598 = arith.addf %553, %597 : vector<10x32xf32>
    %599 = vector.broadcast %14 : vector<1x32xf32> to vector<10x32xf32>
    %600 = arith.mulf %536, %599 : vector<10x32xf32>
    %601 = arith.truncf %600 : vector<10x32xf32> to vector<10x32xbf16>
    %602 = arith.truncf %544 : vector<10x32xf32> to vector<10x32xbf16>
    %cst_259 = arith.constant dense<0.000000e+00> : vector<10x10xf32>
    %603 = tpu.matmul %601, %602, %cst_259 {dimension_numbers = #tpu.dot_dimension_numbers<[1], [1], [0], [0], [0, 0, 1, 0], [], []>} : vector<10x32xbf16>, vector<10x32xbf16>, vector<10x10xf32> -> vector<10x10xf32>
    %cst_260 = arith.constant 0.353553385 : f32
    %604 = vector.broadcast %cst_260 : f32 to vector<10x10xf32>
    %605 = arith.mulf %603, %604 : vector<10x10xf32>
    %606 = arith.addf %605, %29 : vector<10x10xf32>
    %607 = arith.truncf %600 : vector<10x32xf32> to vector<10x32xbf16>
    %608 = arith.truncf %501 : vector<4x32xf32> to vector<4x32xbf16>
    %cst_261 = arith.constant dense<0.000000e+00> : vector<10x4xf32>
    %609 = tpu.matmul %607, %608, %cst_261 {dimension_numbers = #tpu.dot_dimension_numbers<[1], [1], [0], [0], [0, 0, 1, 0], [], []>} : vector<10x32xbf16>, vector<4x32xbf16>, vector<10x4xf32> -> vector<10x4xf32>
    %cst_262 = arith.constant 0.353553385 : f32
    %610 = vector.broadcast %cst_262 : f32 to vector<10x4xf32>
    %611 = arith.mulf %609, %610 : vector<10x4xf32>
    %612 = arith.addf %611, %30 : vector<10x4xf32>
    %cst_263 = arith.constant dense<0xFF800000> : vector<10xf32>
    %613 = vector.multi_reduction <maximumf>, %606, %cst_263 [1] : vector<10x10xf32> to vector<10xf32>
    %614 = vector.shape_cast %613 : vector<10xf32> to vector<10x1xf32>
    %cst_264 = arith.constant dense<0xFF800000> : vector<10xf32>
    %615 = vector.multi_reduction <maximumf>, %612, %cst_264 [1] : vector<10x4xf32> to vector<10xf32>
    %616 = vector.shape_cast %615 : vector<10xf32> to vector<10x1xf32>
    %617 = arith.maximumf %614, %616 : vector<10x1xf32>
    %618 = vector.broadcast %617 : vector<10x1xf32> to vector<10x10xf32>
    %619 = arith.subf %606, %618 : vector<10x10xf32>
    %620 = math.exp %619 : vector<10x10xf32>
    %621 = vector.broadcast %617 : vector<10x1xf32> to vector<10x4xf32>
    %622 = arith.subf %612, %621 : vector<10x4xf32>
    %623 = math.exp %622 : vector<10x4xf32>
    %cst_265 = arith.constant dense<0.000000e+00> : vector<10xf32>
    %624 = vector.multi_reduction <add>, %620, %cst_265 [1] : vector<10x10xf32> to vector<10xf32>
    %625 = vector.shape_cast %624 : vector<10xf32> to vector<10x1xf32>
    %cst_266 = arith.constant dense<0.000000e+00> : vector<10xf32>
    %626 = vector.multi_reduction <add>, %623, %cst_266 [1] : vector<10x4xf32> to vector<10xf32>
    %627 = vector.shape_cast %626 : vector<10xf32> to vector<10x1xf32>
    %628 = arith.addf %625, %627 : vector<10x1xf32>
    %629 = tpu.reciprocal %628 {approx = true} : vector<10x1xf32> -> vector<10x1xf32>
    %630 = vector.broadcast %14 : vector<1x32xf32> to vector<10x32xf32>
    %631 = arith.mulf %552, %630 : vector<10x32xf32>
    %632 = arith.truncf %620 : vector<10x10xf32> to vector<10x10xbf16>
    %633 = arith.truncf %631 : vector<10x32xf32> to vector<10x32xbf16>
    %cst_267 = arith.constant dense<0.000000e+00> : vector<10x32xf32>
    %634 = tpu.matmul %632, %633, %cst_267 {dimension_numbers = #tpu.dot_dimension_numbers<[1], [0], [0], [1], [0, 0, 1, 1], [], []>} : vector<10x10xbf16>, vector<10x32xbf16>, vector<10x32xf32> -> vector<10x32xf32>
    %635 = vector.broadcast %14 : vector<1x32xf32> to vector<4x32xf32>
    %636 = arith.mulf %504, %635 : vector<4x32xf32>
    %637 = arith.truncf %623 : vector<10x4xf32> to vector<10x4xbf16>
    %638 = arith.truncf %636 : vector<4x32xf32> to vector<4x32xbf16>
    %cst_268 = arith.constant dense<0.000000e+00> : vector<10x32xf32>
    %639 = tpu.matmul %637, %638, %cst_268 {dimension_numbers = #tpu.dot_dimension_numbers<[1], [0], [0], [1], [0, 0, 1, 1], [], []>} : vector<10x4xbf16>, vector<4x32xbf16>, vector<10x32xf32> -> vector<10x32xf32>
    %640 = arith.addf %634, %639 : vector<10x32xf32>
    %641 = vector.broadcast %629 : vector<10x1xf32> to vector<10x32xf32>
    %642 = arith.mulf %640, %641 : vector<10x32xf32>
    %643 = arith.addf %598, %642 : vector<10x32xf32>
    %644 = vector.broadcast %21 : vector<1x32xf32> to vector<10x32xf32>
    %645 = arith.mulf %536, %644 : vector<10x32xf32>
    %646 = arith.truncf %645 : vector<10x32xf32> to vector<10x32xbf16>
    %647 = arith.truncf %544 : vector<10x32xf32> to vector<10x32xbf16>
    %cst_269 = arith.constant dense<0.000000e+00> : vector<10x10xf32>
    %648 = tpu.matmul %646, %647, %cst_269 {dimension_numbers = #tpu.dot_dimension_numbers<[1], [1], [0], [0], [0, 0, 1, 0], [], []>} : vector<10x32xbf16>, vector<10x32xbf16>, vector<10x10xf32> -> vector<10x10xf32>
    %cst_270 = arith.constant 0.353553385 : f32
    %649 = vector.broadcast %cst_270 : f32 to vector<10x10xf32>
    %650 = arith.mulf %648, %649 : vector<10x10xf32>
    %651 = arith.addf %650, %29 : vector<10x10xf32>
    %652 = arith.truncf %645 : vector<10x32xf32> to vector<10x32xbf16>
    %653 = arith.truncf %501 : vector<4x32xf32> to vector<4x32xbf16>
    %cst_271 = arith.constant dense<0.000000e+00> : vector<10x4xf32>
    %654 = tpu.matmul %652, %653, %cst_271 {dimension_numbers = #tpu.dot_dimension_numbers<[1], [1], [0], [0], [0, 0, 1, 0], [], []>} : vector<10x32xbf16>, vector<4x32xbf16>, vector<10x4xf32> -> vector<10x4xf32>
    %cst_272 = arith.constant 0.353553385 : f32
    %655 = vector.broadcast %cst_272 : f32 to vector<10x4xf32>
    %656 = arith.mulf %654, %655 : vector<10x4xf32>
    %657 = arith.addf %656, %30 : vector<10x4xf32>
    %cst_273 = arith.constant dense<0xFF800000> : vector<10xf32>
    %658 = vector.multi_reduction <maximumf>, %651, %cst_273 [1] : vector<10x10xf32> to vector<10xf32>
    %659 = vector.shape_cast %658 : vector<10xf32> to vector<10x1xf32>
    %cst_274 = arith.constant dense<0xFF800000> : vector<10xf32>
    %660 = vector.multi_reduction <maximumf>, %657, %cst_274 [1] : vector<10x4xf32> to vector<10xf32>
    %661 = vector.shape_cast %660 : vector<10xf32> to vector<10x1xf32>
    %662 = arith.maximumf %659, %661 : vector<10x1xf32>
    %663 = vector.broadcast %662 : vector<10x1xf32> to vector<10x10xf32>
    %664 = arith.subf %651, %663 : vector<10x10xf32>
    %665 = math.exp %664 : vector<10x10xf32>
    %666 = vector.broadcast %662 : vector<10x1xf32> to vector<10x4xf32>
    %667 = arith.subf %657, %666 : vector<10x4xf32>
    %668 = math.exp %667 : vector<10x4xf32>
    %cst_275 = arith.constant dense<0.000000e+00> : vector<10xf32>
    %669 = vector.multi_reduction <add>, %665, %cst_275 [1] : vector<10x10xf32> to vector<10xf32>
    %670 = vector.shape_cast %669 : vector<10xf32> to vector<10x1xf32>
    %cst_276 = arith.constant dense<0.000000e+00> : vector<10xf32>
    %671 = vector.multi_reduction <add>, %668, %cst_276 [1] : vector<10x4xf32> to vector<10xf32>
    %672 = vector.shape_cast %671 : vector<10xf32> to vector<10x1xf32>
    %673 = arith.addf %670, %672 : vector<10x1xf32>
    %674 = tpu.reciprocal %673 {approx = true} : vector<10x1xf32> -> vector<10x1xf32>
    %675 = vector.broadcast %21 : vector<1x32xf32> to vector<10x32xf32>
    %676 = arith.mulf %552, %675 : vector<10x32xf32>
    %677 = arith.truncf %665 : vector<10x10xf32> to vector<10x10xbf16>
    %678 = arith.truncf %676 : vector<10x32xf32> to vector<10x32xbf16>
    %cst_277 = arith.constant dense<0.000000e+00> : vector<10x32xf32>
    %679 = tpu.matmul %677, %678, %cst_277 {dimension_numbers = #tpu.dot_dimension_numbers<[1], [0], [0], [1], [0, 0, 1, 1], [], []>} : vector<10x10xbf16>, vector<10x32xbf16>, vector<10x32xf32> -> vector<10x32xf32>
    %680 = vector.broadcast %21 : vector<1x32xf32> to vector<4x32xf32>
    %681 = arith.mulf %504, %680 : vector<4x32xf32>
    %682 = arith.truncf %668 : vector<10x4xf32> to vector<10x4xbf16>
    %683 = arith.truncf %681 : vector<4x32xf32> to vector<4x32xbf16>
    %cst_278 = arith.constant dense<0.000000e+00> : vector<10x32xf32>
    %684 = tpu.matmul %682, %683, %cst_278 {dimension_numbers = #tpu.dot_dimension_numbers<[1], [0], [0], [1], [0, 0, 1, 1], [], []>} : vector<10x4xbf16>, vector<4x32xbf16>, vector<10x32xf32> -> vector<10x32xf32>
    %685 = arith.addf %679, %684 : vector<10x32xf32>
    %686 = vector.broadcast %674 : vector<10x1xf32> to vector<10x32xf32>
    %687 = arith.mulf %685, %686 : vector<10x32xf32>
    %688 = arith.addf %643, %687 : vector<10x32xf32>
    %689 = vector.broadcast %28 : vector<1x32xf32> to vector<10x32xf32>
    %690 = arith.mulf %536, %689 : vector<10x32xf32>
    %691 = arith.truncf %690 : vector<10x32xf32> to vector<10x32xbf16>
    %692 = arith.truncf %544 : vector<10x32xf32> to vector<10x32xbf16>
    %cst_279 = arith.constant dense<0.000000e+00> : vector<10x10xf32>
    %693 = tpu.matmul %691, %692, %cst_279 {dimension_numbers = #tpu.dot_dimension_numbers<[1], [1], [0], [0], [0, 0, 1, 0], [], []>} : vector<10x32xbf16>, vector<10x32xbf16>, vector<10x10xf32> -> vector<10x10xf32>
    %cst_280 = arith.constant 0.353553385 : f32
    %694 = vector.broadcast %cst_280 : f32 to vector<10x10xf32>
    %695 = arith.mulf %693, %694 : vector<10x10xf32>
    %696 = arith.addf %695, %29 : vector<10x10xf32>
    %697 = arith.truncf %690 : vector<10x32xf32> to vector<10x32xbf16>
    %698 = arith.truncf %501 : vector<4x32xf32> to vector<4x32xbf16>
    %cst_281 = arith.constant dense<0.000000e+00> : vector<10x4xf32>
    %699 = tpu.matmul %697, %698, %cst_281 {dimension_numbers = #tpu.dot_dimension_numbers<[1], [1], [0], [0], [0, 0, 1, 0], [], []>} : vector<10x32xbf16>, vector<4x32xbf16>, vector<10x4xf32> -> vector<10x4xf32>
    %cst_282 = arith.constant 0.353553385 : f32
    %700 = vector.broadcast %cst_282 : f32 to vector<10x4xf32>
    %701 = arith.mulf %699, %700 : vector<10x4xf32>
    %702 = arith.addf %701, %30 : vector<10x4xf32>
    %cst_283 = arith.constant dense<0xFF800000> : vector<10xf32>
    %703 = vector.multi_reduction <maximumf>, %696, %cst_283 [1] : vector<10x10xf32> to vector<10xf32>
    %704 = vector.shape_cast %703 : vector<10xf32> to vector<10x1xf32>
    %cst_284 = arith.constant dense<0xFF800000> : vector<10xf32>
    %705 = vector.multi_reduction <maximumf>, %702, %cst_284 [1] : vector<10x4xf32> to vector<10xf32>
    %706 = vector.shape_cast %705 : vector<10xf32> to vector<10x1xf32>
    %707 = arith.maximumf %704, %706 : vector<10x1xf32>
    %708 = vector.broadcast %707 : vector<10x1xf32> to vector<10x10xf32>
    %709 = arith.subf %696, %708 : vector<10x10xf32>
    %710 = math.exp %709 : vector<10x10xf32>
    %711 = vector.broadcast %707 : vector<10x1xf32> to vector<10x4xf32>
    %712 = arith.subf %702, %711 : vector<10x4xf32>
    %713 = math.exp %712 : vector<10x4xf32>
    %cst_285 = arith.constant dense<0.000000e+00> : vector<10xf32>
    %714 = vector.multi_reduction <add>, %710, %cst_285 [1] : vector<10x10xf32> to vector<10xf32>
    %715 = vector.shape_cast %714 : vector<10xf32> to vector<10x1xf32>
    %cst_286 = arith.constant dense<0.000000e+00> : vector<10xf32>
    %716 = vector.multi_reduction <add>, %713, %cst_286 [1] : vector<10x4xf32> to vector<10xf32>
    %717 = vector.shape_cast %716 : vector<10xf32> to vector<10x1xf32>
    %718 = arith.addf %715, %717 : vector<10x1xf32>
    %719 = tpu.reciprocal %718 {approx = true} : vector<10x1xf32> -> vector<10x1xf32>
    %720 = vector.broadcast %28 : vector<1x32xf32> to vector<10x32xf32>
    %721 = arith.mulf %552, %720 : vector<10x32xf32>
    %722 = arith.truncf %710 : vector<10x10xf32> to vector<10x10xbf16>
    %723 = arith.truncf %721 : vector<10x32xf32> to vector<10x32xbf16>
    %cst_287 = arith.constant dense<0.000000e+00> : vector<10x32xf32>
    %724 = tpu.matmul %722, %723, %cst_287 {dimension_numbers = #tpu.dot_dimension_numbers<[1], [0], [0], [1], [0, 0, 1, 1], [], []>} : vector<10x10xbf16>, vector<10x32xbf16>, vector<10x32xf32> -> vector<10x32xf32>
    %725 = vector.broadcast %28 : vector<1x32xf32> to vector<4x32xf32>
    %726 = arith.mulf %504, %725 : vector<4x32xf32>
    %727 = arith.truncf %713 : vector<10x4xf32> to vector<10x4xbf16>
    %728 = arith.truncf %726 : vector<4x32xf32> to vector<4x32xbf16>
    %cst_288 = arith.constant dense<0.000000e+00> : vector<10x32xf32>
    %729 = tpu.matmul %727, %728, %cst_288 {dimension_numbers = #tpu.dot_dimension_numbers<[1], [0], [0], [1], [0, 0, 1, 1], [], []>} : vector<10x4xbf16>, vector<4x32xbf16>, vector<10x32xf32> -> vector<10x32xf32>
    %730 = arith.addf %724, %729 : vector<10x32xf32>
    %731 = vector.broadcast %719 : vector<10x1xf32> to vector<10x32xf32>
    %732 = arith.mulf %730, %731 : vector<10x32xf32>
    %733 = arith.addf %688, %732 : vector<10x32xf32>
    %c0_289 = arith.constant 0 : index
    %c0_290 = arith.constant 0 : index
    %c0_291 = arith.constant 0 : index
    %734 = vector.load %arg12[%c0_289, %c0_290, %c0_291] : memref<2x32x32xbf16, #tpu.memory_space<vmem>>, vector<1x32x32xbf16>
    %735 = vector.shape_cast %734 : vector<1x32x32xbf16> to vector<32x32xbf16>
    %736 = arith.truncf %733 : vector<10x32xf32> to vector<10x32xbf16>
    %cst_292 = arith.constant dense<0.000000e+00> : vector<10x32xf32>
    %737 = tpu.matmul %736, %735, %cst_292 {dimension_numbers = #tpu.dot_dimension_numbers<[1], [0], [0], [1], [0, 0, 1, 1], [], []>} : vector<10x32xbf16>, vector<32x32xbf16>, vector<10x32xf32> -> vector<10x32xf32>
    %738 = arith.addf %40, %737 : vector<10x32xf32>
    %c0_293 = arith.constant 0 : index
    %c0_294 = arith.constant 0 : index
    %c0_295 = arith.constant 0 : index
    %739 = vector.load %arg13[%c0_293, %c0_294, %c0_295] : memref<2x1x32xf32, #tpu.memory_space<vmem>>, vector<1x1x32xf32>
    %740 = vector.shape_cast %739 : vector<1x1x32xf32> to vector<1x32xf32>
    %741 = vector.broadcast %740 : vector<1x32xf32> to vector<10x32xf32>
    %742 = arith.addf %738, %741 : vector<10x32xf32>
    %c0_296 = arith.constant 0 : index
    %c0_297 = arith.constant 0 : index
    %c0_298 = arith.constant 0 : index
    %743 = vector.load %arg14[%c0_296, %c0_297, %c0_298] : memref<2x1x32xf32, #tpu.memory_space<vmem>>, vector<1x1x32xf32>
    %744 = vector.shape_cast %743 : vector<1x1x32xf32> to vector<1x32xf32>
    %c0_299 = arith.constant 0 : index
    %c0_300 = arith.constant 0 : index
    %c0_301 = arith.constant 0 : index
    %745 = vector.load %arg15[%c0_299, %c0_300, %c0_301] : memref<2x1x32xf32, #tpu.memory_space<vmem>>, vector<1x1x32xf32>
    %746 = vector.shape_cast %745 : vector<1x1x32xf32> to vector<1x32xf32>
    %cst_302 = arith.constant dense<0.000000e+00> : vector<10xf32>
    %747 = vector.multi_reduction <add>, %742, %cst_302 [1] : vector<10x32xf32> to vector<10xf32>
    %748 = vector.shape_cast %747 : vector<10xf32> to vector<10x1xf32>
    %cst_303 = arith.constant 3.200000e+01 : f32
    %749 = vector.broadcast %cst_303 : f32 to vector<10x1xf32>
    %750 = arith.divf %748, %749 : vector<10x1xf32>
    %751 = vector.broadcast %750 : vector<10x1xf32> to vector<10x32xf32>
    %752 = arith.subf %742, %751 : vector<10x32xf32>
    %753 = arith.mulf %752, %752 : vector<10x32xf32>
    %cst_304 = arith.constant dense<0.000000e+00> : vector<10xf32>
    %754 = vector.multi_reduction <add>, %753, %cst_304 [1] : vector<10x32xf32> to vector<10xf32>
    %755 = vector.shape_cast %754 : vector<10xf32> to vector<10x1xf32>
    %cst_305 = arith.constant 3.200000e+01 : f32
    %756 = vector.broadcast %cst_305 : f32 to vector<10x1xf32>
    %757 = arith.divf %755, %756 : vector<10x1xf32>
    %cst_306 = arith.constant 9.99999997E-7 : f32
    %758 = vector.broadcast %cst_306 : f32 to vector<10x1xf32>
    %759 = arith.addf %757, %758 : vector<10x1xf32>
    %760 = math.rsqrt %759 : vector<10x1xf32>
    %761 = vector.broadcast %760 : vector<10x1xf32> to vector<10x32xf32>
    %762 = arith.mulf %752, %761 : vector<10x32xf32>
    %763 = vector.broadcast %744 : vector<1x32xf32> to vector<10x32xf32>
    %764 = arith.mulf %762, %763 : vector<10x32xf32>
    %765 = vector.broadcast %746 : vector<1x32xf32> to vector<10x32xf32>
    %766 = arith.addf %764, %765 : vector<10x32xf32>
    %c0_307 = arith.constant 0 : index
    %c0_308 = arith.constant 0 : index
    %c0_309 = arith.constant 0 : index
    %767 = vector.load %arg16[%c0_307, %c0_308, %c0_309] : memref<2x32x128xbf16, #tpu.memory_space<vmem>>, vector<1x32x128xbf16>
    %768 = vector.shape_cast %767 : vector<1x32x128xbf16> to vector<32x128xbf16>
    %769 = arith.truncf %766 : vector<10x32xf32> to vector<10x32xbf16>
    %cst_310 = arith.constant dense<0.000000e+00> : vector<10x128xf32>
    %770 = tpu.matmul %769, %768, %cst_310 {dimension_numbers = #tpu.dot_dimension_numbers<[1], [0], [0], [1], [0, 0, 1, 1], [], []>} : vector<10x32xbf16>, vector<32x128xbf16>, vector<10x128xf32> -> vector<10x128xf32>
    %c0_311 = arith.constant 0 : index
    %c0_312 = arith.constant 0 : index
    %c0_313 = arith.constant 0 : index
    %771 = vector.load %arg17[%c0_311, %c0_312, %c0_313] : memref<2x1x128xf32, #tpu.memory_space<vmem>>, vector<1x1x128xf32>
    %772 = vector.shape_cast %771 : vector<1x1x128xf32> to vector<1x128xf32>
    %773 = vector.broadcast %772 : vector<1x128xf32> to vector<10x128xf32>
    %774 = arith.addf %770, %773 : vector<10x128xf32>
    %cst_314 = arith.constant 5.000000e-01 : f32
    %775 = vector.broadcast %cst_314 : f32 to vector<10x128xf32>
    %776 = arith.mulf %775, %774 : vector<10x128xf32>
    %cst_315 = arith.constant 0.707106769 : f32
    %777 = vector.broadcast %cst_315 : f32 to vector<10x128xf32>
    %778 = arith.mulf %774, %777 : vector<10x128xf32>
    %779 = math.erf %778 : vector<10x128xf32>
    %cst_316 = arith.constant 1.000000e+00 : f32
    %780 = vector.broadcast %cst_316 : f32 to vector<10x128xf32>
    %781 = arith.addf %780, %779 : vector<10x128xf32>
    %782 = arith.mulf %776, %781 : vector<10x128xf32>
    %c0_317 = arith.constant 0 : index
    %c0_318 = arith.constant 0 : index
    %c0_319 = arith.constant 0 : index
    %783 = vector.load %arg18[%c0_317, %c0_318, %c0_319] : memref<2x128x32xbf16, #tpu.memory_space<vmem>>, vector<1x128x32xbf16>
    %784 = vector.shape_cast %783 : vector<1x128x32xbf16> to vector<128x32xbf16>
    %785 = arith.truncf %782 : vector<10x128xf32> to vector<10x128xbf16>
    %cst_320 = arith.constant dense<0.000000e+00> : vector<10x32xf32>
    %786 = tpu.matmul %785, %784, %cst_320 {dimension_numbers = #tpu.dot_dimension_numbers<[1], [0], [0], [1], [0, 0, 1, 1], [], []>} : vector<10x128xbf16>, vector<128x32xbf16>, vector<10x32xf32> -> vector<10x32xf32>
    %787 = arith.addf %742, %786 : vector<10x32xf32>
    %c0_321 = arith.constant 0 : index
    %c0_322 = arith.constant 0 : index
    %c0_323 = arith.constant 0 : index
    %788 = vector.load %arg19[%c0_321, %c0_322, %c0_323] : memref<2x1x32xf32, #tpu.memory_space<vmem>>, vector<1x1x32xf32>
    %789 = vector.shape_cast %788 : vector<1x1x32xf32> to vector<1x32xf32>
    %790 = vector.broadcast %789 : vector<1x32xf32> to vector<10x32xf32>
    %791 = arith.addf %787, %790 : vector<10x32xf32>
    %c1_324 = arith.constant 1 : index
    %c0_325 = arith.constant 0 : index
    %c0_326 = arith.constant 0 : index
    %792 = vector.load %arg25[%c1_324, %c0_325, %c0_326] : memref<2x4x32xf32, #tpu.memory_space<vmem>>, vector<1x4x32xf32>
    %793 = vector.shape_cast %792 : vector<1x4x32xf32> to vector<4x32xf32>
    %c1_327 = arith.constant 1 : index
    %c0_328 = arith.constant 0 : index
    %c0_329 = arith.constant 0 : index
    %794 = vector.load %arg26[%c1_327, %c0_328, %c0_329] : memref<2x4x32xf32, #tpu.memory_space<vmem>>, vector<1x4x32xf32>
    %795 = vector.shape_cast %794 : vector<1x4x32xf32> to vector<4x32xf32>
    %796 = arith.mulf %793, %793 : vector<4x32xf32>
    %cst_330 = arith.constant dense<0.000000e+00> : vector<4xf32>
    %797 = vector.multi_reduction <add>, %796, %cst_330 [1] : vector<4x32xf32> to vector<4xf32>
    %798 = vector.shape_cast %797 : vector<4xf32> to vector<4x1xf32>
    %cst_331 = arith.constant 1.000000e-24 : f32
    %799 = vector.broadcast %cst_331 : f32 to vector<4x1xf32>
    %800 = arith.maximumf %798, %799 : vector<4x1xf32>
    %801 = math.rsqrt %800 : vector<4x1xf32>
    %802 = vector.broadcast %801 : vector<4x1xf32> to vector<4x32xf32>
    %803 = arith.mulf %793, %802 : vector<4x32xf32>
    %804 = arith.mulf %795, %803 : vector<4x32xf32>
    %805 = arith.truncf %469 : vector<2x32xf32> to vector<2x32xbf16>
    %806 = arith.truncf %804 : vector<4x32xf32> to vector<4x32xbf16>
    %cst_332 = arith.constant dense<0.000000e+00> : vector<2x4xf32>
    %807 = tpu.matmul %805, %806, %cst_332 {dimension_numbers = #tpu.dot_dimension_numbers<[1], [1], [0], [0], [0, 0, 1, 0], [], []>} : vector<2x32xbf16>, vector<4x32xbf16>, vector<2x4xf32> -> vector<2x4xf32>
    %808 = arith.mulf %469, %469 : vector<2x32xf32>
    %809 = arith.mulf %795, %795 : vector<4x32xf32>
    %810 = arith.truncf %808 : vector<2x32xf32> to vector<2x32xbf16>
    %811 = arith.truncf %809 : vector<4x32xf32> to vector<4x32xbf16>
    %cst_333 = arith.constant dense<0.000000e+00> : vector<2x4xf32>
    %812 = tpu.matmul %810, %811, %cst_333 {dimension_numbers = #tpu.dot_dimension_numbers<[1], [1], [0], [0], [0, 0, 1, 0], [], []>} : vector<2x32xbf16>, vector<4x32xbf16>, vector<2x4xf32> -> vector<2x4xf32>
    %813 = math.sqrt %812 : vector<2x4xf32>
    %cst_334 = arith.constant 9.99999996E-13 : f32
    %814 = vector.broadcast %cst_334 : f32 to vector<2x4xf32>
    %815 = arith.maximumf %813, %814 : vector<2x4xf32>
    %816 = arith.divf %807, %815 : vector<2x4xf32>
    %c1_335 = arith.constant 1 : index
    %c0_336 = arith.constant 0 : index
    %c0_337 = arith.constant 0 : index
    %817 = vector.load %arg24[%c1_335, %c0_336, %c0_337] : memref<2x4x128xbf16, #tpu.memory_space<vmem>>, vector<1x4x128xbf16>
    %818 = vector.shape_cast %817 : vector<1x4x128xbf16> to vector<4x128xbf16>
    %819 = arith.truncf %816 : vector<2x4xf32> to vector<2x4xbf16>
    %cst_338 = arith.constant dense<0.000000e+00> : vector<2x128xf32>
    %820 = tpu.matmul %819, %818, %cst_338 {dimension_numbers = #tpu.dot_dimension_numbers<[1], [0], [0], [1], [0, 0, 1, 1], [], []>} : vector<2x4xbf16>, vector<4x128xbf16>, vector<2x128xf32> -> vector<2x128xf32>
    %821 = vector.extract_strided_slice %820 {offsets = [0, 0], sizes = [2, 32], strides = [1, 1]} : vector<2x128xf32> to vector<2x32xf32>
    %822 = vector.extract_strided_slice %820 {offsets = [0, 32], sizes = [2, 32], strides = [1, 1]} : vector<2x128xf32> to vector<2x32xf32>
    %823 = tpu.concatenate %821, %822 in 0 : vector<2x32xf32>, vector<2x32xf32> -> vector<4x32xf32>
    %824 = vector.extract_strided_slice %820 {offsets = [0, 64], sizes = [2, 32], strides = [1, 1]} : vector<2x128xf32> to vector<2x32xf32>
    %825 = vector.extract_strided_slice %820 {offsets = [0, 96], sizes = [2, 32], strides = [1, 1]} : vector<2x128xf32> to vector<2x32xf32>
    %826 = tpu.concatenate %824, %825 in 0 : vector<2x32xf32>, vector<2x32xf32> -> vector<4x32xf32>
    %c1_339 = arith.constant 1 : index
    %c0_340 = arith.constant 0 : index
    %c0_341 = arith.constant 0 : index
    %827 = vector.load %arg4[%c1_339, %c0_340, %c0_341] : memref<2x1x32xf32, #tpu.memory_space<vmem>>, vector<1x1x32xf32>
    %828 = vector.shape_cast %827 : vector<1x1x32xf32> to vector<1x32xf32>
    %c1_342 = arith.constant 1 : index
    %c0_343 = arith.constant 0 : index
    %c0_344 = arith.constant 0 : index
    %829 = vector.load %arg5[%c1_342, %c0_343, %c0_344] : memref<2x1x32xf32, #tpu.memory_space<vmem>>, vector<1x1x32xf32>
    %830 = vector.shape_cast %829 : vector<1x1x32xf32> to vector<1x32xf32>
    %cst_345 = arith.constant dense<0.000000e+00> : vector<10xf32>
    %831 = vector.multi_reduction <add>, %791, %cst_345 [1] : vector<10x32xf32> to vector<10xf32>
    %832 = vector.shape_cast %831 : vector<10xf32> to vector<10x1xf32>
    %cst_346 = arith.constant 3.200000e+01 : f32
    %833 = vector.broadcast %cst_346 : f32 to vector<10x1xf32>
    %834 = arith.divf %832, %833 : vector<10x1xf32>
    %835 = vector.broadcast %834 : vector<10x1xf32> to vector<10x32xf32>
    %836 = arith.subf %791, %835 : vector<10x32xf32>
    %837 = arith.mulf %836, %836 : vector<10x32xf32>
    %cst_347 = arith.constant dense<0.000000e+00> : vector<10xf32>
    %838 = vector.multi_reduction <add>, %837, %cst_347 [1] : vector<10x32xf32> to vector<10xf32>
    %839 = vector.shape_cast %838 : vector<10xf32> to vector<10x1xf32>
    %cst_348 = arith.constant 3.200000e+01 : f32
    %840 = vector.broadcast %cst_348 : f32 to vector<10x1xf32>
    %841 = arith.divf %839, %840 : vector<10x1xf32>
    %cst_349 = arith.constant 9.99999997E-7 : f32
    %842 = vector.broadcast %cst_349 : f32 to vector<10x1xf32>
    %843 = arith.addf %841, %842 : vector<10x1xf32>
    %844 = math.rsqrt %843 : vector<10x1xf32>
    %845 = vector.broadcast %844 : vector<10x1xf32> to vector<10x32xf32>
    %846 = arith.mulf %836, %845 : vector<10x32xf32>
    %847 = vector.broadcast %828 : vector<1x32xf32> to vector<10x32xf32>
    %848 = arith.mulf %846, %847 : vector<10x32xf32>
    %849 = vector.broadcast %830 : vector<1x32xf32> to vector<10x32xf32>
    %850 = arith.addf %848, %849 : vector<10x32xf32>
    %c1_350 = arith.constant 1 : index
    %c0_351 = arith.constant 0 : index
    %c0_352 = arith.constant 0 : index
    %851 = vector.load %arg6[%c1_350, %c0_351, %c0_352] : memref<2x32x32xbf16, #tpu.memory_space<vmem>>, vector<1x32x32xbf16>
    %852 = vector.shape_cast %851 : vector<1x32x32xbf16> to vector<32x32xbf16>
    %853 = arith.truncf %850 : vector<10x32xf32> to vector<10x32xbf16>
    %cst_353 = arith.constant dense<0.000000e+00> : vector<10x32xf32>
    %854 = tpu.matmul %853, %852, %cst_353 {dimension_numbers = #tpu.dot_dimension_numbers<[1], [0], [0], [1], [0, 0, 1, 1], [], []>} : vector<10x32xbf16>, vector<32x32xbf16>, vector<10x32xf32> -> vector<10x32xf32>
    %c1_354 = arith.constant 1 : index
    %c0_355 = arith.constant 0 : index
    %c0_356 = arith.constant 0 : index
    %855 = vector.load %arg7[%c1_354, %c0_355, %c0_356] : memref<2x1x32xf32, #tpu.memory_space<vmem>>, vector<1x1x32xf32>
    %856 = vector.shape_cast %855 : vector<1x1x32xf32> to vector<1x32xf32>
    %857 = vector.broadcast %856 : vector<1x32xf32> to vector<10x32xf32>
    %858 = arith.addf %854, %857 : vector<10x32xf32>
    %c1_357 = arith.constant 1 : index
    %c0_358 = arith.constant 0 : index
    %c0_359 = arith.constant 0 : index
    %859 = vector.load %arg8[%c1_357, %c0_358, %c0_359] : memref<2x32x32xbf16, #tpu.memory_space<vmem>>, vector<1x32x32xbf16>
    %860 = vector.shape_cast %859 : vector<1x32x32xbf16> to vector<32x32xbf16>
    %861 = arith.truncf %850 : vector<10x32xf32> to vector<10x32xbf16>
    %cst_360 = arith.constant dense<0.000000e+00> : vector<10x32xf32>
    %862 = tpu.matmul %861, %860, %cst_360 {dimension_numbers = #tpu.dot_dimension_numbers<[1], [0], [0], [1], [0, 0, 1, 1], [], []>} : vector<10x32xbf16>, vector<32x32xbf16>, vector<10x32xf32> -> vector<10x32xf32>
    %c1_361 = arith.constant 1 : index
    %c0_362 = arith.constant 0 : index
    %c0_363 = arith.constant 0 : index
    %863 = vector.load %arg9[%c1_361, %c0_362, %c0_363] : memref<2x1x32xf32, #tpu.memory_space<vmem>>, vector<1x1x32xf32>
    %864 = vector.shape_cast %863 : vector<1x1x32xf32> to vector<1x32xf32>
    %865 = vector.broadcast %864 : vector<1x32xf32> to vector<10x32xf32>
    %866 = arith.addf %862, %865 : vector<10x32xf32>
    %c1_364 = arith.constant 1 : index
    %c0_365 = arith.constant 0 : index
    %c0_366 = arith.constant 0 : index
    %867 = vector.load %arg10[%c1_364, %c0_365, %c0_366] : memref<2x32x32xbf16, #tpu.memory_space<vmem>>, vector<1x32x32xbf16>
    %868 = vector.shape_cast %867 : vector<1x32x32xbf16> to vector<32x32xbf16>
    %869 = arith.truncf %850 : vector<10x32xf32> to vector<10x32xbf16>
    %cst_367 = arith.constant dense<0.000000e+00> : vector<10x32xf32>
    %870 = tpu.matmul %869, %868, %cst_367 {dimension_numbers = #tpu.dot_dimension_numbers<[1], [0], [0], [1], [0, 0, 1, 1], [], []>} : vector<10x32xbf16>, vector<32x32xbf16>, vector<10x32xf32> -> vector<10x32xf32>
    %c1_368 = arith.constant 1 : index
    %c0_369 = arith.constant 0 : index
    %c0_370 = arith.constant 0 : index
    %871 = vector.load %arg11[%c1_368, %c0_369, %c0_370] : memref<2x1x32xf32, #tpu.memory_space<vmem>>, vector<1x1x32xf32>
    %872 = vector.shape_cast %871 : vector<1x1x32xf32> to vector<1x32xf32>
    %873 = vector.broadcast %872 : vector<1x32xf32> to vector<10x32xf32>
    %874 = arith.addf %870, %873 : vector<10x32xf32>
    %cst_371 = arith.constant 0.000000e+00 : f32
    %875 = vector.broadcast %cst_371 : f32 to vector<10x32xf32>
    %876 = vector.broadcast %7 : vector<1x32xf32> to vector<10x32xf32>
    %877 = arith.mulf %858, %876 : vector<10x32xf32>
    %878 = arith.truncf %877 : vector<10x32xf32> to vector<10x32xbf16>
    %879 = arith.truncf %866 : vector<10x32xf32> to vector<10x32xbf16>
    %cst_372 = arith.constant dense<0.000000e+00> : vector<10x10xf32>
    %880 = tpu.matmul %878, %879, %cst_372 {dimension_numbers = #tpu.dot_dimension_numbers<[1], [1], [0], [0], [0, 0, 1, 0], [], []>} : vector<10x32xbf16>, vector<10x32xbf16>, vector<10x10xf32> -> vector<10x10xf32>
    %cst_373 = arith.constant 0.353553385 : f32
    %881 = vector.broadcast %cst_373 : f32 to vector<10x10xf32>
    %882 = arith.mulf %880, %881 : vector<10x10xf32>
    %883 = arith.addf %882, %29 : vector<10x10xf32>
    %884 = arith.truncf %877 : vector<10x32xf32> to vector<10x32xbf16>
    %885 = arith.truncf %823 : vector<4x32xf32> to vector<4x32xbf16>
    %cst_374 = arith.constant dense<0.000000e+00> : vector<10x4xf32>
    %886 = tpu.matmul %884, %885, %cst_374 {dimension_numbers = #tpu.dot_dimension_numbers<[1], [1], [0], [0], [0, 0, 1, 0], [], []>} : vector<10x32xbf16>, vector<4x32xbf16>, vector<10x4xf32> -> vector<10x4xf32>
    %cst_375 = arith.constant 0.353553385 : f32
    %887 = vector.broadcast %cst_375 : f32 to vector<10x4xf32>
    %888 = arith.mulf %886, %887 : vector<10x4xf32>
    %889 = arith.addf %888, %30 : vector<10x4xf32>
    %cst_376 = arith.constant dense<0xFF800000> : vector<10xf32>
    %890 = vector.multi_reduction <maximumf>, %883, %cst_376 [1] : vector<10x10xf32> to vector<10xf32>
    %891 = vector.shape_cast %890 : vector<10xf32> to vector<10x1xf32>
    %cst_377 = arith.constant dense<0xFF800000> : vector<10xf32>
    %892 = vector.multi_reduction <maximumf>, %889, %cst_377 [1] : vector<10x4xf32> to vector<10xf32>
    %893 = vector.shape_cast %892 : vector<10xf32> to vector<10x1xf32>
    %894 = arith.maximumf %891, %893 : vector<10x1xf32>
    %895 = vector.broadcast %894 : vector<10x1xf32> to vector<10x10xf32>
    %896 = arith.subf %883, %895 : vector<10x10xf32>
    %897 = math.exp %896 : vector<10x10xf32>
    %898 = vector.broadcast %894 : vector<10x1xf32> to vector<10x4xf32>
    %899 = arith.subf %889, %898 : vector<10x4xf32>
    %900 = math.exp %899 : vector<10x4xf32>
    %cst_378 = arith.constant dense<0.000000e+00> : vector<10xf32>
    %901 = vector.multi_reduction <add>, %897, %cst_378 [1] : vector<10x10xf32> to vector<10xf32>
    %902 = vector.shape_cast %901 : vector<10xf32> to vector<10x1xf32>
    %cst_379 = arith.constant dense<0.000000e+00> : vector<10xf32>
    %903 = vector.multi_reduction <add>, %900, %cst_379 [1] : vector<10x4xf32> to vector<10xf32>
    %904 = vector.shape_cast %903 : vector<10xf32> to vector<10x1xf32>
    %905 = arith.addf %902, %904 : vector<10x1xf32>
    %906 = tpu.reciprocal %905 {approx = true} : vector<10x1xf32> -> vector<10x1xf32>
    %907 = vector.broadcast %7 : vector<1x32xf32> to vector<10x32xf32>
    %908 = arith.mulf %874, %907 : vector<10x32xf32>
    %909 = arith.truncf %897 : vector<10x10xf32> to vector<10x10xbf16>
    %910 = arith.truncf %908 : vector<10x32xf32> to vector<10x32xbf16>
    %cst_380 = arith.constant dense<0.000000e+00> : vector<10x32xf32>
    %911 = tpu.matmul %909, %910, %cst_380 {dimension_numbers = #tpu.dot_dimension_numbers<[1], [0], [0], [1], [0, 0, 1, 1], [], []>} : vector<10x10xbf16>, vector<10x32xbf16>, vector<10x32xf32> -> vector<10x32xf32>
    %912 = vector.broadcast %7 : vector<1x32xf32> to vector<4x32xf32>
    %913 = arith.mulf %826, %912 : vector<4x32xf32>
    %914 = arith.truncf %900 : vector<10x4xf32> to vector<10x4xbf16>
    %915 = arith.truncf %913 : vector<4x32xf32> to vector<4x32xbf16>
    %cst_381 = arith.constant dense<0.000000e+00> : vector<10x32xf32>
    %916 = tpu.matmul %914, %915, %cst_381 {dimension_numbers = #tpu.dot_dimension_numbers<[1], [0], [0], [1], [0, 0, 1, 1], [], []>} : vector<10x4xbf16>, vector<4x32xbf16>, vector<10x32xf32> -> vector<10x32xf32>
    %917 = arith.addf %911, %916 : vector<10x32xf32>
    %918 = vector.broadcast %906 : vector<10x1xf32> to vector<10x32xf32>
    %919 = arith.mulf %917, %918 : vector<10x32xf32>
    %920 = arith.addf %875, %919 : vector<10x32xf32>
    %921 = vector.broadcast %14 : vector<1x32xf32> to vector<10x32xf32>
    %922 = arith.mulf %858, %921 : vector<10x32xf32>
    %923 = arith.truncf %922 : vector<10x32xf32> to vector<10x32xbf16>
    %924 = arith.truncf %866 : vector<10x32xf32> to vector<10x32xbf16>
    %cst_382 = arith.constant dense<0.000000e+00> : vector<10x10xf32>
    %925 = tpu.matmul %923, %924, %cst_382 {dimension_numbers = #tpu.dot_dimension_numbers<[1], [1], [0], [0], [0, 0, 1, 0], [], []>} : vector<10x32xbf16>, vector<10x32xbf16>, vector<10x10xf32> -> vector<10x10xf32>
    %cst_383 = arith.constant 0.353553385 : f32
    %926 = vector.broadcast %cst_383 : f32 to vector<10x10xf32>
    %927 = arith.mulf %925, %926 : vector<10x10xf32>
    %928 = arith.addf %927, %29 : vector<10x10xf32>
    %929 = arith.truncf %922 : vector<10x32xf32> to vector<10x32xbf16>
    %930 = arith.truncf %823 : vector<4x32xf32> to vector<4x32xbf16>
    %cst_384 = arith.constant dense<0.000000e+00> : vector<10x4xf32>
    %931 = tpu.matmul %929, %930, %cst_384 {dimension_numbers = #tpu.dot_dimension_numbers<[1], [1], [0], [0], [0, 0, 1, 0], [], []>} : vector<10x32xbf16>, vector<4x32xbf16>, vector<10x4xf32> -> vector<10x4xf32>
    %cst_385 = arith.constant 0.353553385 : f32
    %932 = vector.broadcast %cst_385 : f32 to vector<10x4xf32>
    %933 = arith.mulf %931, %932 : vector<10x4xf32>
    %934 = arith.addf %933, %30 : vector<10x4xf32>
    %cst_386 = arith.constant dense<0xFF800000> : vector<10xf32>
    %935 = vector.multi_reduction <maximumf>, %928, %cst_386 [1] : vector<10x10xf32> to vector<10xf32>
    %936 = vector.shape_cast %935 : vector<10xf32> to vector<10x1xf32>
    %cst_387 = arith.constant dense<0xFF800000> : vector<10xf32>
    %937 = vector.multi_reduction <maximumf>, %934, %cst_387 [1] : vector<10x4xf32> to vector<10xf32>
    %938 = vector.shape_cast %937 : vector<10xf32> to vector<10x1xf32>
    %939 = arith.maximumf %936, %938 : vector<10x1xf32>
    %940 = vector.broadcast %939 : vector<10x1xf32> to vector<10x10xf32>
    %941 = arith.subf %928, %940 : vector<10x10xf32>
    %942 = math.exp %941 : vector<10x10xf32>
    %943 = vector.broadcast %939 : vector<10x1xf32> to vector<10x4xf32>
    %944 = arith.subf %934, %943 : vector<10x4xf32>
    %945 = math.exp %944 : vector<10x4xf32>
    %cst_388 = arith.constant dense<0.000000e+00> : vector<10xf32>
    %946 = vector.multi_reduction <add>, %942, %cst_388 [1] : vector<10x10xf32> to vector<10xf32>
    %947 = vector.shape_cast %946 : vector<10xf32> to vector<10x1xf32>
    %cst_389 = arith.constant dense<0.000000e+00> : vector<10xf32>
    %948 = vector.multi_reduction <add>, %945, %cst_389 [1] : vector<10x4xf32> to vector<10xf32>
    %949 = vector.shape_cast %948 : vector<10xf32> to vector<10x1xf32>
    %950 = arith.addf %947, %949 : vector<10x1xf32>
    %951 = tpu.reciprocal %950 {approx = true} : vector<10x1xf32> -> vector<10x1xf32>
    %952 = vector.broadcast %14 : vector<1x32xf32> to vector<10x32xf32>
    %953 = arith.mulf %874, %952 : vector<10x32xf32>
    %954 = arith.truncf %942 : vector<10x10xf32> to vector<10x10xbf16>
    %955 = arith.truncf %953 : vector<10x32xf32> to vector<10x32xbf16>
    %cst_390 = arith.constant dense<0.000000e+00> : vector<10x32xf32>
    %956 = tpu.matmul %954, %955, %cst_390 {dimension_numbers = #tpu.dot_dimension_numbers<[1], [0], [0], [1], [0, 0, 1, 1], [], []>} : vector<10x10xbf16>, vector<10x32xbf16>, vector<10x32xf32> -> vector<10x32xf32>
    %957 = vector.broadcast %14 : vector<1x32xf32> to vector<4x32xf32>
    %958 = arith.mulf %826, %957 : vector<4x32xf32>
    %959 = arith.truncf %945 : vector<10x4xf32> to vector<10x4xbf16>
    %960 = arith.truncf %958 : vector<4x32xf32> to vector<4x32xbf16>
    %cst_391 = arith.constant dense<0.000000e+00> : vector<10x32xf32>
    %961 = tpu.matmul %959, %960, %cst_391 {dimension_numbers = #tpu.dot_dimension_numbers<[1], [0], [0], [1], [0, 0, 1, 1], [], []>} : vector<10x4xbf16>, vector<4x32xbf16>, vector<10x32xf32> -> vector<10x32xf32>
    %962 = arith.addf %956, %961 : vector<10x32xf32>
    %963 = vector.broadcast %951 : vector<10x1xf32> to vector<10x32xf32>
    %964 = arith.mulf %962, %963 : vector<10x32xf32>
    %965 = arith.addf %920, %964 : vector<10x32xf32>
    %966 = vector.broadcast %21 : vector<1x32xf32> to vector<10x32xf32>
    %967 = arith.mulf %858, %966 : vector<10x32xf32>
    %968 = arith.truncf %967 : vector<10x32xf32> to vector<10x32xbf16>
    %969 = arith.truncf %866 : vector<10x32xf32> to vector<10x32xbf16>
    %cst_392 = arith.constant dense<0.000000e+00> : vector<10x10xf32>
    %970 = tpu.matmul %968, %969, %cst_392 {dimension_numbers = #tpu.dot_dimension_numbers<[1], [1], [0], [0], [0, 0, 1, 0], [], []>} : vector<10x32xbf16>, vector<10x32xbf16>, vector<10x10xf32> -> vector<10x10xf32>
    %cst_393 = arith.constant 0.353553385 : f32
    %971 = vector.broadcast %cst_393 : f32 to vector<10x10xf32>
    %972 = arith.mulf %970, %971 : vector<10x10xf32>
    %973 = arith.addf %972, %29 : vector<10x10xf32>
    %974 = arith.truncf %967 : vector<10x32xf32> to vector<10x32xbf16>
    %975 = arith.truncf %823 : vector<4x32xf32> to vector<4x32xbf16>
    %cst_394 = arith.constant dense<0.000000e+00> : vector<10x4xf32>
    %976 = tpu.matmul %974, %975, %cst_394 {dimension_numbers = #tpu.dot_dimension_numbers<[1], [1], [0], [0], [0, 0, 1, 0], [], []>} : vector<10x32xbf16>, vector<4x32xbf16>, vector<10x4xf32> -> vector<10x4xf32>
    %cst_395 = arith.constant 0.353553385 : f32
    %977 = vector.broadcast %cst_395 : f32 to vector<10x4xf32>
    %978 = arith.mulf %976, %977 : vector<10x4xf32>
    %979 = arith.addf %978, %30 : vector<10x4xf32>
    %cst_396 = arith.constant dense<0xFF800000> : vector<10xf32>
    %980 = vector.multi_reduction <maximumf>, %973, %cst_396 [1] : vector<10x10xf32> to vector<10xf32>
    %981 = vector.shape_cast %980 : vector<10xf32> to vector<10x1xf32>
    %cst_397 = arith.constant dense<0xFF800000> : vector<10xf32>
    %982 = vector.multi_reduction <maximumf>, %979, %cst_397 [1] : vector<10x4xf32> to vector<10xf32>
    %983 = vector.shape_cast %982 : vector<10xf32> to vector<10x1xf32>
    %984 = arith.maximumf %981, %983 : vector<10x1xf32>
    %985 = vector.broadcast %984 : vector<10x1xf32> to vector<10x10xf32>
    %986 = arith.subf %973, %985 : vector<10x10xf32>
    %987 = math.exp %986 : vector<10x10xf32>
    %988 = vector.broadcast %984 : vector<10x1xf32> to vector<10x4xf32>
    %989 = arith.subf %979, %988 : vector<10x4xf32>
    %990 = math.exp %989 : vector<10x4xf32>
    %cst_398 = arith.constant dense<0.000000e+00> : vector<10xf32>
    %991 = vector.multi_reduction <add>, %987, %cst_398 [1] : vector<10x10xf32> to vector<10xf32>
    %992 = vector.shape_cast %991 : vector<10xf32> to vector<10x1xf32>
    %cst_399 = arith.constant dense<0.000000e+00> : vector<10xf32>
    %993 = vector.multi_reduction <add>, %990, %cst_399 [1] : vector<10x4xf32> to vector<10xf32>
    %994 = vector.shape_cast %993 : vector<10xf32> to vector<10x1xf32>
    %995 = arith.addf %992, %994 : vector<10x1xf32>
    %996 = tpu.reciprocal %995 {approx = true} : vector<10x1xf32> -> vector<10x1xf32>
    %997 = vector.broadcast %21 : vector<1x32xf32> to vector<10x32xf32>
    %998 = arith.mulf %874, %997 : vector<10x32xf32>
    %999 = arith.truncf %987 : vector<10x10xf32> to vector<10x10xbf16>
    %1000 = arith.truncf %998 : vector<10x32xf32> to vector<10x32xbf16>
    %cst_400 = arith.constant dense<0.000000e+00> : vector<10x32xf32>
    %1001 = tpu.matmul %999, %1000, %cst_400 {dimension_numbers = #tpu.dot_dimension_numbers<[1], [0], [0], [1], [0, 0, 1, 1], [], []>} : vector<10x10xbf16>, vector<10x32xbf16>, vector<10x32xf32> -> vector<10x32xf32>
    %1002 = vector.broadcast %21 : vector<1x32xf32> to vector<4x32xf32>
    %1003 = arith.mulf %826, %1002 : vector<4x32xf32>
    %1004 = arith.truncf %990 : vector<10x4xf32> to vector<10x4xbf16>
    %1005 = arith.truncf %1003 : vector<4x32xf32> to vector<4x32xbf16>
    %cst_401 = arith.constant dense<0.000000e+00> : vector<10x32xf32>
    %1006 = tpu.matmul %1004, %1005, %cst_401 {dimension_numbers = #tpu.dot_dimension_numbers<[1], [0], [0], [1], [0, 0, 1, 1], [], []>} : vector<10x4xbf16>, vector<4x32xbf16>, vector<10x32xf32> -> vector<10x32xf32>
    %1007 = arith.addf %1001, %1006 : vector<10x32xf32>
    %1008 = vector.broadcast %996 : vector<10x1xf32> to vector<10x32xf32>
    %1009 = arith.mulf %1007, %1008 : vector<10x32xf32>
    %1010 = arith.addf %965, %1009 : vector<10x32xf32>
    %1011 = vector.broadcast %28 : vector<1x32xf32> to vector<10x32xf32>
    %1012 = arith.mulf %858, %1011 : vector<10x32xf32>
    %1013 = arith.truncf %1012 : vector<10x32xf32> to vector<10x32xbf16>
    %1014 = arith.truncf %866 : vector<10x32xf32> to vector<10x32xbf16>
    %cst_402 = arith.constant dense<0.000000e+00> : vector<10x10xf32>
    %1015 = tpu.matmul %1013, %1014, %cst_402 {dimension_numbers = #tpu.dot_dimension_numbers<[1], [1], [0], [0], [0, 0, 1, 0], [], []>} : vector<10x32xbf16>, vector<10x32xbf16>, vector<10x10xf32> -> vector<10x10xf32>
    %cst_403 = arith.constant 0.353553385 : f32
    %1016 = vector.broadcast %cst_403 : f32 to vector<10x10xf32>
    %1017 = arith.mulf %1015, %1016 : vector<10x10xf32>
    %1018 = arith.addf %1017, %29 : vector<10x10xf32>
    %1019 = arith.truncf %1012 : vector<10x32xf32> to vector<10x32xbf16>
    %1020 = arith.truncf %823 : vector<4x32xf32> to vector<4x32xbf16>
    %cst_404 = arith.constant dense<0.000000e+00> : vector<10x4xf32>
    %1021 = tpu.matmul %1019, %1020, %cst_404 {dimension_numbers = #tpu.dot_dimension_numbers<[1], [1], [0], [0], [0, 0, 1, 0], [], []>} : vector<10x32xbf16>, vector<4x32xbf16>, vector<10x4xf32> -> vector<10x4xf32>
    %cst_405 = arith.constant 0.353553385 : f32
    %1022 = vector.broadcast %cst_405 : f32 to vector<10x4xf32>
    %1023 = arith.mulf %1021, %1022 : vector<10x4xf32>
    %1024 = arith.addf %1023, %30 : vector<10x4xf32>
    %cst_406 = arith.constant dense<0xFF800000> : vector<10xf32>
    %1025 = vector.multi_reduction <maximumf>, %1018, %cst_406 [1] : vector<10x10xf32> to vector<10xf32>
    %1026 = vector.shape_cast %1025 : vector<10xf32> to vector<10x1xf32>
    %cst_407 = arith.constant dense<0xFF800000> : vector<10xf32>
    %1027 = vector.multi_reduction <maximumf>, %1024, %cst_407 [1] : vector<10x4xf32> to vector<10xf32>
    %1028 = vector.shape_cast %1027 : vector<10xf32> to vector<10x1xf32>
    %1029 = arith.maximumf %1026, %1028 : vector<10x1xf32>
    %1030 = vector.broadcast %1029 : vector<10x1xf32> to vector<10x10xf32>
    %1031 = arith.subf %1018, %1030 : vector<10x10xf32>
    %1032 = math.exp %1031 : vector<10x10xf32>
    %1033 = vector.broadcast %1029 : vector<10x1xf32> to vector<10x4xf32>
    %1034 = arith.subf %1024, %1033 : vector<10x4xf32>
    %1035 = math.exp %1034 : vector<10x4xf32>
    %cst_408 = arith.constant dense<0.000000e+00> : vector<10xf32>
    %1036 = vector.multi_reduction <add>, %1032, %cst_408 [1] : vector<10x10xf32> to vector<10xf32>
    %1037 = vector.shape_cast %1036 : vector<10xf32> to vector<10x1xf32>
    %cst_409 = arith.constant dense<0.000000e+00> : vector<10xf32>
    %1038 = vector.multi_reduction <add>, %1035, %cst_409 [1] : vector<10x4xf32> to vector<10xf32>
    %1039 = vector.shape_cast %1038 : vector<10xf32> to vector<10x1xf32>
    %1040 = arith.addf %1037, %1039 : vector<10x1xf32>
    %1041 = tpu.reciprocal %1040 {approx = true} : vector<10x1xf32> -> vector<10x1xf32>
    %1042 = vector.broadcast %28 : vector<1x32xf32> to vector<10x32xf32>
    %1043 = arith.mulf %874, %1042 : vector<10x32xf32>
    %1044 = arith.truncf %1032 : vector<10x10xf32> to vector<10x10xbf16>
    %1045 = arith.truncf %1043 : vector<10x32xf32> to vector<10x32xbf16>
    %cst_410 = arith.constant dense<0.000000e+00> : vector<10x32xf32>
    %1046 = tpu.matmul %1044, %1045, %cst_410 {dimension_numbers = #tpu.dot_dimension_numbers<[1], [0], [0], [1], [0, 0, 1, 1], [], []>} : vector<10x10xbf16>, vector<10x32xbf16>, vector<10x32xf32> -> vector<10x32xf32>
    %1047 = vector.broadcast %28 : vector<1x32xf32> to vector<4x32xf32>
    %1048 = arith.mulf %826, %1047 : vector<4x32xf32>
    %1049 = arith.truncf %1035 : vector<10x4xf32> to vector<10x4xbf16>
    %1050 = arith.truncf %1048 : vector<4x32xf32> to vector<4x32xbf16>
    %cst_411 = arith.constant dense<0.000000e+00> : vector<10x32xf32>
    %1051 = tpu.matmul %1049, %1050, %cst_411 {dimension_numbers = #tpu.dot_dimension_numbers<[1], [0], [0], [1], [0, 0, 1, 1], [], []>} : vector<10x4xbf16>, vector<4x32xbf16>, vector<10x32xf32> -> vector<10x32xf32>
    %1052 = arith.addf %1046, %1051 : vector<10x32xf32>
    %1053 = vector.broadcast %1041 : vector<10x1xf32> to vector<10x32xf32>
    %1054 = arith.mulf %1052, %1053 : vector<10x32xf32>
    %1055 = arith.addf %1010, %1054 : vector<10x32xf32>
    %c1_412 = arith.constant 1 : index
    %c0_413 = arith.constant 0 : index
    %c0_414 = arith.constant 0 : index
    %1056 = vector.load %arg12[%c1_412, %c0_413, %c0_414] : memref<2x32x32xbf16, #tpu.memory_space<vmem>>, vector<1x32x32xbf16>
    %1057 = vector.shape_cast %1056 : vector<1x32x32xbf16> to vector<32x32xbf16>
    %1058 = arith.truncf %1055 : vector<10x32xf32> to vector<10x32xbf16>
    %cst_415 = arith.constant dense<0.000000e+00> : vector<10x32xf32>
    %1059 = tpu.matmul %1058, %1057, %cst_415 {dimension_numbers = #tpu.dot_dimension_numbers<[1], [0], [0], [1], [0, 0, 1, 1], [], []>} : vector<10x32xbf16>, vector<32x32xbf16>, vector<10x32xf32> -> vector<10x32xf32>
    %1060 = arith.addf %791, %1059 : vector<10x32xf32>
    %c1_416 = arith.constant 1 : index
    %c0_417 = arith.constant 0 : index
    %c0_418 = arith.constant 0 : index
    %1061 = vector.load %arg13[%c1_416, %c0_417, %c0_418] : memref<2x1x32xf32, #tpu.memory_space<vmem>>, vector<1x1x32xf32>
    %1062 = vector.shape_cast %1061 : vector<1x1x32xf32> to vector<1x32xf32>
    %1063 = vector.broadcast %1062 : vector<1x32xf32> to vector<10x32xf32>
    %1064 = arith.addf %1060, %1063 : vector<10x32xf32>
    %c1_419 = arith.constant 1 : index
    %c0_420 = arith.constant 0 : index
    %c0_421 = arith.constant 0 : index
    %1065 = vector.load %arg14[%c1_419, %c0_420, %c0_421] : memref<2x1x32xf32, #tpu.memory_space<vmem>>, vector<1x1x32xf32>
    %1066 = vector.shape_cast %1065 : vector<1x1x32xf32> to vector<1x32xf32>
    %c1_422 = arith.constant 1 : index
    %c0_423 = arith.constant 0 : index
    %c0_424 = arith.constant 0 : index
    %1067 = vector.load %arg15[%c1_422, %c0_423, %c0_424] : memref<2x1x32xf32, #tpu.memory_space<vmem>>, vector<1x1x32xf32>
    %1068 = vector.shape_cast %1067 : vector<1x1x32xf32> to vector<1x32xf32>
    %cst_425 = arith.constant dense<0.000000e+00> : vector<10xf32>
    %1069 = vector.multi_reduction <add>, %1064, %cst_425 [1] : vector<10x32xf32> to vector<10xf32>
    %1070 = vector.shape_cast %1069 : vector<10xf32> to vector<10x1xf32>
    %cst_426 = arith.constant 3.200000e+01 : f32
    %1071 = vector.broadcast %cst_426 : f32 to vector<10x1xf32>
    %1072 = arith.divf %1070, %1071 : vector<10x1xf32>
    %1073 = vector.broadcast %1072 : vector<10x1xf32> to vector<10x32xf32>
    %1074 = arith.subf %1064, %1073 : vector<10x32xf32>
    %1075 = arith.mulf %1074, %1074 : vector<10x32xf32>
    %cst_427 = arith.constant dense<0.000000e+00> : vector<10xf32>
    %1076 = vector.multi_reduction <add>, %1075, %cst_427 [1] : vector<10x32xf32> to vector<10xf32>
    %1077 = vector.shape_cast %1076 : vector<10xf32> to vector<10x1xf32>
    %cst_428 = arith.constant 3.200000e+01 : f32
    %1078 = vector.broadcast %cst_428 : f32 to vector<10x1xf32>
    %1079 = arith.divf %1077, %1078 : vector<10x1xf32>
    %cst_429 = arith.constant 9.99999997E-7 : f32
    %1080 = vector.broadcast %cst_429 : f32 to vector<10x1xf32>
    %1081 = arith.addf %1079, %1080 : vector<10x1xf32>
    %1082 = math.rsqrt %1081 : vector<10x1xf32>
    %1083 = vector.broadcast %1082 : vector<10x1xf32> to vector<10x32xf32>
    %1084 = arith.mulf %1074, %1083 : vector<10x32xf32>
    %1085 = vector.broadcast %1066 : vector<1x32xf32> to vector<10x32xf32>
    %1086 = arith.mulf %1084, %1085 : vector<10x32xf32>
    %1087 = vector.broadcast %1068 : vector<1x32xf32> to vector<10x32xf32>
    %1088 = arith.addf %1086, %1087 : vector<10x32xf32>
    %c1_430 = arith.constant 1 : index
    %c0_431 = arith.constant 0 : index
    %c0_432 = arith.constant 0 : index
    %1089 = vector.load %arg16[%c1_430, %c0_431, %c0_432] : memref<2x32x128xbf16, #tpu.memory_space<vmem>>, vector<1x32x128xbf16>
    %1090 = vector.shape_cast %1089 : vector<1x32x128xbf16> to vector<32x128xbf16>
    %1091 = arith.truncf %1088 : vector<10x32xf32> to vector<10x32xbf16>
    %cst_433 = arith.constant dense<0.000000e+00> : vector<10x128xf32>
    %1092 = tpu.matmul %1091, %1090, %cst_433 {dimension_numbers = #tpu.dot_dimension_numbers<[1], [0], [0], [1], [0, 0, 1, 1], [], []>} : vector<10x32xbf16>, vector<32x128xbf16>, vector<10x128xf32> -> vector<10x128xf32>
    %c1_434 = arith.constant 1 : index
    %c0_435 = arith.constant 0 : index
    %c0_436 = arith.constant 0 : index
    %1093 = vector.load %arg17[%c1_434, %c0_435, %c0_436] : memref<2x1x128xf32, #tpu.memory_space<vmem>>, vector<1x1x128xf32>
    %1094 = vector.shape_cast %1093 : vector<1x1x128xf32> to vector<1x128xf32>
    %1095 = vector.broadcast %1094 : vector<1x128xf32> to vector<10x128xf32>
    %1096 = arith.addf %1092, %1095 : vector<10x128xf32>
    %cst_437 = arith.constant 5.000000e-01 : f32
    %1097 = vector.broadcast %cst_437 : f32 to vector<10x128xf32>
    %1098 = arith.mulf %1097, %1096 : vector<10x128xf32>
    %cst_438 = arith.constant 0.707106769 : f32
    %1099 = vector.broadcast %cst_438 : f32 to vector<10x128xf32>
    %1100 = arith.mulf %1096, %1099 : vector<10x128xf32>
    %1101 = math.erf %1100 : vector<10x128xf32>
    %cst_439 = arith.constant 1.000000e+00 : f32
    %1102 = vector.broadcast %cst_439 : f32 to vector<10x128xf32>
    %1103 = arith.addf %1102, %1101 : vector<10x128xf32>
    %1104 = arith.mulf %1098, %1103 : vector<10x128xf32>
    %c1_440 = arith.constant 1 : index
    %c0_441 = arith.constant 0 : index
    %c0_442 = arith.constant 0 : index
    %1105 = vector.load %arg18[%c1_440, %c0_441, %c0_442] : memref<2x128x32xbf16, #tpu.memory_space<vmem>>, vector<1x128x32xbf16>
    %1106 = vector.shape_cast %1105 : vector<1x128x32xbf16> to vector<128x32xbf16>
    %1107 = arith.truncf %1104 : vector<10x128xf32> to vector<10x128xbf16>
    %cst_443 = arith.constant dense<0.000000e+00> : vector<10x32xf32>
    %1108 = tpu.matmul %1107, %1106, %cst_443 {dimension_numbers = #tpu.dot_dimension_numbers<[1], [0], [0], [1], [0, 0, 1, 1], [], []>} : vector<10x128xbf16>, vector<128x32xbf16>, vector<10x32xf32> -> vector<10x32xf32>
    %1109 = arith.addf %1064, %1108 : vector<10x32xf32>
    %c1_444 = arith.constant 1 : index
    %c0_445 = arith.constant 0 : index
    %c0_446 = arith.constant 0 : index
    %1110 = vector.load %arg19[%c1_444, %c0_445, %c0_446] : memref<2x1x32xf32, #tpu.memory_space<vmem>>, vector<1x1x32xf32>
    %1111 = vector.shape_cast %1110 : vector<1x1x32xf32> to vector<1x32xf32>
    %1112 = vector.broadcast %1111 : vector<1x32xf32> to vector<10x32xf32>
    %1113 = arith.addf %1109, %1112 : vector<10x32xf32>
    %c0_447 = arith.constant 0 : index
    %c0_448 = arith.constant 0 : index
    %1114 = vector.load %arg20[%c0_447, %c0_448] : memref<1x32xf32, #tpu.memory_space<vmem>>, vector<1x32xf32>
    %c0_449 = arith.constant 0 : index
    %c0_450 = arith.constant 0 : index
    %1115 = vector.load %arg21[%c0_449, %c0_450] : memref<1x32xf32, #tpu.memory_space<vmem>>, vector<1x32xf32>
    %cst_451 = arith.constant dense<0.000000e+00> : vector<10xf32>
    %1116 = vector.multi_reduction <add>, %1113, %cst_451 [1] : vector<10x32xf32> to vector<10xf32>
    %1117 = vector.shape_cast %1116 : vector<10xf32> to vector<10x1xf32>
    %cst_452 = arith.constant 3.200000e+01 : f32
    %1118 = vector.broadcast %cst_452 : f32 to vector<10x1xf32>
    %1119 = arith.divf %1117, %1118 : vector<10x1xf32>
    %1120 = vector.broadcast %1119 : vector<10x1xf32> to vector<10x32xf32>
    %1121 = arith.subf %1113, %1120 : vector<10x32xf32>
    %1122 = arith.mulf %1121, %1121 : vector<10x32xf32>
    %cst_453 = arith.constant dense<0.000000e+00> : vector<10xf32>
    %1123 = vector.multi_reduction <add>, %1122, %cst_453 [1] : vector<10x32xf32> to vector<10xf32>
    %1124 = vector.shape_cast %1123 : vector<10xf32> to vector<10x1xf32>
    %cst_454 = arith.constant 3.200000e+01 : f32
    %1125 = vector.broadcast %cst_454 : f32 to vector<10x1xf32>
    %1126 = arith.divf %1124, %1125 : vector<10x1xf32>
    %cst_455 = arith.constant 9.99999997E-7 : f32
    %1127 = vector.broadcast %cst_455 : f32 to vector<10x1xf32>
    %1128 = arith.addf %1126, %1127 : vector<10x1xf32>
    %1129 = math.rsqrt %1128 : vector<10x1xf32>
    %1130 = vector.broadcast %1129 : vector<10x1xf32> to vector<10x32xf32>
    %1131 = arith.mulf %1121, %1130 : vector<10x32xf32>
    %1132 = vector.broadcast %1114 : vector<1x32xf32> to vector<10x32xf32>
    %1133 = arith.mulf %1131, %1132 : vector<10x32xf32>
    %1134 = vector.broadcast %1115 : vector<1x32xf32> to vector<10x32xf32>
    %1135 = arith.addf %1133, %1134 : vector<10x32xf32>
    %cst_456 = arith.constant dense<0.000000e+00> : vector<2x32xf32>
    %1136 = tpu.matmul %31, %1135, %cst_456 {dimension_numbers = #tpu.dot_dimension_numbers<[1], [0], [0], [1], [0, 0, 1, 1], [], []>} : vector<2x10xf32>, vector<10x32xf32>, vector<2x32xf32> -> vector<2x32xf32>
    %c0_457 = arith.constant 0 : index
    %c0_458 = arith.constant 0 : index
    %1137 = vector.load %arg22[%c0_457, %c0_458] : memref<32x128xbf16, #tpu.memory_space<vmem>>, vector<32x128xbf16>
    %1138 = arith.truncf %1136 : vector<2x32xf32> to vector<2x32xbf16>
    %cst_459 = arith.constant dense<0.000000e+00> : vector<2x128xf32>
    %1139 = tpu.matmul %1138, %1137, %cst_459 {dimension_numbers = #tpu.dot_dimension_numbers<[1], [0], [0], [1], [0, 0, 1, 1], [], []>} : vector<2x32xbf16>, vector<32x128xbf16>, vector<2x128xf32> -> vector<2x128xf32>
    %c0_460 = arith.constant 0 : index
    %c0_461 = arith.constant 0 : index
    %1140 = vector.load %arg23[%c0_460, %c0_461] : memref<1x128xf32, #tpu.memory_space<vmem>>, vector<1x128xf32>
    %1141 = vector.broadcast %1140 : vector<1x128xf32> to vector<2x128xf32>
    %1142 = arith.addf %1139, %1141 : vector<2x128xf32>
    %c0_462 = arith.constant 0 : index
    %c0_463 = arith.constant 0 : index
    %1143 = vector.load %arg30[%c0_462, %c0_463] : memref<2x128xf32, #tpu.memory_space<vmem>>, vector<2x128xf32>
    tpu.vector_store %arg30[%c0_462, %c0_463], %1142 {strides = array<i32>} : memref<2x128xf32, #tpu.memory_space<vmem>>, vector<2x128xf32>,
    %c0_464 = arith.constant 0 : index
    %c10 = arith.constant 10 : index
    %1144 = vector.load %arg30[%c0_464, %c10] : memref<2x128xf32, #tpu.memory_space<vmem>>, vector<2x32xf32>
    tpu.vector_store %arg30[%c0_464, %c10], %1136 {strides = array<i32>} : memref<2x128xf32, #tpu.memory_space<vmem>>, vector<2x32xf32>,
    return
  }
}

</mosaic_0001>

<bundles_post_ra>
// kernel: tile.7
= control target key start
LH: loop header
LB: loop body
LE: loop exit
PB: predicated region body
PF: predicated region fallthrough
CT: control target
= control target key end

     0   :  { %vm3_vm0 = vcmask 261120   ;;  %s34_s0 = inlined_call_operand.vmem [shape: f32[2,5,32], index: 0, kind: input, shape index: {}]   ;;  %s35_s1 = inlined_call_operand.vmem [shape: f32[10,32], index: 1, kind: output, shape index: {}]  }
   0x1   :  { %v2_v0 = vld [vmem:[%s34_s0] sm:$0x1f]   ;;  %v10_v1 = vld [vmem:[%s34_s0 + $0x8] sm:$0x1f]  }
   0x2   :  { %4 = vst.msk [vmem:[%s35_s1] sm:$0x1f] %vm3_vm0, %v2_v0   ;;  %11 = vst.msk [vmem:[%s35_s1 + $0x5] sm:$0x1f] %vm3_vm0, %v10_v1  }

// kernel: _lambda_.1
= control target key start
LH: loop header
LB: loop body
LE: loop exit
PB: predicated region body
PF: predicated region fallthrough
CT: control target
= control target key end

     0   :  { %s7274_s6 = smov 1   ;;  %s7275_s10 = smov 2   ;;  %s8718_s0 = inlined_call_operand.smem [shape: u32[31], index: -1, kind: input, shape index: {}] }
   0x1   :  { %s7320_s5 = sld [smem:[%s8718_s0]]   ;;  %s7276_s14 = smov 3  }
   0x2   :  { %s7325_s9 = sld [smem:[%s8718_s0 + %s7274_s6]]   ;;  %s7277_s18 = smov 4  }
   0x3   :  { %s7330_s13 = sld [smem:[%s8718_s0 + %s7275_s10]]   ;;  %s7278_s22 = smov 5  }
   0x4   :  { %s7335_s17 = sld [smem:[%s8718_s0 + %s7276_s14]]   ;;  %s7279_s26 = smov 6  }
   0x5   :  { %s7340_s21 = sld [smem:[%s8718_s0 + %s7277_s18]]   ;;  %s7280_s30 = smov 7  }
   0x6   :  { %s7345_s25 = sld [smem:[%s8718_s0 + %s7278_s22]]   ;;  %s7281_s4 = smov 8  }
   0x7   :  { %s7350_s29 = sld [smem:[%s8718_s0 + %s7279_s26]]   ;;  %s7282_s10 = smov 9  }
   0x8   :  { %s7355_s3 = sld [smem:[%s8718_s0 + %s7280_s30]]   ;;  %s7283_s15 = smov 10  }
   0x9   :  { %s7360_s8 = sld [smem:[%s8718_s0 + %s7281_s4]]   ;;  %s7284_s20 = smov 11  }
   0xa   :  { %s7365_s14 = sld [smem:[%s8718_s0 + %s7282_s10]]   ;;  %s7285_s26 = smov 12  }
   0xb   :  { %s7370_s19 = sld [smem:[%s8718_s0 + %s7283_s15]]   ;;  %s7286_s1 = smov 13  }
   0xc   :  { %s7375_s24 = sld [smem:[%s8718_s0 + %s7284_s20]]   ;;  %s7287_s7 = smov 14  }
   0xd   :  { %s7380_s30 = sld [smem:[%s8718_s0 + %s7285_s26]]   ;;  %s7288_s15 = smov 15  }
   0xe   :  { %s7385_s6 = sld [smem:[%s8718_s0 + %s7286_s1]]   ;;  %s7289_s22 = smov 16  }
   0xf   :  { %s7390_s12 = sld [smem:[%s8718_s0 + %s7287_s7]]   ;;  %s7290_s28 = smov 17  }
  0x10   :  { %s7395_s20 = sld [smem:[%s8718_s0 + %s7288_s15]]   ;;  %s7291_s7 = smov 18  }
  0x11   :  { %s7400_s27 = sld [smem:[%s8718_s0 + %s7289_s22]]   ;;  %s7292_s15 = smov 19  }
  0x12   :  { %s7405_s4 = sld [smem:[%s8718_s0 + %s7290_s28]]   ;;  %s7293_s22 = smov 20  }
  0x13   :  { %s7294_s28 = smov 21  }
  0x15   :  { %8731 = sst [smem:[#allocation5_spill]] %s7390_s12 }
  0x16   :  { %8732 = sst [smem:[#allocation6_spill]] %s7395_s20 }
  0x17   :  { %8733 = sst [smem:[#allocation7_spill]] %s7400_s27 }
  0x18   :  { %8734 = sst [smem:[#allocation8_spill]] %s7405_s4 }
  0x19   :  { %s7410_s12 = sld [smem:[%s8718_s0 + %s7291_s7]]   ;;  %s7295_s7 = smov 22  }
  0x1a   :  { %s7415_s20 = sld [smem:[%s8718_s0 + %s7292_s15]]   ;;  %s7296_s15 = smov 23  }
  0x1b   :  { %s7420_s27 = sld [smem:[%s8718_s0 + %s7293_s22]]   ;;  %s7297_s22 = smov 24  }
  0x1c   :  { %s7425_s4 = sld [smem:[%s8718_s0 + %s7294_s28]]   ;;  %s7298_s28 = smov 25  }
  0x1f   :  { %8735 = sst [smem:[#allocation9_spill]] %s7410_s12 }
  0x20   :  { %8736 = sst [smem:[#allocation10_spill]] %s7415_s20 }
  0x21   :  { %8737 = sst [smem:[#allocation11_spill]] %s7420_s27 }
  0x22   :  { %8738 = sst [smem:[#allocation12_spill]] %s7425_s4 }
  0x23   :  { %s7430_s12 = sld [smem:[%s8718_s0 + %s7295_s7]]   ;;  %s7299_s7 = smov 26  }
  0x24   :  { %s7435_s20 = sld [smem:[%s8718_s0 + %s7296_s15]]   ;;  %s7300_s15 = smov 27  }
  0x25   :  { %s7440_s27 = sld [smem:[%s8718_s0 + %s7297_s22]]   ;;  %s7301_s22 = smov 28  }
  0x26   :  { %s7445_s4 = sld [smem:[%s8718_s0 + %s7298_s28]]   ;;  %s7302_s28 = smov 29  }
  0x29   :  { %8739 = sst [smem:[#allocation13_spill]] %s7430_s12 }
  0x2a   :  { %8740 = sst [smem:[#allocation14_spill]] %s7435_s20 }
  0x2b   :  { %8741 = sst [smem:[#allocation15_spill]] %s7440_s27 }
  0x2c   :  { %8742 = sst [smem:[#allocation16_spill]] %s7445_s4 }
  0x2d   :  { %s7450_s12 = sld [smem:[%s8718_s0 + %s7299_s7]]   ;;  %s7303_s7 = smov 30  }
  0x2e   :  { %s7455_s20 = sld [smem:[%s8718_s0 + %s7300_s15]]  }
  0x2f   :  { %s7460_s27 = sld [smem:[%s8718_s0 + %s7301_s22]]  }
  0x30   :  { %s7465_s4 = sld [smem:[%s8718_s0 + %s7302_s28]]  }
  0x33   :  { %8743 = sst [smem:[#allocation17_spill]] %s7450_s12 }
  0x34   :  { %s7470_s12 = sld [smem:[%s8718_s0 + %s7303_s7]]  }
  0x35   :  { %v6888_v0 = vld [vmem:[%s7325_s9 + $0x40] sm:$0xff]   ;;  %v6892_v4 = vld [vmem:[%s7325_s9 + $0x48] sm:$0xff]   ;;  %v6896_v8 = vld [vmem:[%s7325_s9 + $0x50] sm:$0xff]  }
  0x36   :  { %v6889_v1 = vld [vmem:[%s7325_s9] sm:$0xff]   ;;  %6010 = vmatprep.subr.bf16.mxu0 %v6888_v0  ;;  %v6893_v5 = vld [vmem:[%s7325_s9 + $0x8] sm:$0xff]   ;;  %v6897_v9 = vld [vmem:[%s7325_s9 + $0x10] sm:$0xff]  }
  0x37   :  { %v6890_v2 = vld [vmem:[%s7325_s9 + $0xc0] sm:$0xff]   ;;  %6011 = vmatpush3.bf16.msra.mxu0 %v6889_v1  ;;  %v6894_v6 = vld [vmem:[%s7325_s9 + $0xc8] sm:$0xff]   ;;  %v6898_v10 = vld [vmem:[%s7325_s9 + $0xd0] sm:$0xff]  }
  0x38   :  { %v6891_v3 = vld [vmem:[%s7325_s9 + $0x80] sm:$0xff]   ;;  %6032 = vmatprep.subr.bf16.mxu1 %v6890_v2  ;;  %6012 = vmatprep.subr.bf16.mxu0 %v6892_v4  ;;  %v6895_v7 = vld [vmem:[%s7325_s9 + $0x88] sm:$0xff]   ;;  %v6899_v11 = vld [vmem:[%s7325_s9 + $0x90] sm:$0xff]  }
  0x39   :  { %6033 = vmatpush3.bf16.msra.mxu1 %v6891_v3  ;;  %v6900_v12 = vld [vmem:[%s7325_s9 + $0x58] sm:$0xff]   ;;  %v6904_v16 = vld [vmem:[%s7325_s9 + $0x60] sm:$0xff]   ;;  %v6908_v20 = vld [vmem:[%s7325_s9 + $0x68] sm:$0xff]  }
  0x3a   :  { %6034 = vmatprep.subr.bf16.mxu1 %v6894_v6  ;;  %v6901_v13 = vld [vmem:[%s7325_s9 + $0x18] sm:$0xff]   ;;  %v6905_v17 = vld [vmem:[%s7325_s9 + $0x20] sm:$0xff]   ;;  %v6909_v21 = vld [vmem:[%s7325_s9 + $0x28] sm:$0xff]  }
  0x3b   :  { %6013 = vmatpush3.bf16.msra.mxu0 %v6893_v5  ;;  %v6902_v14 = vld [vmem:[%s7325_s9 + $0xd8] sm:$0xff]   ;;  %v6906_v18 = vld [vmem:[%s7325_s9 + $0xe0] sm:$0xff]   ;;  %v6910_v22 = vld [vmem:[%s7325_s9 + $0xe8] sm:$0xff]  }
  0x3c   :  { %6014 = vmatprep.subr.bf16.mxu0 %v6896_v8  ;;  %v6903_v15 = vld [vmem:[%s7325_s9 + $0x98] sm:$0xff]   ;;  %v6907_v19 = vld [vmem:[%s7325_s9 + $0xa0] sm:$0xff]   ;;  %v6911_v23 = vld [vmem:[%s7325_s9 + $0xa8] sm:$0xff]  }
  0x3d   :  { %6035 = vmatpush3.bf16.msra.mxu1 %v6895_v7  ;;  %v6912_v24 = vld [vmem:[%s7325_s9 + $0x70] sm:$0xff]   ;;  %v6916_v28 = vld [vmem:[%s7325_s9 + $0x78] sm:$0xff]   ;;  %v156_v31 = vld [vmem:[%s7320_s5 + $0x8] sm:$0xff] }
  0x3e   :  { %6036 = vmatprep.subr.bf16.mxu1 %v6898_v10  ;;  %v6913_v25 = vld [vmem:[%s7325_s9 + $0x30] sm:$0xff]   ;;  %v6917_v29 = vld [vmem:[%s7325_s9 + $0x38] sm:$0xff]   ;;  %v155_v35 = vld [vmem:[%s7320_s5] sm:$0xff] }
  0x3f   :  { %6015 = vmatpush3.bf16.msra.mxu0 %v6897_v9  ;;  %v6914_v26 = vld [vmem:[%s7325_s9 + $0xf0] sm:$0xff]   ;;  %v6918_v30 = vld [vmem:[%s7325_s9 + $0xf8] sm:$0xff]   ;;  %v6920_v38 = vld [vmem:[%s7325_s9 + $0x140] sm:$0xff]  }
  0x40   :  { %6016 = vmatprep.subr.bf16.mxu0 %v6900_v12  ;;  %v6915_v27 = vld [vmem:[%s7325_s9 + $0xb0] sm:$0xff]   ;;  %v162_v32 = vld [vmem:[%s7320_s5 + $0x38] sm:$0x3]  ;;  %v164_v40 = vld [vmem:[%s7320_s5 + $0x48] sm:$0x3] }
  0x41   :  { %6037 = vmatpush3.bf16.msra.mxu1 %v6899_v11  ;;  %v264_v33 = vpack.c.bf16 %v162_v32, %v156_v31  ;;  %v6919_v34 = vld [vmem:[%s7325_s9 + $0xb8] sm:$0xff]   ;;  %v161_v36 = vld [vmem:[%s7320_s5 + $0x30] sm:$0x3]  ;;  %v6921_v42 = vld [vmem:[%s7325_s9 + $0x100] sm:$0xff]  }
  0x42   :  { %6038 = vmatprep.subr.bf16.mxu1 %v6902_v14  ;;  %v263_v37 = vpack.c.bf16 %v161_v36, %v155_v35  ;;  %v158_v39 = vld [vmem:[%s7320_s5 + $0x18] sm:$0xff]  ;;  %v157_v43 = vld [vmem:[%s7320_s5 + $0x10] sm:$0xff]  ;;  %v163_v44 = vld [vmem:[%s7320_s5 + $0x40] sm:$0x3] }
  0x43   :  { %6017 = vmatpush3.bf16.msra.mxu0 %v6901_v13  ;;  %596 = vmatprep.mubr.bf16.mxu0 %v264_v33  ;;  %v266_v41 = vpack.c.bf16 %v164_v40, %v158_v39  ;;  %v265_v45 = vpack.c.bf16 %v163_v44, %v157_v43  ;;  %v6922_v46 = vld [vmem:[%s7325_s9 + $0x148] sm:$0xff]   ;;  %v6924_v48 = vld [vmem:[%s7325_s9 + $0x150] sm:$0xff]   ;;  %v6926_v50 = vld [vmem:[%s7325_s9 + $0x158] sm:$0xff]  }
  0x44   :  { %6018 = vmatprep.subr.bf16.mxu0 %v6904_v16  ;;  %v6923_v47 = vld [vmem:[%s7325_s9 + $0x108] sm:$0xff]   ;;  %v6925_v49 = vld [vmem:[%s7325_s9 + $0x110] sm:$0xff]   ;;  %v6927_v51 = vld [vmem:[%s7325_s9 + $0x118] sm:$0xff]  }
  0x45   :  { %6039 = vmatpush3.bf16.msra.mxu1 %v6903_v15  ;;  %637 = vmatprep.mubr.bf16.mxu1 %v266_v41  ;;  %v6928_v52 = vld [vmem:[%s7325_s9 + $0x160] sm:$0xff]   ;;  %v6930_v54 = vld [vmem:[%s7325_s9 + $0x168] sm:$0xff]   ;;  %v166_v57 = vld [vmem:[%s7320_s5 + $0x58] sm:$0x3] }
  0x46   :  { %6040 = vmatprep.subr.bf16.mxu1 %v6906_v18  ;;  %v6929_v53 = vld [vmem:[%s7325_s9 + $0x120] sm:$0xff]   ;;  %v160_v55 = vld [vmem:[%s7320_s5 + $0x28] sm:$0xff]  ;;  %v6932_v58 = vld [vmem:[%s7325_s9 + $0x170] sm:$0xff]  }
  0x47   :  { %6019 = vmatpush3.bf16.msra.mxu0 %v6905_v17  ;;  %v6931_v56 = vld [vmem:[%s7325_s9 + $0x128] sm:$0xff]   ;;  %v268_v59 = vpack.c.bf16 %v166_v57, %v160_v55  ;;  %v6933_v60 = vld [vmem:[%s7325_s9 + $0x130] sm:$0xff]   ;;  %v6934_v61 = vld [vmem:[%s7325_s9 + $0x178] sm:$0xff]  }
  0x48   :  { %6020 = vmatprep.subr.bf16.mxu0 %v6908_v20  ;;  %v6935_v62 = vld [vmem:[%s7325_s9 + $0x138] sm:$0xff]   ;;  %v159_v63 = vld [vmem:[%s7320_s5 + $0x20] sm:$0xff]  ;;  %v165_v0 = vld [vmem:[%s7320_s5 + $0x50] sm:$0x3] }
  0x49   :  { %6041 = vmatpush3.bf16.msra.mxu1 %v6907_v19  ;;  %v267_v1 = vpack.c.bf16 %v165_v0, %v159_v63 }
  0x4a   :  { %6042 = vmatprep.subr.bf16.mxu1 %v6910_v22 }
  0x4b   :  { %6021 = vmatpush3.bf16.msra.mxu0 %v6909_v21 }
  0x4c   :  { %6022 = vmatprep.subr.bf16.mxu0 %v6912_v24 }
  0x4d   :  { %6043 = vmatpush3.bf16.msra.mxu1 %v6911_v23 }
  0x4e   :  { %6044 = vmatprep.subr.bf16.mxu1 %v6914_v26 }
  0x4f   :  { %6023 = vmatpush3.bf16.msra.mxu0 %v6913_v25 }
  0x50   :  { %6024 = vmatprep.subr.bf16.mxu0 %v6916_v28 }
  0x51   :  { %6045 = vmatpush3.bf16.msra.mxu1 %v6915_v27 }
  0x52   :  { %6046 = vmatprep.subr.bf16.mxu1 %v6918_v30 }
  0x53   :  { %6025 = vmatpush3.bf16.msra.mxu0 %v6917_v29 }
  0x54   :  { %6054 = vmatprep.subr.bf16.mxu0 %v6920_v38 }
  0x55   :  { %6047 = vmatpush3.bf16.msra.mxu1 %v6919_v34 }
  0x56   :  { %597 = vmatmul.mubr.bf16.vlgmr.msra.gmra.mrb[0].mxu0 %v263_v37 }
  0x57   :  { %6055 = vmatpush3.bf16.msra.mxu0 %v6921_v42  ;;  %678 = vmatprep.mubr.bf16.mxu0 %v268_v59 }
  0x58   :  { %638 = vmatmul.mubr.bf16.vlgmr.msra.gmra.mrb[0].mxu1 %v265_v45  ;;  %6056 = vmatprep.subr.bf16.mxu0 %v6922_v46 }
  0x5b   :  { %6057 = vmatpush3.bf16.msra.mxu0 %v6923_v47 }
  0x5c   :  { %6058 = vmatprep.subr.bf16.mxu0 %v6924_v48 }
  0x5f   :  { %6059 = vmatpush3.bf16.msra.mxu0 %v6925_v49 }
  0x60   :  { %6060 = vmatprep.subr.bf16.mxu0 %v6926_v50 }
  0x63   :  { %6061 = vmatpush3.bf16.msra.mxu0 %v6927_v51 }
  0x64   :  { %6062 = vmatprep.subr.bf16.mxu0 %v6928_v52 }
  0x67   :  { %6063 = vmatpush3.bf16.msra.mxu0 %v6929_v53 }
  0x68   :  { %6064 = vmatprep.subr.bf16.mxu0 %v6930_v54 }
  0x6b   :  { %6065 = vmatpush3.bf16.msra.mxu0 %v6931_v56 }
  0x6c   :  { %6066 = vmatprep.subr.bf16.mxu0 %v6932_v58 }
  0x6f   :  { %6067 = vmatpush3.bf16.msra.mxu0 %v6933_v60 }
  0x70   :  { %6068 = vmatprep.subr.bf16.mxu0 %v6934_v61 }
  0x73   :  { %6069 = vmatpush3.bf16.msra.mxu0 %v6935_v62 }
  0x76   :  { %679 = vmatmul.mubr.bf16.vlgmr.msra.gmra.mrb[4].mxu0 %v267_v1 }
  0x77   :  { %66 = vsyncpa [#allocation3], 0  ;;  %v5779_v3 = vld [vmem:[%s7330_s13] ss:$0 sm:$0xff]  ;;  %v688_v27 = vld [vmem:[%s7335_s17 + $0x8] sm:$0x3] }
  0x78   :  { %v687_v23 = vld [vmem:[%s7335_s17] sm:$0xff]  ;;  %vm693_vm0 = vcmask 261120   ;;  %vm697_vm1 = vcmask 254976   ;;  %v7304_v44 = vmov 0.0   ;;  %v6937_v45 = vld [vmem:[%s7350_s29 + $0x8] sm:$0xff]   ;;  %vm7305_vm2 = vmmov 0  }
  0x79   :  { %v6936_v43 = vld [vmem:[%s7350_s29] sm:$0xff]   ;;  %6272 = vmatprep.subr.bf16.mxu1 %v7304_v44  ;;  %6314 = vmatprep.subr.bf16.mxu0 %v7304_v44  ;;  %v6939_v0 = vld [vmem:[%s7360_s8 + $0x8] sm:$0xff]   ;;  %vm1018_vm13 = vcmask 1044480   ;;  %vm989_vm14 = vcmask 80896   ;;  %vm993_vm15 = vcmask 74752   ;;  %s8744_s0 = sld [smem:[#allocation7_spill]] }
  0x7a   :  { %6273 = vmatpush3.bf16.msra.mxu1 %v6936_v43  ;;  %6276 = vmatprep.mubr.msk.bf16.mxu1 %vm7305_vm2, %v7304_v44  ;;  %v5828_v54 = vld [vmem:[%s7340_s21] ss:$0 sm:$0xff]  ;;  %s8745_s5 = sld [smem:[#allocation9_spill]]  ;;  %s8746_s9 = sld [smem:[#allocation5_spill]] }
  0x7b   :  { %6274 = vmatprep.subr.bf16.mxu1 %v7304_v44  ;;  %6316 = vmatprep.mubr.msk.bf16.mxu0 %vm7305_vm2, %v7304_v44  ;;  %v5829_v58 = vld [vmem:[%s7345_s25] ss:$0 sm:$0xff]  ;;  %s8747_s13 = sld [smem:[#allocation6_spill]]  ;;  %s8748_s17 = sld [smem:[#allocation8_spill]] }
  0x7c   :  { %v6938_v62 = vld [vmem:[%s7360_s8] sm:$0xff]   ;;  %s8749_s15 = sld [smem:[#allocation10_spill]]  ;;  %s8752_s16 = sld [smem:[#allocation16_spill]] }
  0x7d   :  { %v6940_v1 = vld [vmem:[%s7370_s19] sm:$0xff]   ;;  %s8753_s18 = sld [smem:[#allocation11_spill]]  ;;  %s8754_s22 = sld [smem:[#allocation12_spill]] }
  0x7e   :  { %6275 = vmatpush3.bf16.msra.mxu1 %v6937_v45  ;;  %s8755_s23 = sld [smem:[#allocation17_spill]]  ;;  %s8758_s26 = sld [smem:[#allocation15_spill]] }
  0x7f   :  { %6280 = vmatprep.subr.bf16.mxu1 %v7304_v44  ;;  %s7308_s28 = smov 64   ;;  %s7309_s1 = smov 96  }
 0x129   :  { %v6026_v2 = vpop.f32.mrb[0].mxu0 }
 0x12a   :  { %v6027_v4 = vpop.f32.mrb[1].mxu0 }
 0x12b   :  { %v6028_v5 = vadd.f32 %v6027_v4, %v6026_v2  ;;  %v6029_v6 = vpop.f32.mrb[2].mxu0  ;;  %v6048_v7 = vpop.f32.mrb[0].mxu1  ;;  %v6941_v2 = vld [vmem:[%s7370_s19 + $0x8] sm:$0xff]  }
 0x12c   :  { %v6030_v8 = vpop.f32.mrb[3].mxu0  ;;  %v6049_v11 = vpop.f32.mrb[1].mxu1 }
 0x12d   :  { %v599_v9 = vadd.f32 %v6028_v5, %v5779_v3  ;;  %v6031_v10 = vadd.f32 %v6030_v8, %v6029_v6  ;;  %v6050_v12 = vadd.f32 %v6049_v11, %v6048_v7  ;;  %v6051_v13 = vpop.f32.mrb[2].mxu1  ;;  %v5830_v5 = vld [vmem:[%s7355_s3] ss:$0 sm:$0xff] }
 0x12e   :  { %v6052_v15 = vpop.f32.mrb[3].mxu1 }
 0x12f   :  { %v602_v14 = vadd.f32 %v6031_v10, %v5779_v3  ;;  %v640_v16 = vadd.f32 %v6050_v12, %v599_v9  ;;  %v6053_v17 = vadd.f32 %v6052_v15, %v6051_v13  ;;  %v128_v3 = vlaneseq }
 0x131   :  { %v643_v18 = vadd.f32 %v6053_v17, %v602_v14  ;;  %v129_v4 = vand.u32 127, %v128_v3 }
 0x133   :  { %vm135_vm3 = vcmp.ge.s32.totalorder %v129_v4, 8  ;;  %vm136_vm4 = vcmp.lt.s32.totalorder %v129_v4, 16  ;;  %vm140_vm5 = vcmp.ge.s32.totalorder %v129_v4, 16  ;;  %vm141_vm6 = vcmp.lt.s32.totalorder %v129_v4, 24 }
 0x134   :  { %vm145_vm7 = vcmp.ge.s32.totalorder %v129_v4, 24  ;;  %vm146_vm8 = vcmp.lt.s32.totalorder %v129_v4, 32  ;;  %vm137_vm9 = vmand %vm135_vm3, %vm136_vm4  ;;  %vm131_vm11 = vcmp.lt.s32.totalorder %v129_v4, 8  ;;  %vm2955_vm3 = vcmask 257024  }
 0x135   :  { %vm142_vm10 = vmand %vm140_vm5, %vm141_vm6  ;;  %v7578_v9 = vsel %vm131_vm11, 1.0, %v7304_v44  ;;  %v7581_v10 = vsel %vm137_vm9, 1.0, %v7304_v44  ;;  %vm2878_vm4 = vcmask 1041408   ;;  %vm7307_vm5 = vmmov 1  }
 0x136   :  { %vm147_vm12 = vmand %vm145_vm7, %vm146_vm8  ;;  %v7584_v11 = vsel %vm142_vm10, 1.0, %v7304_v44  ;;  %vm3073_vm9 = vcmask 31744   ;;  %vm3178_vm10 = vcmask 25600  }
 0x137   :  { %v7587_v12 = vsel %vm147_vm12, 1.0, %v7304_v44  ;;  %vm8041_vm6 = vmpackc.low %vm2878_vm4, %vm7307_vm5 }
 0x149   :  { %v6070_v19 = vpop.f32.mrb[4].mxu0 }
 0x14a   :  { %v6071_v20 = vpop.f32.mrb[5].mxu0 }
 0x14b   :  { %v6072_v21 = vadd.f32 %v6071_v20, %v6070_v19  ;;  %v6073_v22 = vpop.f32.mrb[6].mxu0 }
 0x14c   :  { %v6074_v24 = vpop.f32.mrb[7].mxu0 }
 0x14d   :  { %v681_v25 = vadd.f32 %v6072_v21, %v640_v16  ;;  %v6075_v26 = vadd.f32 %v6074_v24, %v6073_v22 }
 0x14f   :  { %v7535_v28 = vadd.f32 %v687_v23, %v681_v25  ;;  %v684_v29 = vadd.f32 %v6075_v26, %v643_v18 }
 0x151   :  { %v7537_v30 = vadd.f32 %v688_v27, %v684_v29  ;;  %v694_v31 = vsel %vm693_vm0, %v7535_v28, 0.0  ;;  %v5834_v29 = vld [vmem:[%s7365_s14] ss:$0 sm:$0xff] }
 0x152   :  { %695 = vadd.xlane.f32.xlu0 %v694_v31 }
 0x153   :  { %v698_v32 = vsel %vm697_vm1, %v7537_v30, 0.0 }
 0x156   :  { %699 = vadd.xlane.f32.xlu0 %v698_v32 }
 0x1df   :  { %v696_v33 = vpop.xlane.xlu0 %695 }
 0x1e0   :  { %v702_v34 = vmul.f32 0.03125, %v696_v33 }
 0x1e2   :  { %v704_v35 = vsub.f32 %v7535_v28, %v702_v34 }
 0x1e3   :  { %v700_v36 = vpop.xlane.xlu0 %699 }
 0x1e4   :  { %v703_v37 = vmul.f32 0.03125, %v700_v36  ;;  %v706_v38 = vmul.f32 %v704_v35, %v704_v35 }
 0x1e6   :  { %v705_v39 = vsub.f32 %v7537_v30, %v703_v37  ;;  %v708_v40 = vsel %vm693_vm0, %v706_v38, 0.0  ;;  %v5838_v38 = vld [vmem:[%s7375_s24] ss:$0 sm:$0xff] }
 0x1e7   :  { %709 = vadd.xlane.f32.xlu1 %v708_v40 }
 0x1e8   :  { %v707_v41 = vmul.f32 %v705_v39, %v705_v39 }
 0x1ea   :  { %v711_v42 = vsel %vm697_vm1, %v707_v41, 0.0 }
 0x1eb   :  { %712 = vadd.xlane.f32.xlu1 %v711_v42 }
 0x274   :  { %v710_v46 = vpop.xlane.xlu1 %709 }
 0x275   :  { %v714_v47 = vmul.f32 0.03125, %v710_v46 }
 0x277   :  { %v716_v48 = vadd.f32 1e-06, %v714_v47 }
 0x278   :  { %v713_v49 = vpop.xlane.xlu1 %712 }
 0x279   :  { %6974 = vrsqrt.f32 %v716_v48  ;;  %v715_v50 = vmul.f32 0.03125, %v713_v49 }
 0x27b   :  { %v717_v51 = vadd.f32 1e-06, %v715_v50 }
 0x27d   :  { %6976 = vrsqrt.f32 %v717_v51 }
 0x283   :  { %v6975_v52 = vpop.eup %6974 }
 0x284   :  { %v720_v53 = vmul.f32 %v6975_v52, %v704_v35 }
 0x286   :  { %v728_v56 = vmul.f32 %v5828_v54, %v720_v53 }
 0x287   :  { %v6977_v55 = vpop.eup %6976 }
 0x288   :  { %v721_v57 = vmul.f32 %v6977_v55, %v705_v39  ;;  %v736_v60 = vadd.f32 %v5829_v58, %v728_v56 }
 0x28a   :  { %v729_v59 = vmul.f32 %v5828_v54, %v721_v57 }
 0x28c   :  { %v737_v61 = vadd.f32 %v5829_v58, %v729_v59 }
 0x28e   :  { %v742_v63 = vpack.c.bf16 %v737_v61, %v736_v60  ;;  %v7647_v61 = vld [vmem:[%s7455_s20] sm:$0xff] }
 0x290   :  { %6277 = vmatmul.mubr.msk.bf16.vlgmr.msra.gmra.mrb[4].mxu1 %vm693_vm0, %v742_v63 }
 0x291   :  { %6281 = vmatpush3.bf16.msra.mxu1 %v6938_v62  ;;  %6284 = vmatprep.mubr.msk.bf16.mxu1 %vm7305_vm2, %v7304_v44 }
 0x292   :  { %6282 = vmatprep.subr.bf16.mxu1 %v7304_v44 }
 0x295   :  { %6283 = vmatpush3.bf16.msra.mxu1 %v6939_v0 }
 0x296   :  { %6288 = vmatprep.subr.bf16.mxu1 %v7304_v44 }
 0x298   :  { %6285 = vmatmul.mubr.msk.bf16.vlgmr.msra.gmra.mrb[8].mxu1 %vm693_vm0, %v742_v63 }
 0x299   :  { %6289 = vmatpush3.bf16.msra.mxu1 %v6940_v1  ;;  %6292 = vmatprep.mubr.msk.bf16.mxu1 %vm7305_vm2, %v7304_v44  ;;  %v7650_v1 = vld [vmem:[%s7455_s20 + $0x8] sm:$0x3] }
 0x29a   :  { %6290 = vmatprep.subr.bf16.mxu1 %v7304_v44 }
 0x29d   :  { %6291 = vmatpush3.bf16.msra.mxu1 %v6941_v2 }
 0x29e   :  { %6296 = vmatprep.subr.bf16.mxu1 %v7304_v44 }
 0x2a0   :  { %6293 = vmatmul.mubr.msk.bf16.vlgmr.msra.gmra.mrb[12].mxu1 %vm693_vm0, %v742_v63 }
 0x2a1   :  { %6298 = vmatprep.mubr.msk.bf16.mxu1 %vm7305_vm2, %v7304_v44 }
 0x363   :  { %v799_v6 = vpop.f32.mrb[4].mxu1 }
 0x364   :  { %v800_v7 = vadd.f32 %v5830_v5, %v799_v6  ;;  %v6278_v8 = vpop.f32.mrb[5].mxu1 }
 0x365   :  { %v802_v13 = vpop.f32.mrb[6].mxu1 }
 0x366   :  { %v6279_v14 = vpop.f32.mrb[7].mxu1  ;;  %v803_v15 = vadd.f32 %v5830_v5, %v802_v13  ;;  %v934_v16 = vmul.f32 %v7578_v9, %v800_v7  ;;  %v1067_v17 = vmul.f32 %v7581_v10, %v800_v7  ;;  %v1193_v18 = vmul.f32 %v7584_v11, %v800_v7 }
 0x367   :  { %v1319_v19 = vmul.f32 %v7587_v12, %v800_v7 }
 0x368   :  { %v935_v20 = vmul.f32 %v7578_v9, %v803_v15  ;;  %v1068_v21 = vmul.f32 %v7581_v10, %v803_v15  ;;  %v1194_v22 = vmul.f32 %v7584_v11, %v803_v15  ;;  %v1320_v23 = vmul.f32 %v7587_v12, %v803_v15 }
 0x36a   :  { %v7597_v24 = vpack.c.bf16 %v935_v20, %v934_v16  ;;  %v7599_v25 = vpack.c.bf16 %v1068_v21, %v1067_v17  ;;  %v7601_v26 = vpack.c.bf16 %v1194_v22, %v1193_v18  ;;  %v7603_v27 = vpack.c.bf16 %v1320_v23, %v1319_v19 }
 0x36b   :  { %v863_v31 = vpop.f32.mrb[8].mxu1 }
 0x36c   :  { %v6286_v32 = vpop.f32.mrb[9].mxu1  ;;  %v864_v34 = vadd.f32 %v5834_v29, %v863_v31 }
 0x36d   :  { %v866_v33 = vpop.f32.mrb[10].mxu1 }
 0x36e   :  { %v867_v35 = vadd.f32 %v5834_v29, %v866_v33  ;;  %v6287_v36 = vpop.f32.mrb[11].mxu1 }
 0x370   :  { %v937_v37 = vpack.c.bf16 %v867_v35, %v864_v34 }
 0x372   :  { %v7608_v39 = vsel %vm693_vm0, %v937_v37, 0 }
 0x373   :  { %v927_v40 = vpop.f32.mrb[12].mxu1  ;;  %6297 = vmatpush3.bf16.xpose.msra.mxu1 %v7608_v39 }
 0x374   :  { %v928_v41 = vadd.f32 %v5838_v38, %v927_v40  ;;  %v6294_v42 = vpop.f32.mrb[13].mxu1  ;;  %6302 = vmatprep.subr.bf16.mxu1 %v7304_v44 }
 0x375   :  { %v930_v43 = vpop.f32.mrb[14].mxu1 }
 0x376   :  { %v931_v45 = vadd.f32 %v5838_v38, %v930_v43  ;;  %v6295_v46 = vpop.f32.mrb[15].mxu1  ;;  %v1011_v47 = vmul.f32 %v7578_v9, %v928_v41  ;;  %v1138_v48 = vmul.f32 %v7581_v10, %v928_v41  ;;  %v7615_v49 = vmul.f32 %v7584_v11, %v928_v41 }
 0x377   :  { %v7618_v50 = vmul.f32 %v7587_v12, %v928_v41 }
 0x378   :  { %v1012_v51 = vmul.f32 %v7578_v9, %v931_v45  ;;  %v1139_v52 = vmul.f32 %v7581_v10, %v931_v45  ;;  %v7623_v53 = vmul.f32 %v7584_v11, %v931_v45  ;;  %v7626_v54 = vmul.f32 %v7587_v12, %v931_v45 }
 0x37a   :  { %6299 = vmatmul.mubr.msk.bf16.vlgmr.msra.gmra.mrb[16].mxu1 %vm693_vm0, %v7597_v24  ;;  %v1014_v55 = vpack.c.bf16 %v1012_v51, %v1011_v47  ;;  %v1141_v56 = vpack.c.bf16 %v1139_v52, %v1138_v48  ;;  %v1267_v57 = vpack.c.bf16 %v7623_v53, %v7615_v49  ;;  %v1393_v58 = vpack.c.bf16 %v7626_v54, %v7618_v50  ;;  %v6942_v50 = vld [vmem:[%s7380_s30] sm:$0xff]   ;;  %v6943_v54 = vld [vmem:[%s7380_s30 + $0x8] sm:$0xff]  }
 0x37b   :  { %6304 = vmatprep.mubr.msk.bf16.mxu1 %vm7305_vm2, %v7304_v44 }
 0x37c   :  { %v7637_v59 = vsel %vm1018_vm13, %v1014_v55, 0  ;;  %v7640_v60 = vsel %vm1018_vm13, %v1141_v56, 0 }
 0x37d   :  { %6303 = vmatpush3.bf16.msra.mxu1 %v7637_v59  ;;  %6315 = vmatpush3.bf16.msra.mxu0 %v7640_v60 }
 0x37e   :  { %6308 = vmatprep.subr.bf16.mxu1 %v7304_v44  ;;  %6326 = vmatprep.subr.bf16.mxu0 %v7304_v44 }
 0x44d   :  { %v978_v62 = vpop.f32.mrb[16].mxu1 }
 0x44e   :  { %v985_v63 = vmul.f32 0.35355338, %v978_v62  ;;  %v6300_v0 = vpop.f32.mrb[17].mxu1 }
 0x44f   :  { %v981_v2 = vpop.f32.mrb[18].mxu1 }
 0x450   :  { %v7653_v3 = vadd.f32 %v985_v63, %v7647_v61  ;;  %v986_v4 = vmul.f32 0.35355338, %v981_v2  ;;  %v6301_v5 = vpop.f32.mrb[19].mxu1 }
 0x452   :  { %v7656_v6 = vadd.f32 %v986_v4, %v7650_v1  ;;  %v990_v7 = vsel %vm989_vm14, %v7653_v3, -inf }
 0x453   :  { %991 = vmax.xlane.f32.xlu0 %v990_v7 }
 0x454   :  { %v994_v8 = vsel %vm993_vm15, %v7656_v6, -inf }
 0x455   :  { %995 = vmax.xlane.f32.xlu1 %v994_v8 }
 0x4e0   :  { %v7662_v13 = vpop.xlane.xlu0 %991 }
 0x4e1   :  { %v997_v14 = vsub.f32 %v7653_v3, %v7662_v13 }
 0x4e2   :  { %v7666_v15 = vpop.xlane.xlu1 %995 }
 0x4e3   :  { %v999_v16 = vmul.f32 1.442695, %v997_v14  ;;  %v998_v17 = vsub.f32 %v7656_v6, %v7666_v15 }
 0x4e5   :  { %v1001_v18 = vmul.f32 1.442695, %v998_v17  ;;  %6978 = vpow2.f32 %v999_v16 }
 0x4e7   :  { %6980 = vpow2.f32 %v1001_v18 }
 0x4ef   :  { %v6979_v19 = vpop.eup %6978 }
 0x4f0   :  { %v1003_v17 = vsel %vm989_vm14, %v6979_v19, 0.0 }
 0x4f1   :  { %v6981_v20 = vpop.eup %6980 }
 0x4f2   :  { %v1013_v21 = vpack.c.bf16 %v6981_v20, %v6979_v19  ;;  %v1006_v18 = vsel %vm993_vm15, %v6981_v20, 0.0 }
 0x4f4   :  { %6305 = vmatmul.mubr.msk.bf16.vlgmr.msra.gmra.mrb[20].mxu1 %vm989_vm14, %v1013_v21 }
 0x4f5   :  { %6309 = vmatpush3.bf16.xpose.msra.mxu1 %v7608_v39  ;;  %6310 = vmatprep.mubr.msk.bf16.mxu1 %vm7305_vm2, %v7304_v44 }
 0x4f6   :  { %6320 = vmatprep.subr.bf16.mxu1 %v7304_v44 }
 0x4fc   :  { %6311 = vmatmul.mubr.msk.bf16.vlgmr.msra.gmra.mrb[24].mxu1 %vm693_vm0, %v7599_v25 }
 0x4fd   :  { %6321 = vmatpush3.bf16.xpose.msra.mxu1 %v7608_v39  ;;  %6322 = vmatprep.mubr.msk.bf16.mxu1 %vm7305_vm2, %v7304_v44 }
 0x4fe   :  { %6332 = vmatprep.subr.bf16.mxu1 %v7304_v44 }
 0x504   :  { %6323 = vmatmul.mubr.msk.bf16.vlgmr.msra.gmra.mrb[28].mxu1 %vm693_vm0, %v7601_v26 }
 0x505   :  { %6333 = vmatpush3.bf16.xpose.msra.mxu1 %v7608_v39  ;;  %6334 = vmatprep.mubr.msk.bf16.mxu1 %vm7305_vm2, %v7304_v44 }
 0x506   :  { %6344 = vmatprep.subr.bf16.mxu1 %v7304_v44 }
 0x50c   :  { %6335 = vmatmul.mubr.msk.bf16.vlgmr.msra.gmra.mrb[32].mxu1 %vm693_vm0, %v7603_v27 }
 0x50d   :  { %6348 = vmatprep.mubr.msk.bf16.mxu1 %vm7305_vm2, %v7304_v44  ;;  %6345 = vmatpush3.bf16.msra.mxu1 %v6942_v50 }
 0x50e   :  { %6346 = vmatprep.subr.bf16.mxu1 %v7304_v44 }
 0x511   :  { %6347 = vmatpush3.bf16.msra.mxu1 %v6943_v54 }
 0x512   :  { %6360 = vmatprep.subr.bf16.mxu1 %v7304_v44 }
 0x5c7   :  { %v7691_v22 = vpop.f32.mrb[20].mxu1 }
 0x5c8   :  { %v6306_v23 = vpop.f32.mrb[21].mxu1 }
 0x5c9   :  { %v7693_v29 = vpop.f32.mrb[22].mxu1 }
 0x5ca   :  { %v6307_v31 = vpop.f32.mrb[23].mxu1 }
 0x5cf   :  { %v1107_v32 = vpop.f32.mrb[24].mxu1 }
 0x5d0   :  { %v1114_v33 = vmul.f32 0.35355338, %v1107_v32  ;;  %v6312_v34 = vpop.f32.mrb[25].mxu1 }
 0x5d1   :  { %v1110_v35 = vpop.f32.mrb[26].mxu1 }
 0x5d2   :  { %v7696_v36 = vadd.f32 %v1114_v33, %v7647_v61  ;;  %v1115_v37 = vmul.f32 0.35355338, %v1110_v35  ;;  %v6313_v38 = vpop.f32.mrb[27].mxu1 }
 0x5d4   :  { %v7699_v39 = vadd.f32 %v1115_v37, %v7650_v1  ;;  %v1118_v40 = vsel %vm989_vm14, %v7696_v36, -inf }
 0x5d5   :  { %1119 = vmax.xlane.f32.xlu0 %v1118_v40 }
 0x5d6   :  { %v1121_v41 = vsel %vm993_vm15, %v7699_v39, -inf }
 0x5d7   :  { %1122 = vmax.xlane.f32.xlu1 %v1121_v41  ;;  %v1233_v42 = vpop.f32.mrb[28].mxu1 }
 0x5d8   :  { %v1240_v43 = vmul.f32 0.35355338, %v1233_v42  ;;  %v6324_v45 = vpop.f32.mrb[29].mxu1 }
 0x5d9   :  { %v1236_v46 = vpop.f32.mrb[30].mxu1 }
 0x5da   :  { %v7706_v47 = vadd.f32 %v1240_v43, %v7647_v61  ;;  %v1241_v48 = vmul.f32 0.35355338, %v1236_v46  ;;  %v6325_v51 = vpop.f32.mrb[31].mxu1 }
 0x5dc   :  { %v7709_v52 = vadd.f32 %v1241_v48, %v7650_v1  ;;  %v1244_v55 = vsel %vm989_vm14, %v7706_v47, -inf }
 0x5dd   :  { %1245 = vmax.xlane.f32.xlu0 %v1244_v55 }
 0x5de   :  { %v1247_v56 = vsel %vm993_vm15, %v7709_v52, -inf }
 0x5df   :  { %1248 = vmax.xlane.f32.xlu1 %v1247_v56  ;;  %v1359_v62 = vpop.f32.mrb[32].mxu1 }
 0x5e0   :  { %v1366_v63 = vmul.f32 0.35355338, %v1359_v62  ;;  %v6336_v0 = vpop.f32.mrb[33].mxu1 }
 0x5e1   :  { %v1362_v2 = vpop.f32.mrb[34].mxu1 }
 0x5e2   :  { %v7716_v4 = vadd.f32 %v1366_v63, %v7647_v61  ;;  %v1367_v5 = vmul.f32 0.35355338, %v1362_v2  ;;  %v6337_v7 = vpop.f32.mrb[35].mxu1  ;;  %v7758_v63 = vsel %vm1018_vm13, %v1267_v57, 0  ;;  %v7771_v57 = vsel %vm1018_vm13, %v1393_v58, 0 }
 0x5e4   :  { %v7719_v8 = vadd.f32 %v1367_v5, %v7650_v1  ;;  %v1370_v14 = vsel %vm989_vm14, %v7716_v4, -inf }
 0x5e5   :  { %1371 = vmax.xlane.f32.xlu0 %v1370_v14 }
 0x5e6   :  { %v1373_v16 = vsel %vm993_vm15, %v7719_v8, -inf }
 0x5e7   :  { %1374 = vmax.xlane.f32.xlu1 %v1373_v16 }
 0x5e9   :  { %1004 = vadd.xlane.f32.xlu0 %v1003_v17 }
 0x5eb   :  { %1007 = vadd.xlane.f32.xlu1 %v1006_v18 }
 0x662   :  { %v7727_v21 = vpop.xlane.xlu0 %1119 }
 0x663   :  { %v1124_v23 = vsub.f32 %v7696_v36, %v7727_v21 }
 0x664   :  { %v7731_v31 = vpop.xlane.xlu1 %1122 }
 0x665   :  { %v1126_v32 = vmul.f32 1.442695, %v1124_v23  ;;  %v1125_v33 = vsub.f32 %v7699_v39, %v7731_v31 }
 0x667   :  { %6982 = vpow2.f32 %v1126_v32  ;;  %v1128_v34 = vmul.f32 1.442695, %v1125_v33 }
 0x669   :  { %6984 = vpow2.f32 %v1128_v34 }
 0x66a   :  { %v7735_v35 = vpop.xlane.xlu0 %1245 }
 0x66b   :  { %v1250_v19 = vsub.f32 %v7706_v47, %v7735_v35 }
 0x66c   :  { %v7739_v20 = vpop.xlane.xlu1 %1248 }
 0x66d   :  { %v1252_v37 = vmul.f32 1.442695, %v1250_v19  ;;  %v1251_v38 = vsub.f32 %v7709_v52, %v7739_v20 }
 0x66f   :  { %6986 = vpow2.f32 %v1252_v37  ;;  %v1254_v40 = vmul.f32 1.442695, %v1251_v38 }
 0x671   :  { %v6983_v41 = vpop.eup %6982  ;;  %6988 = vpow2.f32 %v1254_v40 }
 0x672   :  { %v7743_v42 = vpop.xlane.xlu0 %1371  ;;  %v1130_v43 = vsel %vm989_vm14, %v6983_v41, 0.0 }
 0x673   :  { %v6985_v45 = vpop.eup %6984  ;;  %v1376_v46 = vsub.f32 %v7716_v4, %v7743_v42  ;;  %1131 = vadd.xlane.f32.xlu0 %v1130_v43 }
 0x674   :  { %v7748_v48 = vpop.xlane.xlu1 %1374  ;;  %v1133_v51 = vsel %vm993_vm15, %v6985_v45, 0.0  ;;  %v1140_v55 = vpack.c.bf16 %v6985_v45, %v6983_v41 }
 0x675   :  { %v1378_v56 = vmul.f32 1.442695, %v1376_v46  ;;  %v1377_v62 = vsub.f32 %v7719_v8, %v7748_v48  ;;  %1134 = vadd.xlane.f32.xlu1 %v1133_v51 }
 0x676   :  { %6317 = vmatmul.mubr.msk.bf16.vlgmr.msra.gmra.mrb[8].mxu0 %vm989_vm14, %v1140_v55  ;;  %v1005_v58 = vpop.xlane.xlu0 %1004 }
 0x677   :  { %6990 = vpow2.f32 %v1378_v56  ;;  %v1380_v0 = vmul.f32 1.442695, %v1377_v62  ;;  %6327 = vmatpush3.bf16.msra.mxu0 %v7758_v63  ;;  %6328 = vmatprep.mubr.msk.bf16.mxu0 %vm7305_vm2, %v7304_v44 }
 0x678   :  { %6338 = vmatprep.subr.bf16.mxu0 %v7304_v44  ;;  %v1008_v32 = vpop.xlane.xlu1 %1007 }
 0x679   :  { %v6987_v2 = vpop.eup %6986  ;;  %6992 = vpow2.f32 %v1380_v0 }
 0x67a   :  { %v1256_v5 = vsel %vm989_vm14, %v6987_v2, 0.0  ;;  %6994 = vrcp.f32 %v1005_v58 }
 0x67b   :  { %v6989_v7 = vpop.eup %6988  ;;  %1257 = vadd.xlane.f32.xlu0 %v1256_v5  ;;  %6996 = vrcp.f32 %v1008_v32 }
 0x67c   :  { %v1259_v49 = vsel %vm993_vm15, %v6989_v7, 0.0  ;;  %v1266_v53 = vpack.c.bf16 %v6989_v7, %v6987_v2 }
 0x67d   :  { %1260 = vadd.xlane.f32.xlu1 %v1259_v49 }
 0x67e   :  { %6329 = vmatmul.mubr.msk.bf16.vlgmr.msra.gmra.mrb[12].mxu0 %vm989_vm14, %v1266_v53 }
 0x67f   :  { %6339 = vmatpush3.bf16.msra.mxu0 %v7771_v57  ;;  %6340 = vmatprep.mubr.msk.bf16.mxu0 %vm7305_vm2, %v7304_v44 }
 0x680   :  { %6352 = vmatprep.subr.bf16.mxu0 %v7304_v44 }
 0x681   :  { %v6991_v14 = vpop.eup %6990 }
 0x682   :  { %v1382_v16 = vsel %vm989_vm14, %v6991_v14, 0.0 }
 0x683   :  { %v6993_v17 = vpop.eup %6992  ;;  %1383 = vadd.xlane.f32.xlu0 %v1382_v16 }
 0x684   :  { %v1385_v18 = vsel %vm993_vm15, %v6993_v17, 0.0  ;;  %v1392_v23 = vpack.c.bf16 %v6993_v17, %v6991_v14  ;;  %v6995_v38 = vpop.eup %6994 }
 0x685   :  { %1386 = vadd.xlane.f32.xlu1 %v1385_v18  ;;  %v6997_v40 = vpop.eup %6996  ;;  %v1063_v45 = vmul.f32 %v6995_v38, %v7691_v22 }
 0x686   :  { %6341 = vmatmul.mubr.msk.bf16.vlgmr.msra.gmra.mrb[16].mxu0 %vm989_vm14, %v1392_v23  ;;  %v1064_v2 = vmul.f32 %v6997_v40, %v7693_v29 }
 0x687   :  { %6356 = vmatprep.mubr.msk.bf16.mxu0 %vm7305_vm2, %v7304_v44 }
 0x700   :  { %v1132_v33 = vpop.xlane.xlu0 %1131 }
 0x701   :  { %6998 = vrcp.f32 %v1132_v33 }
 0x702   :  { %v1135_v34 = vpop.xlane.xlu1 %1134 }
 0x703   :  { %7000 = vrcp.f32 %v1135_v34 }
 0x708   :  { %v1258_v19 = vpop.xlane.xlu0 %1257 }
 0x709   :  { %7002 = vrcp.f32 %v1258_v19 }
 0x70a   :  { %v1261_v37 = vpop.xlane.xlu1 %1260 }
 0x70b   :  { %v6999_v41 = vpop.eup %6998  ;;  %7004 = vrcp.f32 %v1261_v37 }
 0x70d   :  { %v7001_v55 = vpop.eup %7000 }
 0x710   :  { %v1384_v62 = vpop.xlane.xlu0 %1383 }
 0x711   :  { %7006 = vrcp.f32 %v1384_v62 }
 0x712   :  { %v1387_v49 = vpop.xlane.xlu1 %1386 }
 0x713   :  { %v7003_v14 = vpop.eup %7002  ;;  %7008 = vrcp.f32 %v1387_v49 }
 0x715   :  { %v7005_v23 = vpop.eup %7004 }
 0x71b   :  { %v7007_v33 = vpop.eup %7006 }
 0x71d   :  { %v7009_v37 = vpop.eup %7008 }
 0x749   :  { %v1182_v43 = vpop.f32.mrb[8].mxu0 }
 0x74a   :  { %v1189_v46 = vmul.f32 %v6999_v41, %v1182_v43  ;;  %v6318_v51 = vpop.f32.mrb[9].mxu0 }
 0x74b   :  { %v1185_v56 = vpop.f32.mrb[10].mxu0 }
 0x74c   :  { %v1191_v0 = vadd.f32 %v1189_v46, %v1063_v45  ;;  %v1190_v5 = vmul.f32 %v7001_v55, %v1185_v56  ;;  %v6319_v7 = vpop.f32.mrb[11].mxu0  ;;  %v5853_v55 = vld [vmem:[%s7385_s6] ss:$0 sm:$0xff] }
 0x74e   :  { %v1192_v53 = vadd.f32 %v1190_v5, %v1064_v2 }
 0x751   :  { %v1308_v16 = vpop.f32.mrb[12].mxu0 }
 0x752   :  { %v1315_v17 = vmul.f32 %v7003_v14, %v1308_v16  ;;  %v6330_v18 = vpop.f32.mrb[13].mxu0 }
 0x753   :  { %v1311_v22 = vpop.f32.mrb[14].mxu0 }
 0x754   :  { %v1317_v50 = vadd.f32 %v1315_v17, %v1191_v0  ;;  %v1316_v54 = vmul.f32 %v7005_v23, %v1311_v22  ;;  %v6331_v58 = vpop.f32.mrb[15].mxu0 }
 0x756   :  { %v1318_v32 = vadd.f32 %v1316_v54, %v1192_v53 }
 0x759   :  { %v1434_v34 = vpop.f32.mrb[16].mxu0 }
 0x75a   :  { %v1441_v29 = vmul.f32 %v7007_v33, %v1434_v34  ;;  %v6342_v19 = vpop.f32.mrb[17].mxu0  ;;  %v6944_v34 = vld [vmem:[%s8744_s0] sm:$0xff]  }
 0x75b   :  { %v1437_v38 = vpop.f32.mrb[18].mxu0  ;;  %6353 = vmatpush3.bf16.msra.mxu0 %v6944_v34  ;;  %v6946_v19 = vld [vmem:[%s8745_s5] sm:$0xff]  }
 0x75c   :  { %v1443_v40 = vadd.f32 %v1441_v29, %v1317_v50  ;;  %v1442_v41 = vmul.f32 %v7009_v37, %v1437_v38  ;;  %v6343_v43 = vpop.f32.mrb[19].mxu0  ;;  %v6945_v29 = vld [vmem:[%s8744_s0 + $0x8] sm:$0xff]   ;;  %6354 = vmatprep.subr.bf16.mxu0 %v7304_v44 }
 0x75d   :  { %v6947_v37 = vld [vmem:[%s8745_s5 + $0x8] sm:$0xff]  }
 0x75e   :  { %v1444_v45 = vadd.f32 %v1442_v41, %v1318_v32 }
 0x75f   :  { %6355 = vmatpush3.bf16.msra.mxu0 %v6945_v29 }
 0x760   :  { %v1449_v46 = vpack.c.bf16 %v1444_v45, %v1443_v40  ;;  %6380 = vmatprep.subr.bf16.mxu0 %v7304_v44 }
 0x762   :  { %6349 = vmatmul.mubr.msk.bf16.vlgmr.msra.gmra.mrb[36].mxu1 %vm693_vm0, %v1449_v46 }
 0x763   :  { %6376 = vmatprep.mubr.msk.bf16.mxu1 %vm7305_vm2, %v7304_v44  ;;  %6361 = vmatpush3.bf16.msra.mxu1 %v6946_v19 }
 0x764   :  { %6362 = vmatprep.subr.bf16.mxu1 %v7304_v44 }
 0x767   :  { %6363 = vmatpush3.bf16.msra.mxu1 %v6947_v37 }
 0x768   :  { %6364 = vmatprep.subr.bf16.mxu1 %v7304_v44 }
 0x835   :  { %v1499_v51 = vpop.f32.mrb[36].mxu1 }
 0x836   :  { %v1506_v56 = vadd.f32 %v1499_v51, %v7535_v28  ;;  %v6350_v62 = vpop.f32.mrb[37].mxu1 }
 0x837   :  { %v1502_v0 = vpop.f32.mrb[38].mxu1 }
 0x838   :  { %v7793_v2 = vadd.f32 %v5853_v55, %v1506_v56  ;;  %v1507_v5 = vadd.f32 %v1502_v0, %v7537_v30  ;;  %v6351_v7 = vpop.f32.mrb[39].mxu1 }
 0x839   :  { %v5855_v7 = vld [vmem:[%s8747_s13] ss:$0 sm:$0xff] }
 0x83a   :  { %v7796_v49 = vadd.f32 %v5853_v55, %v1507_v5  ;;  %v1519_v53 = vsel %vm693_vm0, %v7793_v2, 0.0  ;;  %v5854_v55 = vld [vmem:[%s8746_s9] ss:$0 sm:$0xff] }
 0x83b   :  { %1520 = vadd.xlane.f32.xlu0 %v1519_v53 }
 0x83c   :  { %v1522_v14 = vsel %vm697_vm1, %v7796_v49, 0.0 }
 0x83d   :  { %1523 = vadd.xlane.f32.xlu1 %v1522_v14 }
 0x8c8   :  { %v1521_v16 = vpop.xlane.xlu0 %1520 }
 0x8c9   :  { %v1525_v17 = vmul.f32 0.03125, %v1521_v16 }
 0x8ca   :  { %v1524_v18 = vpop.xlane.xlu1 %1523 }
 0x8cb   :  { %v1527_v23 = vsub.f32 %v7793_v2, %v1525_v17  ;;  %v1526_v22 = vmul.f32 0.03125, %v1524_v18  ;;  %v6948_v18 = vld [vmem:[%s8745_s5 + $0x10] sm:$0xff]  }
 0x8cc   :  { %6365 = vmatpush3.bf16.msra.mxu1 %v6948_v18 }
 0x8cd   :  { %v1528_v50 = vsub.f32 %v7796_v49, %v1526_v22  ;;  %v1529_v54 = vmul.f32 %v1527_v23, %v1527_v23  ;;  %6366 = vmatprep.subr.bf16.mxu1 %v7304_v44  ;;  %v6950_v22 = vld [vmem:[%s8745_s5 + $0x20] sm:$0xff]  }
 0x8cf   :  { %v1531_v58 = vsel %vm693_vm0, %v1529_v54, 0.0  ;;  %v1530_v32 = vmul.f32 %v1528_v50, %v1528_v50  ;;  %v6952_v54 = vld [vmem:[%s8745_s5 + $0x30] sm:$0xff]  }
 0x8d0   :  { %1532 = vadd.xlane.f32.xlu0 %v1531_v58  ;;  %v6953_v58 = vld [vmem:[%s8745_s5 + $0x38] sm:$0xff]  }
 0x8d1   :  { %v1534_v33 = vsel %vm697_vm1, %v1530_v32, 0.0  ;;  %v5856_v32 = vld [vmem:[%s8748_s17] ss:$0 sm:$0xff] }
 0x8d2   :  { %1535 = vadd.xlane.f32.xlu1 %v1534_v33 }
 0x95d   :  { %v1533_v38 = vpop.xlane.xlu0 %1532 }
 0x95e   :  { %v1537_v40 = vmul.f32 0.03125, %v1533_v38 }
 0x95f   :  { %v1536_v41 = vpop.xlane.xlu1 %1535 }
 0x960   :  { %v1539_v43 = vadd.f32 1e-06, %v1537_v40  ;;  %v1538_v45 = vmul.f32 0.03125, %v1536_v41 }
 0x962   :  { %7010 = vrsqrt.f32 %v1539_v43  ;;  %v1540_v46 = vadd.f32 1e-06, %v1538_v45 }
 0x964   :  { %7012 = vrsqrt.f32 %v1540_v46 }
 0x96c   :  { %v7011_v51 = vpop.eup %7010 }
 0x96d   :  { %v1543_v56 = vmul.f32 %v7011_v51, %v1527_v23  ;;  %v6949_v23 = vld [vmem:[%s8745_s5 + $0x18] sm:$0xff]  }
 0x96e   :  { %v7013_v62 = vpop.eup %7012  ;;  %6367 = vmatpush3.bf16.msra.mxu1 %v6949_v23 }
 0x96f   :  { %v1551_v0 = vmul.f32 %v5854_v55, %v1543_v56  ;;  %v1544_v5 = vmul.f32 %v7013_v62, %v1528_v50  ;;  %6368 = vmatprep.subr.bf16.mxu1 %v7304_v44  ;;  %v6951_v50 = vld [vmem:[%s8745_s5 + $0x28] sm:$0xff]  }
 0x971   :  { %v1552_v53 = vmul.f32 %v5854_v55, %v1544_v5  ;;  %v1559_v14 = vadd.f32 %v5855_v7, %v1551_v0 }
 0x972   :  { %6369 = vmatpush3.bf16.msra.mxu1 %v6950_v22 }
 0x973   :  { %v1560_v16 = vadd.f32 %v5855_v7, %v1552_v53  ;;  %6370 = vmatprep.subr.bf16.mxu1 %v7304_v44  ;;  %v5868_v53 = vld [vmem:[%s8749_s15] ss:$0 sm:$0xff] }
 0x975   :  { %v1565_v17 = vpack.c.bf16 %v1560_v16, %v1559_v14 }
 0x976   :  { %6371 = vmatpush3.bf16.msra.mxu1 %v6951_v50 }
 0x977   :  { %6357 = vmatmul.mubr.msk.bf16.vlgmr.msra.gmra.mrb[20].mxu0 %vm693_vm0, %v1565_v17  ;;  %6372 = vmatprep.subr.bf16.mxu1 %v7304_v44 }
 0x978   :  { %6384 = vmatprep.mubr.msk.bf16.mxu0 %vm7305_vm2, %v7304_v44 }
 0x97a   :  { %6373 = vmatpush3.bf16.msra.mxu1 %v6952_v54 }
 0x97b   :  { %6374 = vmatprep.subr.bf16.mxu1 %v7304_v44 }
 0x97e   :  { %6375 = vmatpush3.bf16.msra.mxu1 %v6953_v58 }
 0x97f   :  { %6410 = vmatprep.subr.bf16.mxu1 %v7304_v44 }
 0xa4a   :  { %v1622_v33 = vpop.f32.mrb[20].mxu0 }
 0xa4b   :  { %v1623_v34 = vadd.f32 %v5856_v32, %v1622_v33  ;;  %v6358_v29 = vpop.f32.mrb[21].mxu0 }
 0xa4c   :  { %v1625_v19 = vpop.f32.mrb[22].mxu0 }
 0xa4d   :  { %v1631_v37 = vmul.f32 0.70710677, %v1623_v34  ;;  %v1626_v38 = vadd.f32 %v5856_v32, %v1625_v19  ;;  %v6359_v40 = vpop.f32.mrb[23].mxu0  ;;  %v1629_v51 = vmul.f32 0.5, %v1623_v34 }
 0xa4f   :  { %7014 = verf.f32 %v1631_v37  ;;  %v1632_v41 = vmul.f32 0.70710677, %v1626_v38  ;;  %v1630_v55 = vmul.f32 0.5, %v1626_v38 }
 0xa51   :  { %7016 = verf.f32 %v1632_v41  ;;  %v6954_v41 = vld [vmem:[%s7350_s29 + $0x10] sm:$0xff]  }
 0xa52   :  { %6381 = vmatpush3.bf16.msra.mxu0 %v6954_v41 }
 0xa53   :  { %6382 = vmatprep.subr.bf16.mxu0 %v7304_v44 }
 0xa59   :  { %v7015_v43 = vpop.eup %7014 }
 0xa5a   :  { %v1635_v45 = vadd.f32 1.0, %v7015_v43  ;;  %v6955_v43 = vld [vmem:[%s7350_s29 + $0x18] sm:$0xff]  }
 0xa5b   :  { %v7017_v46 = vpop.eup %7016  ;;  %6383 = vmatpush3.bf16.msra.mxu0 %v6955_v43 }
 0xa5c   :  { %v1636_v56 = vadd.f32 1.0, %v7017_v46  ;;  %v1637_v62 = vmul.f32 %v1635_v45, %v1629_v51  ;;  %6388 = vmatprep.subr.bf16.mxu0 %v7304_v44 }
 0xa5e   :  { %v1638_v0 = vmul.f32 %v1636_v56, %v1630_v55 }
 0xa60   :  { %v1655_v5 = vpack.c.bf16 %v1638_v0, %v1637_v62 }
 0xa62   :  { %6377 = vmatmul.mubr.bf16.vlgmr.msra.gmra.mrb[40].mxu1 %v1655_v5  ;;  %v5871_v5 = vld [vmem:[%s7340_s21 + $0x1] ss:$0 sm:$0xff] }
 0xa63   :  { %6412 = vmatprep.mubr.msk.bf16.mxu1 %vm7305_vm2, %v7304_v44 }
 0xb35   :  { %v1738_v7 = vpop.f32.mrb[40].mxu1 }
 0xb36   :  { %v1745_v14 = vadd.f32 %v1738_v7, %v7793_v2  ;;  %v6378_v16 = vpop.f32.mrb[41].mxu1 }
 0xb37   :  { %v1741_v17 = vpop.f32.mrb[42].mxu1 }
 0xb38   :  { %v7836_v18 = vadd.f32 %v5868_v53, %v1745_v14  ;;  %v1746_v23 = vadd.f32 %v1741_v17, %v7796_v49  ;;  %v6379_v22 = vpop.f32.mrb[43].mxu1  ;;  %v5872_v17 = vld [vmem:[%s7345_s25 + $0x1] ss:$0 sm:$0xff] }
 0xb3a   :  { %v7839_v50 = vadd.f32 %v5868_v53, %v1746_v23  ;;  %v1760_v54 = vsel %vm693_vm0, %v7836_v18, 0.0 }
 0xb3b   :  { %1761 = vadd.xlane.f32.xlu0 %v1760_v54 }
 0xb3c   :  { %v1763_v58 = vsel %vm697_vm1, %v7839_v50, 0.0 }
 0xb3d   :  { %1764 = vadd.xlane.f32.xlu1 %v1763_v58  ;;  %v6956_v58 = vld [vmem:[%s7360_s8 + $0x10] sm:$0xff]  }
 0xbc8   :  { %v1762_v2 = vpop.xlane.xlu0 %1761 }
 0xbc9   :  { %v1766_v32 = vmul.f32 0.03125, %v1762_v2 }
 0xbca   :  { %v1765_v33 = vpop.xlane.xlu1 %1764 }
 0xbcb   :  { %v1768_v34 = vsub.f32 %v7836_v18, %v1766_v32  ;;  %v1767_v29 = vmul.f32 0.03125, %v1765_v33  ;;  %v6957_v32 = vld [vmem:[%s7360_s8 + $0x18] sm:$0xff]   ;;  %v6958_v33 = vld [vmem:[%s7370_s19 + $0x10] sm:$0xff]  }
 0xbcd   :  { %v1769_v49 = vsub.f32 %v7839_v50, %v1767_v29  ;;  %v1770_v19 = vmul.f32 %v1768_v34, %v1768_v34  ;;  %v5878_v29 = vld [vmem:[%s7355_s3 + $0x1] ss:$0 sm:$0xff] }
 0xbcf   :  { %v1772_v37 = vsel %vm693_vm0, %v1770_v19, 0.0  ;;  %v1771_v38 = vmul.f32 %v1769_v49, %v1769_v49 }
 0xbd0   :  { %1773 = vadd.xlane.f32.xlu0 %v1772_v37 }
 0xbd1   :  { %v1775_v40 = vsel %vm697_vm1, %v1771_v38, 0.0 }
 0xbd2   :  { %1776 = vadd.xlane.f32.xlu1 %v1775_v40 }
 0xc5d   :  { %v1774_v45 = vpop.xlane.xlu0 %1773 }
 0xc5e   :  { %v1778_v46 = vmul.f32 0.03125, %v1774_v45 }
 0xc5f   :  { %v1777_v51 = vpop.xlane.xlu1 %1776 }
 0xc60   :  { %v1780_v55 = vadd.f32 1e-06, %v1778_v46  ;;  %v1779_v56 = vmul.f32 0.03125, %v1777_v51 }
 0xc62   :  { %7018 = vrsqrt.f32 %v1780_v55  ;;  %v1781_v62 = vadd.f32 1e-06, %v1779_v56 }
 0xc64   :  { %7020 = vrsqrt.f32 %v1781_v62 }
 0xc6c   :  { %v7019_v0 = vpop.eup %7018 }
 0xc6d   :  { %v1784_v7 = vmul.f32 %v7019_v0, %v1768_v34  ;;  %v6959_v34 = vld [vmem:[%s7370_s19 + $0x18] sm:$0xff]  }
 0xc6e   :  { %v7021_v53 = vpop.eup %7020 }
 0xc6f   :  { %v1792_v14 = vmul.f32 %v5871_v5, %v1784_v7  ;;  %v1785_v16 = vmul.f32 %v7021_v53, %v1769_v49 }
 0xc71   :  { %v1793_v23 = vmul.f32 %v5871_v5, %v1785_v16  ;;  %v1800_v22 = vadd.f32 %v5872_v17, %v1792_v14  ;;  %v5887_v16 = vld [vmem:[%s7365_s14 + $0x1] ss:$0 sm:$0xff] }
 0xc73   :  { %v1801_v54 = vadd.f32 %v5872_v17, %v1793_v23 }
 0xc75   :  { %v1807_v2 = vpack.c.bf16 %v1801_v54, %v1800_v22 }
 0xc77   :  { %6385 = vmatmul.mubr.msk.bf16.vlgmr.msra.gmra.mrb[24].mxu0 %vm693_vm0, %v1807_v2 }
 0xc78   :  { %6389 = vmatpush3.bf16.msra.mxu0 %v6956_v58  ;;  %6392 = vmatprep.mubr.msk.bf16.mxu0 %vm7305_vm2, %v7304_v44 }
 0xc79   :  { %6390 = vmatprep.subr.bf16.mxu0 %v7304_v44 }
 0xc7c   :  { %6391 = vmatpush3.bf16.msra.mxu0 %v6957_v32 }
 0xc7d   :  { %6396 = vmatprep.subr.bf16.mxu0 %v7304_v44 }
 0xc7f   :  { %6393 = vmatmul.mubr.msk.bf16.vlgmr.msra.gmra.mrb[28].mxu0 %vm693_vm0, %v1807_v2 }
 0xc80   :  { %6397 = vmatpush3.bf16.msra.mxu0 %v6958_v33  ;;  %6400 = vmatprep.mubr.msk.bf16.mxu0 %vm7305_vm2, %v7304_v44  ;;  %v5896_v33 = vld [vmem:[%s7375_s24 + $0x1] ss:$0 sm:$0xff] }
 0xc81   :  { %6398 = vmatprep.subr.bf16.mxu0 %v7304_v44 }
 0xc84   :  { %6399 = vmatpush3.bf16.msra.mxu0 %v6959_v34 }
 0xc85   :  { %6404 = vmatprep.subr.bf16.mxu0 %v7304_v44 }
 0xc87   :  { %6401 = vmatmul.mubr.msk.bf16.vlgmr.msra.gmra.mrb[32].mxu0 %vm693_vm0, %v1807_v2 }
 0xc88   :  { %6406 = vmatprep.mubr.msk.bf16.mxu0 %vm7305_vm2, %v7304_v44 }
 0xd4a   :  { %v1865_v49 = vpop.f32.mrb[24].mxu0 }
 0xd4b   :  { %v1866_v19 = vadd.f32 %v5878_v29, %v1865_v49  ;;  %v6386_v37 = vpop.f32.mrb[25].mxu0 }
 0xd4c   :  { %v1868_v38 = vpop.f32.mrb[26].mxu0 }
 0xd4d   :  { %v6387_v40 = vpop.f32.mrb[27].mxu0  ;;  %v1869_v41 = vadd.f32 %v5878_v29, %v1868_v38  ;;  %v2004_v43 = vmul.f32 %v7578_v9, %v1866_v19  ;;  %v2134_v45 = vmul.f32 %v7581_v10, %v1866_v19  ;;  %v2260_v46 = vmul.f32 %v7584_v11, %v1866_v19 }
 0xd4e   :  { %v2386_v51 = vmul.f32 %v7587_v12, %v1866_v19 }
 0xd4f   :  { %v2005_v55 = vmul.f32 %v7578_v9, %v1869_v41  ;;  %v2135_v56 = vmul.f32 %v7581_v10, %v1869_v41  ;;  %v2261_v62 = vmul.f32 %v7584_v11, %v1869_v41  ;;  %v2387_v0 = vmul.f32 %v7587_v12, %v1869_v41 }
 0xd51   :  { %v2006_v5 = vpack.c.bf16 %v2005_v55, %v2004_v43  ;;  %v2136_v7 = vpack.c.bf16 %v2135_v56, %v2134_v45  ;;  %v2262_v53 = vpack.c.bf16 %v2261_v62, %v2260_v46  ;;  %v2388_v14 = vpack.c.bf16 %v2387_v0, %v2386_v51 }
 0xd52   :  { %v1931_v17 = vpop.f32.mrb[28].mxu0 }
 0xd53   :  { %v6394_v23 = vpop.f32.mrb[29].mxu0  ;;  %v1932_v54 = vadd.f32 %v5887_v16, %v1931_v17 }
 0xd54   :  { %v1934_v22 = vpop.f32.mrb[30].mxu0 }
 0xd55   :  { %v1935_v58 = vadd.f32 %v5887_v16, %v1934_v22  ;;  %v6395_v2 = vpop.f32.mrb[31].mxu0 }
 0xd57   :  { %v2007_v32 = vpack.c.bf16 %v1935_v58, %v1932_v54 }
 0xd59   :  { %v2012_v34 = vsel %vm693_vm0, %v2007_v32, 0 }
 0xd5a   :  { %v1997_v29 = vpop.f32.mrb[32].mxu0  ;;  %6405 = vmatpush3.bf16.xpose.msra.mxu0 %v2012_v34 }
 0xd5b   :  { %v1998_v49 = vadd.f32 %v5896_v33, %v1997_v29  ;;  %v6402_v19 = vpop.f32.mrb[33].mxu0  ;;  %6416 = vmatprep.subr.bf16.mxu0 %v7304_v44 }
 0xd5c   :  { %v2000_v37 = vpop.f32.mrb[34].mxu0 }
 0xd5d   :  { %v2001_v38 = vadd.f32 %v5896_v33, %v2000_v37  ;;  %v6403_v40 = vpop.f32.mrb[35].mxu0  ;;  %v2079_v41 = vmul.f32 %v7578_v9, %v1998_v49  ;;  %v7887_v43 = vmul.f32 %v7581_v10, %v1998_v49  ;;  %v7890_v45 = vmul.f32 %v7584_v11, %v1998_v49 }
 0xd5e   :  { %v7893_v46 = vmul.f32 %v7587_v12, %v1998_v49 }
 0xd5f   :  { %v2080_v51 = vmul.f32 %v7578_v9, %v2001_v38  ;;  %v7897_v55 = vmul.f32 %v7581_v10, %v2001_v38  ;;  %v7900_v56 = vmul.f32 %v7584_v11, %v2001_v38  ;;  %v7903_v62 = vmul.f32 %v7587_v12, %v2001_v38 }
 0xd61   :  { %6407 = vmatmul.mubr.msk.bf16.vlgmr.msra.gmra.mrb[36].mxu0 %vm693_vm0, %v2006_v5  ;;  %v2082_v0 = vpack.c.bf16 %v2080_v51, %v2079_v41  ;;  %v2208_v16 = vpack.c.bf16 %v7897_v55, %v7887_v43 }
 0xd62   :  { %6417 = vmatpush3.bf16.xpose.msra.mxu0 %v2012_v34  ;;  %6418 = vmatprep.mubr.msk.bf16.mxu0 %vm7305_vm2, %v7304_v44 }
 0xd63   :  { %v2087_v22 = vsel %vm1018_vm13, %v2082_v0, 0  ;;  %6428 = vmatprep.subr.bf16.mxu0 %v7304_v44 }
 0xd64   :  { %6411 = vmatpush3.bf16.msra.mxu1 %v2087_v22 }
 0xd65   :  { %6422 = vmatprep.subr.bf16.mxu1 %v7304_v44 }
 0xd69   :  { %6419 = vmatmul.mubr.msk.bf16.vlgmr.msra.gmra.mrb[40].mxu0 %vm693_vm0, %v2136_v7 }
 0xd6a   :  { %6429 = vmatpush3.bf16.xpose.msra.mxu0 %v2012_v34  ;;  %6430 = vmatprep.mubr.msk.bf16.mxu0 %vm7305_vm2, %v7304_v44 }
 0xd6b   :  { %6440 = vmatprep.subr.bf16.mxu0 %v7304_v44 }
 0xd71   :  { %6431 = vmatmul.mubr.msk.bf16.vlgmr.msra.gmra.mrb[44].mxu0 %vm693_vm0, %v2262_v53 }
 0xd72   :  { %6441 = vmatpush3.bf16.xpose.msra.mxu0 %v2012_v34  ;;  %6442 = vmatprep.mubr.msk.bf16.mxu0 %vm7305_vm2, %v7304_v44 }
 0xd73   :  { %6452 = vmatprep.subr.bf16.mxu0 %v7304_v44 }
 0xd79   :  { %6443 = vmatmul.mubr.msk.bf16.vlgmr.msra.gmra.mrb[48].mxu0 %vm693_vm0, %v2388_v14 }
 0xd7a   :  { %6456 = vmatprep.mubr.msk.bf16.mxu0 %vm7305_vm2, %v7304_v44 }
 0xe34   :  { %v2048_v5 = vpop.f32.mrb[36].mxu0 }
 0xe35   :  { %v2055_v7 = vmul.f32 0.35355338, %v2048_v5  ;;  %v6408_v54 = vpop.f32.mrb[37].mxu0 }
 0xe36   :  { %v2051_v58 = vpop.f32.mrb[38].mxu0 }
 0xe37   :  { %v2056_v2 = vmul.f32 0.35355338, %v2051_v58  ;;  %v6409_v32 = vpop.f32.mrb[39].mxu0  ;;  %v2057_v33 = vadd.f32 %v2055_v7, %v7647_v61 }
 0xe39   :  { %v2059_v53 = vsel %vm989_vm14, %v2057_v33, -inf  ;;  %v2058_v34 = vadd.f32 %v2056_v2, %v7650_v1 }
 0xe3a   :  { %2060 = vmax.xlane.f32.xlu0 %v2059_v53 }
 0xe3b   :  { %v2062_v29 = vsel %vm993_vm15, %v2058_v34, -inf }
 0xe3c   :  { %2063 = vmax.xlane.f32.xlu1 %v2062_v29  ;;  %v2174_v14 = vpop.f32.mrb[40].mxu0 }
 0xe3d   :  { %v2181_v49 = vmul.f32 0.35355338, %v2174_v14  ;;  %v6420_v19 = vpop.f32.mrb[41].mxu0 }
 0xe3e   :  { %v2177_v37 = vpop.f32.mrb[42].mxu0 }
 0xe3f   :  { %v2182_v38 = vmul.f32 0.35355338, %v2177_v37  ;;  %v6421_v40 = vpop.f32.mrb[43].mxu0  ;;  %v2183_v41 = vadd.f32 %v2181_v49, %v7647_v61 }
 0xe41   :  { %v2185_v51 = vsel %vm989_vm14, %v2183_v41, -inf  ;;  %v2184_v0 = vadd.f32 %v2182_v38, %v7650_v1 }
 0xe42   :  { %2186 = vmax.xlane.f32.xlu0 %v2185_v51 }
 0xe43   :  { %v2188_v22 = vsel %vm993_vm15, %v2184_v0, -inf }
 0xe44   :  { %2189 = vmax.xlane.f32.xlu1 %v2188_v22  ;;  %v2300_v5 = vpop.f32.mrb[44].mxu0 }
 0xe45   :  { %v2307_v7 = vmul.f32 0.35355338, %v2300_v5  ;;  %v6432_v54 = vpop.f32.mrb[45].mxu0 }
 0xe46   :  { %v2303_v58 = vpop.f32.mrb[46].mxu0 }
 0xe47   :  { %v2308_v2 = vmul.f32 0.35355338, %v2303_v58  ;;  %v6433_v32 = vpop.f32.mrb[47].mxu0  ;;  %v2309_v53 = vadd.f32 %v2307_v7, %v7647_v61 }
 0xe49   :  { %v2311_v29 = vsel %vm989_vm14, %v2309_v53, -inf  ;;  %v2310_v14 = vadd.f32 %v2308_v2, %v7650_v1 }
 0xe4a   :  { %2312 = vmax.xlane.f32.xlu0 %v2311_v29 }
 0xe4b   :  { %v2314_v49 = vsel %vm993_vm15, %v2310_v14, -inf }
 0xe4c   :  { %2315 = vmax.xlane.f32.xlu1 %v2314_v49  ;;  %v2426_v19 = vpop.f32.mrb[48].mxu0 }
 0xe4d   :  { %v2433_v37 = vmul.f32 0.35355338, %v2426_v19  ;;  %v6444_v38 = vpop.f32.mrb[49].mxu0 }
 0xe4e   :  { %v2429_v40 = vpop.f32.mrb[50].mxu0 }
 0xe4f   :  { %v2434_v51 = vmul.f32 0.35355338, %v2429_v40  ;;  %v6445_v22 = vpop.f32.mrb[51].mxu0  ;;  %v2435_v5 = vadd.f32 %v2433_v37, %v7647_v61 }
 0xe51   :  { %v2437_v54 = vsel %vm989_vm14, %v2435_v5, -inf  ;;  %v2436_v7 = vadd.f32 %v2434_v51, %v7650_v1 }
 0xe52   :  { %2438 = vmax.xlane.f32.xlu0 %v2437_v54 }
 0xe53   :  { %v2440_v58 = vsel %vm993_vm15, %v2436_v7, -inf }
 0xe54   :  { %2441 = vmax.xlane.f32.xlu1 %v2440_v58 }
 0xec7   :  { %v2061_v2 = vpop.xlane.xlu0 %2060 }
 0xec8   :  { %v2065_v32 = vsub.f32 %v2057_v33, %v2061_v2 }
 0xec9   :  { %v2064_v29 = vpop.xlane.xlu1 %2063 }
 0xeca   :  { %v2067_v49 = vmul.f32 1.442695, %v2065_v32  ;;  %v2066_v23 = vsub.f32 %v2058_v34, %v2064_v29 }
 0xecc   :  { %7022 = vpow2.f32 %v2067_v49  ;;  %v2069_v19 = vmul.f32 1.442695, %v2066_v23 }
 0xece   :  { %7024 = vpow2.f32 %v2069_v19 }
 0xecf   :  { %v2187_v38 = vpop.xlane.xlu0 %2186 }
 0xed0   :  { %v2191_v40 = vsub.f32 %v2183_v41, %v2187_v38 }
 0xed1   :  { %v2190_v22 = vpop.xlane.xlu1 %2189 }
 0xed2   :  { %v2193_v61 = vmul.f32 1.442695, %v2191_v40  ;;  %v2192_v37 = vsub.f32 %v2184_v0, %v2190_v22  ;;  %v8750_v22 = vpack.c.bf16 %v7900_v56, %v7890_v45  ;;  %v8751_v45 = vpack.c.bf16 %v7903_v62, %v7893_v46  ;;  %v6960_v46 = vld [vmem:[%s7380_s30 + $0x10] sm:$0xff]   ;;  %v6961_v62 = vld [vmem:[%s7380_s30 + $0x18] sm:$0xff]  }
 0xed3   :  { %6453 = vmatpush3.bf16.msra.mxu0 %v6960_v46 }
 0xed4   :  { %7026 = vpow2.f32 %v2193_v61  ;;  %v2195_v17 = vmul.f32 1.442695, %v2192_v37  ;;  %v2339_v61 = vsel %vm1018_vm13, %v8750_v22, 0  ;;  %v2465_v56 = vsel %vm1018_vm13, %v8751_v45, 0  ;;  %6454 = vmatprep.subr.bf16.mxu0 %v7304_v44 }
 0xed6   :  { %v7023_v1 = vpop.eup %7022  ;;  %7028 = vpow2.f32 %v2195_v17  ;;  %v2213_v17 = vsel %vm1018_vm13, %v2208_v16, 0 }
 0xed7   :  { %v2313_v51 = vpop.xlane.xlu0 %2312  ;;  %v2071_v54 = vsel %vm989_vm14, %v7023_v1, 0.0  ;;  %6455 = vmatpush3.bf16.msra.mxu0 %v6961_v62 }
 0xed8   :  { %v7025_v58 = vpop.eup %7024  ;;  %v2317_v33 = vsub.f32 %v2309_v53, %v2313_v51  ;;  %2072 = vadd.xlane.f32.xlu0 %v2071_v54  ;;  %6468 = vmatprep.subr.bf16.mxu0 %v7304_v44 }
 0xed9   :  { %v2316_v2 = vpop.xlane.xlu1 %2315  ;;  %v2074_v34 = vsel %vm993_vm15, %v7025_v58, 0.0  ;;  %v2081_v23 = vpack.c.bf16 %v7025_v58, %v7023_v1 }
 0xeda   :  { %v2319_v32 = vmul.f32 1.442695, %v2317_v33  ;;  %v2318_v29 = vsub.f32 %v2310_v14, %v2316_v2  ;;  %2075 = vadd.xlane.f32.xlu1 %v2074_v34 }
 0xedb   :  { %6413 = vmatmul.mubr.msk.bf16.vlgmr.msra.gmra.mrb[44].mxu1 %vm989_vm14, %v2081_v23 }
 0xedc   :  { %7030 = vpow2.f32 %v2319_v32  ;;  %v2321_v41 = vmul.f32 1.442695, %v2318_v29  ;;  %6423 = vmatpush3.bf16.msra.mxu1 %v2213_v17  ;;  %6424 = vmatprep.mubr.msk.bf16.mxu1 %vm7305_vm2, %v7304_v44 }
 0xedd   :  { %6434 = vmatprep.subr.bf16.mxu1 %v7304_v44 }
 0xede   :  { %v7027_v0 = vpop.eup %7026  ;;  %7032 = vpow2.f32 %v2321_v41 }
 0xedf   :  { %v2439_v53 = vpop.xlane.xlu0 %2438  ;;  %v2197_v14 = vsel %vm989_vm14, %v7027_v0, 0.0 }
 0xee0   :  { %v7029_v49 = vpop.eup %7028  ;;  %v2443_v19 = vsub.f32 %v2435_v5, %v2439_v53  ;;  %2198 = vadd.xlane.f32.xlu0 %v2197_v14 }
 0xee1   :  { %v2442_v38 = vpop.xlane.xlu1 %2441  ;;  %v2200_v43 = vsel %vm993_vm15, %v7029_v49, 0.0  ;;  %v2207_v55 = vpack.c.bf16 %v7029_v49, %v7027_v0 }
 0xee2   :  { %v2445_v16 = vmul.f32 1.442695, %v2443_v19  ;;  %v2444_v40 = vsub.f32 %v2436_v7, %v2442_v38  ;;  %2201 = vadd.xlane.f32.xlu1 %v2200_v43 }
 0xee3   :  { %6425 = vmatmul.mubr.msk.bf16.vlgmr.msra.gmra.mrb[48].mxu1 %vm989_vm14, %v2207_v55 }
 0xee4   :  { %7034 = vpow2.f32 %v2445_v16  ;;  %v2447_v37 = vmul.f32 1.442695, %v2444_v40  ;;  %6435 = vmatpush3.bf16.msra.mxu1 %v2339_v61  ;;  %6436 = vmatprep.mubr.msk.bf16.mxu1 %vm7305_vm2, %v7304_v44 }
 0xee5   :  { %6446 = vmatprep.subr.bf16.mxu1 %v7304_v44 }
 0xee6   :  { %v7031_v5 = vpop.eup %7030  ;;  %7036 = vpow2.f32 %v2447_v37 }
 0xee7   :  { %v2323_v7 = vsel %vm989_vm14, %v7031_v5, 0.0 }
 0xee8   :  { %v7033_v1 = vpop.eup %7032  ;;  %2324 = vadd.xlane.f32.xlu0 %v2323_v7 }
 0xee9   :  { %v2326_v51 = vsel %vm993_vm15, %v7033_v1, 0.0  ;;  %v2333_v54 = vpack.c.bf16 %v7033_v1, %v7031_v5 }
 0xeea   :  { %2327 = vadd.xlane.f32.xlu1 %v2326_v51 }
 0xeeb   :  { %6437 = vmatmul.mubr.msk.bf16.vlgmr.msra.gmra.mrb[52].mxu1 %vm989_vm14, %v2333_v54 }
 0xeec   :  { %6447 = vmatpush3.bf16.msra.mxu1 %v2465_v56  ;;  %6448 = vmatprep.mubr.msk.bf16.mxu1 %vm7305_vm2, %v7304_v44 }
 0xeed   :  { %6460 = vmatprep.subr.bf16.mxu1 %v7304_v44 }
 0xeee   :  { %v7035_v58 = vpop.eup %7034 }
 0xeef   :  { %v2449_v33 = vsel %vm989_vm14, %v7035_v58, 0.0 }
 0xef0   :  { %v7037_v2 = vpop.eup %7036  ;;  %2450 = vadd.xlane.f32.xlu0 %v2449_v33 }
 0xef1   :  { %v2452_v34 = vsel %vm993_vm15, %v7037_v2, 0.0  ;;  %v2459_v23 = vpack.c.bf16 %v7037_v2, %v7035_v58 }
 0xef2   :  { %2453 = vadd.xlane.f32.xlu1 %v2452_v34 }
 0xef3   :  { %6449 = vmatmul.mubr.msk.bf16.vlgmr.msra.gmra.mrb[56].mxu1 %vm989_vm14, %v2459_v23 }
 0xef4   :  { %6464 = vmatprep.mubr.msk.bf16.mxu1 %vm7305_vm2, %v7304_v44 }
 0xf65   :  { %v2073_v32 = vpop.xlane.xlu0 %2072 }
 0xf66   :  { %7038 = vrcp.f32 %v2073_v32 }
 0xf67   :  { %v2076_v29 = vpop.xlane.xlu1 %2075 }
 0xf6d   :  { %v2199_v17 = vpop.xlane.xlu0 %2198 }
 0xf6e   :  { %7040 = vrcp.f32 %v2199_v17 }
 0xf6f   :  { %v2202_v41 = vpop.xlane.xlu1 %2201  ;;  %7042 = vrcp.f32 %v2076_v29 }
 0xf70   :  { %7044 = vrcp.f32 %v2202_v41  ;;  %v7039_v43 = vpop.eup %7038 }
 0xf75   :  { %v2325_v49 = vpop.xlane.xlu0 %2324 }
 0xf76   :  { %7046 = vrcp.f32 %v2325_v49 }
 0xf77   :  { %v2328_v38 = vpop.xlane.xlu1 %2327 }
 0xf78   :  { %v7041_v55 = vpop.eup %7040  ;;  %7048 = vrcp.f32 %v2328_v38 }
 0xf79   :  { %v7043_v40 = vpop.eup %7042 }
 0xf7a   :  { %v7045_v5 = vpop.eup %7044 }
 0xf7d   :  { %v2451_v1 = vpop.xlane.xlu0 %2450 }
 0xf7e   :  { %7050 = vrcp.f32 %v2451_v1 }
 0xf7f   :  { %v2454_v58 = vpop.xlane.xlu1 %2453 }
 0xf80   :  { %v7047_v2 = vpop.eup %7046  ;;  %7052 = vrcp.f32 %v2454_v58 }
 0xf82   :  { %v7049_v62 = vpop.eup %7048 }
 0xfae   :  { %v2123_v0 = vpop.f32.mrb[44].mxu1 }
 0xfaf   :  { %v6414_v53 = vpop.f32.mrb[45].mxu1  ;;  %v2130_v22 = vmul.f32 %v7039_v43, %v2123_v0 }
 0xfb0   :  { %v2126_v14 = vpop.f32.mrb[46].mxu1  ;;  %v7051_v53 = vpop.eup %7050 }
 0xfb1   :  { %v6415_v19 = vpop.f32.mrb[47].mxu1  ;;  %v2131_v51 = vmul.f32 %v7043_v40, %v2126_v14  ;;  %v7053_v38 = vpop.eup %7052 }
 0xfb6   :  { %v2249_v16 = vpop.f32.mrb[48].mxu1 }
 0xfb7   :  { %v2256_v61 = vmul.f32 %v7041_v55, %v2249_v16  ;;  %v6426_v37 = vpop.f32.mrb[49].mxu1 }
 0xfb8   :  { %v2252_v7 = vpop.f32.mrb[50].mxu1 }
 0xfb9   :  { %v2258_v54 = vadd.f32 %v2256_v61, %v2130_v22  ;;  %v2257_v45 = vmul.f32 %v7045_v5, %v2252_v7  ;;  %v6427_v56 = vpop.f32.mrb[51].mxu1  ;;  %v5916_v5 = vld [vmem:[%s7385_s6 + $0x1] ss:$0 sm:$0xff] }
 0xfbb   :  { %v2259_v33 = vadd.f32 %v2257_v45, %v2131_v51 }
 0xfbe   :  { %v2375_v34 = vpop.f32.mrb[52].mxu1 }
 0xfbf   :  { %v2382_v23 = vmul.f32 %v7047_v2, %v2375_v34  ;;  %v6438_v46 = vpop.f32.mrb[53].mxu1 }
 0xfc0   :  { %v2378_v32 = vpop.f32.mrb[54].mxu1 }
 0xfc1   :  { %v2384_v29 = vadd.f32 %v2382_v23, %v2258_v54  ;;  %v2383_v17 = vmul.f32 %v7049_v62, %v2378_v32  ;;  %v6439_v41 = vpop.f32.mrb[55].mxu1 }
 0xfc3   :  { %v2385_v0 = vadd.f32 %v2383_v17, %v2259_v33 }
 0xfc6   :  { %v2501_v14 = vpop.f32.mrb[56].mxu1 }
 0xfc7   :  { %v2508_v49 = vmul.f32 %v7051_v53, %v2501_v14  ;;  %v6450_v19 = vpop.f32.mrb[57].mxu1  ;;  %v6963_v53 = vld [vmem:[%s8744_s0 + $0x18] sm:$0xff]   ;;  %v6964_v14 = vld [vmem:[%s8745_s5 + $0x40] sm:$0xff]  }
 0xfc8   :  { %v2504_v43 = vpop.f32.mrb[58].mxu1 }
 0xfc9   :  { %v2510_v55 = vadd.f32 %v2508_v49, %v2384_v29  ;;  %v2509_v16 = vmul.f32 %v7053_v38, %v2504_v43  ;;  %v6451_v40 = vpop.f32.mrb[59].mxu1  ;;  %v6965_v49 = vld [vmem:[%s8745_s5 + $0x48] sm:$0xff]  }
 0xfcb   :  { %v2511_v22 = vadd.f32 %v2509_v16, %v2385_v0  ;;  %v6962_v0 = vld [vmem:[%s8744_s0 + $0x10] sm:$0xff]  }
 0xfcc   :  { %6461 = vmatpush3.bf16.msra.mxu1 %v6962_v0 }
 0xfcd   :  { %v2517_v61 = vpack.c.bf16 %v2511_v22, %v2510_v55  ;;  %6462 = vmatprep.subr.bf16.mxu1 %v7304_v44 }
 0xfcf   :  { %6457 = vmatmul.mubr.msk.bf16.vlgmr.msra.gmra.mrb[52].mxu0 %vm693_vm0, %v2517_v61  ;;  %v5919_v61 = vld [vmem:[%s8746_s9 + $0x1] ss:$0 sm:$0xff] }
 0xfd0   :  { %6484 = vmatprep.mubr.msk.bf16.mxu0 %vm7305_vm2, %v7304_v44  ;;  %6463 = vmatpush3.bf16.msra.mxu1 %v6963_v53 }
 0xfd1   :  { %6469 = vmatpush3.bf16.msra.mxu0 %v6964_v14 }
 0xfd2   :  { %6470 = vmatprep.subr.bf16.mxu0 %v7304_v44 }
 0xfd5   :  { %6471 = vmatpush3.bf16.msra.mxu0 %v6965_v49 }
 0xfd6   :  { %6472 = vmatprep.subr.bf16.mxu0 %v7304_v44 }
0x10a2   :  { %v2567_v37 = vpop.f32.mrb[52].mxu0 }
0x10a3   :  { %v2574_v7 = vadd.f32 %v2567_v37, %v7836_v18  ;;  %v6458_v1 = vpop.f32.mrb[53].mxu0 }
0x10a4   :  { %v2570_v51 = vpop.f32.mrb[54].mxu0 }
0x10a5   :  { %v7988_v54 = vadd.f32 %v5916_v5, %v2574_v7  ;;  %v2575_v45 = vadd.f32 %v2570_v51, %v7839_v50  ;;  %v6459_v56 = vpop.f32.mrb[55].mxu0  ;;  %v5920_v51 = vld [vmem:[%s8747_s13 + $0x1] ss:$0 sm:$0xff] }
0x10a7   :  { %v7991_v58 = vadd.f32 %v5916_v5, %v2575_v45  ;;  %v2590_v33 = vsel %vm693_vm0, %v7988_v54, 0.0 }
0x10a8   :  { %2591 = vadd.xlane.f32.xlu0 %v2590_v33 }
0x10a9   :  { %v2593_v2 = vsel %vm697_vm1, %v7991_v58, 0.0 }
0x10aa   :  { %2594 = vadd.xlane.f32.xlu1 %v2593_v2 }
0x1135   :  { %v2592_v18 = vpop.xlane.xlu0 %2591 }
0x1136   :  { %v2596_v34 = vmul.f32 0.03125, %v2592_v18  ;;  %v6966_v18 = vld [vmem:[%s8745_s5 + $0x50] sm:$0xff]  }
0x1137   :  { %v2595_v23 = vpop.xlane.xlu1 %2594  ;;  %6473 = vmatpush3.bf16.msra.mxu0 %v6966_v18 }
0x1138   :  { %v2598_v46 = vsub.f32 %v7988_v54, %v2596_v34  ;;  %v2597_v50 = vmul.f32 0.03125, %v2595_v23  ;;  %6474 = vmatprep.subr.bf16.mxu0 %v7304_v44  ;;  %v6967_v34 = vld [vmem:[%s8745_s5 + $0x58] sm:$0xff]   ;;  %v6968_v23 = vld [vmem:[%s8745_s5 + $0x60] sm:$0xff]  }
0x113a   :  { %v2599_v62 = vsub.f32 %v7991_v58, %v2597_v50  ;;  %v2600_v32 = vmul.f32 %v2598_v46, %v2598_v46  ;;  %v6970_v50 = vld [vmem:[%s8745_s5 + $0x70] sm:$0xff]  }
0x113b   :  { %6475 = vmatpush3.bf16.msra.mxu0 %v6967_v34 }
0x113c   :  { %v2602_v29 = vsel %vm693_vm0, %v2600_v32, 0.0  ;;  %v2601_v17 = vmul.f32 %v2599_v62, %v2599_v62  ;;  %6476 = vmatprep.subr.bf16.mxu0 %v7304_v44  ;;  %v5926_v32 = vld [vmem:[%s8748_s17 + $0x1] ss:$0 sm:$0xff] }
0x113d   :  { %2603 = vadd.xlane.f32.xlu0 %v2602_v29 }
0x113e   :  { %v2605_v41 = vsel %vm697_vm1, %v2601_v17, 0.0 }
0x113f   :  { %2606 = vadd.xlane.f32.xlu1 %v2605_v41  ;;  %6477 = vmatpush3.bf16.msra.mxu0 %v6968_v23 }
0x1140   :  { %6478 = vmatprep.subr.bf16.mxu0 %v7304_v44 }
0x11ca   :  { %v2604_v19 = vpop.xlane.xlu0 %2603 }
0x11cb   :  { %v2608_v38 = vmul.f32 0.03125, %v2604_v19 }
0x11cc   :  { %v2607_v43 = vpop.xlane.xlu1 %2606 }
0x11cd   :  { %v2610_v55 = vadd.f32 1e-06, %v2608_v38  ;;  %v2609_v16 = vmul.f32 0.03125, %v2607_v43 }
0x11cf   :  { %7054 = vrsqrt.f32 %v2610_v55  ;;  %v2611_v40 = vadd.f32 1e-06, %v2609_v16 }
0x11d1   :  { %7056 = vrsqrt.f32 %v2611_v40 }
0x11d9   :  { %v7055_v22 = vpop.eup %7054 }
0x11da   :  { %v2614_v37 = vmul.f32 %v7055_v22, %v2598_v46  ;;  %v6969_v46 = vld [vmem:[%s8745_s5 + $0x68] sm:$0xff]  }
0x11db   :  { %v7057_v5 = vpop.eup %7056  ;;  %6479 = vmatpush3.bf16.msra.mxu0 %v6969_v46 }
0x11dc   :  { %v2622_v7 = vmul.f32 %v5919_v61, %v2614_v37  ;;  %v2615_v1 = vmul.f32 %v7057_v5, %v2599_v62  ;;  %6480 = vmatprep.subr.bf16.mxu0 %v7304_v44  ;;  %v6971_v62 = vld [vmem:[%s8745_s5 + $0x78] sm:$0xff]  }
0x11de   :  { %v2623_v45 = vmul.f32 %v5919_v61, %v2615_v1  ;;  %v2630_v56 = vadd.f32 %v5920_v51, %v2622_v7  ;;  %v5955_v1 = vld [vmem:[%s8749_s15 + $0x1] ss:$0 sm:$0xff] }
0x11df   :  { %6481 = vmatpush3.bf16.msra.mxu0 %v6970_v50 }
0x11e0   :  { %v2631_v33 = vadd.f32 %v5920_v51, %v2623_v45  ;;  %6482 = vmatprep.subr.bf16.mxu0 %v7304_v44 }
0x11e2   :  { %v2637_v2 = vpack.c.bf16 %v2631_v33, %v2630_v56 }
0x11e3   :  { %6483 = vmatpush3.bf16.msra.mxu0 %v6971_v62 }
0x11e4   :  { %6465 = vmatmul.mubr.msk.bf16.vlgmr.msra.gmra.mrb[60].mxu1 %vm693_vm0, %v2637_v2  ;;  %6513 = vmatprep.subr.bf16.mxu0 %v7304_v44 }
0x11e5   :  { %6492 = vmatprep.mubr.msk.f32.mxu1 %vm7305_vm2, %v7304_v44 }
0x12b7   :  { %v2695_v29 = vpop.f32.mrb[60].mxu1 }
0x12b8   :  { %v2696_v17 = vadd.f32 %v5926_v32, %v2695_v29  ;;  %v6466_v41 = vpop.f32.mrb[61].mxu1 }
0x12b9   :  { %v2698_v0 = vpop.f32.mrb[62].mxu1 }
0x12ba   :  { %v2704_v53 = vmul.f32 0.70710677, %v2696_v17  ;;  %v2699_v14 = vadd.f32 %v5926_v32, %v2698_v0  ;;  %v6467_v49 = vpop.f32.mrb[63].mxu1  ;;  %v2702_v16 = vmul.f32 0.5, %v2696_v17 }
0x12bb   :  { %v2952_v49 = vld [vmem:[%s8752_s16] sm:$0xf] }
0x12bc   :  { %7058 = verf.f32 %v2704_v53  ;;  %v2705_v19 = vmul.f32 0.70710677, %v2699_v14  ;;  %v2703_v40 = vmul.f32 0.5, %v2699_v14  ;;  %v7306_v14 = vmov 0.0|0.0  }
0x12bd   :  { %6810 = vmatprep.subr.bf16.mxu1 %v7306_v14 }
0x12be   :  { %7060 = verf.f32 %v2705_v19  ;;  %v2954_v19 = vmul.f32 %v2952_v49, %v2952_v49 }
0x12c6   :  { %v7059_v38 = vpop.eup %7058 }
0x12c7   :  { %v2708_v43 = vadd.f32 1.0, %v7059_v38  ;;  %v2956_v38 = vsel %vm2955_vm3, %v2954_v19, 0.0 }
0x12c8   :  { %v7061_v55 = vpop.eup %7060 }
0x12c9   :  { %v2709_v22 = vadd.f32 1.0, %v7061_v55  ;;  %v2710_v61 = vmul.f32 %v2708_v43, %v2702_v16 }
0x12cb   :  { %v2711_v37 = vmul.f32 %v2709_v22, %v2703_v40 }
0x12cd   :  { %v2729_v5 = vpack.c.bf16 %v2711_v37, %v2710_v61 }
0x12cf   :  { %6485 = vmatmul.mubr.bf16.vlgmr.msra.gmra.mrb[56].mxu0 %v2729_v5  ;;  %v5956_v5 = vld [vmem:[%s8753_s18] ss:$0 sm:$0xff] }
0x12d0   :  { %6515 = vmatprep.mubr.msk.bf16.mxu0 %vm7305_vm2, %v7304_v44 }
0x13a2   :  { %v2812_v7 = vpop.f32.mrb[56].mxu0 }
0x13a3   :  { %v2819_v51 = vadd.f32 %v2812_v7, %v7988_v54  ;;  %v6486_v45 = vpop.f32.mrb[57].mxu0 }
0x13a4   :  { %v2815_v56 = vpop.f32.mrb[58].mxu0 }
0x13a5   :  { %v2820_v33 = vadd.f32 %v2815_v56, %v7991_v58  ;;  %v6487_v2 = vpop.f32.mrb[59].mxu0  ;;  %v2829_v18 = vadd.f32 %v5955_v1, %v2819_v51  ;;  %v5957_v56 = vld [vmem:[%s8754_s22] ss:$0 sm:$0xff] }
0x13a7   :  { %v2833_v34 = vsel %vm693_vm0, %v2829_v18, 0.0  ;;  %v2830_v23 = vadd.f32 %v5955_v1, %v2820_v33 }
0x13a8   :  { %2834 = vadd.xlane.f32.xlu0 %v2833_v34 }
0x13a9   :  { %v2836_v46 = vsel %vm697_vm1, %v2830_v23, 0.0 }
0x13aa   :  { %2837 = vadd.xlane.f32.xlu1 %v2836_v46  ;;  %v154_v46 = vld [vmem:[%s7465_s4] sm:$0x3] }
0x1435   :  { %v2835_v50 = vpop.xlane.xlu0 %2834 }
0x1436   :  { %v2839_v62 = vmul.f32 0.03125, %v2835_v50 }
0x1437   :  { %v2838_v32 = vpop.xlane.xlu1 %2837 }
0x1438   :  { %v2841_v29 = vsub.f32 %v2829_v18, %v2839_v62  ;;  %v2840_v17 = vmul.f32 0.03125, %v2838_v32 }
0x143a   :  { %v2842_v54 = vsub.f32 %v2830_v23, %v2840_v17  ;;  %v2843_v41 = vmul.f32 %v2841_v29, %v2841_v29 }
0x143c   :  { %v2845_v0 = vsel %vm693_vm0, %v2843_v41, 0.0  ;;  %v2844_v58 = vmul.f32 %v2842_v54, %v2842_v54 }
0x143d   :  { %2846 = vadd.xlane.f32.xlu0 %v2845_v0 }
0x143e   :  { %v2848_v53 = vsel %vm697_vm1, %v2844_v58, 0.0 }
0x143f   :  { %2849 = vadd.xlane.f32.xlu1 %v2848_v53 }
0x1441   :  { %2957 = vadd.xlane.f32.xlu0 %v2956_v38 }
0x1457   :  { %3214 = vrot.lane.b32.xlu0 %v7578_v9, %s7308_s28 }
0x14ca   :  { %v2847_v43 = vpop.xlane.xlu0 %2846 }
0x14cb   :  { %v2851_v55 = vmul.f32 0.03125, %v2847_v43 }
0x14cc   :  { %v2850_v16 = vpop.xlane.xlu1 %2849 }
0x14cd   :  { %v2853_v40 = vadd.f32 1e-06, %v2851_v55  ;;  %v2852_v22 = vmul.f32 0.03125, %v2850_v16 }
0x14ce   :  { %v2958_v50 = vpop.xlane.xlu0 %2957 }
0x14cf   :  { %7062 = vrsqrt.f32 %v2853_v40  ;;  %v2854_v61 = vadd.f32 1e-06, %v2852_v22  ;;  %v2959_v62 = vmax.f32 %v2958_v50, 1e-24  ;;  %v3071_v40 = vld [vmem:[%s8758_s26] sm:$0x3] }
0x14d0   :  { %v3078_v22 = vsel %vm2878_vm4, %v3071_v40, 0  ;;  %v8101_v40 = vld [vmem:[%s7460_s27] sm:$0xff] }
0x14d1   :  { %7064 = vrsqrt.f32 %v2854_v61 }
0x14d2   :  { %7066 = vrsqrt.f32 %v2959_v62 }
0x14d9   :  { %v7063_v37 = vpop.eup %7062 }
0x14da   :  { %v2857_v7 = vmul.f32 %v7063_v37, %v2841_v29  ;;  %v2953_v29 = vld [vmem:[%s8755_s23] sm:$0xf] }
0x14db   :  { %v7065_v1 = vpop.eup %7064  ;;  %v3012_v58 = vmul.f32 %v2953_v29, %v2953_v29 }
0x14dc   :  { %v2865_v51 = vmul.f32 %v5956_v5, %v2857_v7  ;;  %v2858_v45 = vmul.f32 %v7065_v1, %v2842_v54  ;;  %v7067_v32 = vpop.eup %7066 }
0x14dd   :  { %v2961_v17 = vmul.f32 %v7067_v32, %v2952_v49  ;;  %v3014_v53 = vpack.c.bf16 %v3012_v58, %v3012_v58 }
0x14de   :  { %v2866_v33 = vmul.f32 %v5956_v5, %v2858_v45  ;;  %v2873_v2 = vadd.f32 %v5957_v56, %v2865_v51 }
0x14df   :  { %v2962_v54 = vmul.f32 %v2961_v17, %v2953_v29  ;;  %v3019_v55 = vsel %vm693_vm0, %v3014_v53, 0 }
0x14e0   :  { %v2874_v18 = vadd.f32 %v5957_v56, %v2866_v33 }
0x14e1   :  { %v2964_v41 = vpack.c.bf16 %v2962_v54, %v2962_v54 }
0x14e2   :  { %v6811_v23 = vpack.c.bf16 %v2874_v18, %v2873_v2 }
0x14e3   :  { %v2969_v0 = vsel %vm693_vm0, %v2964_v41, 0 }
0x14e4   :  { %6813 = vmatpush3.bf16.msk.msra.mxu1 %vm8041_vm6, %v6811_v23 }
0x14e5   :  { %6495 = vmatprep.subr.bf16.mxu1 %v7304_v44 }
0x14e7   :  { %6493 = vmatmul.mubr.msk.f32.vlgmr.msra.gmra.mrb[64].mxu1 %vm989_vm14, %v154_v46 }
0x14e8   :  { %6497 = vmatprep.mubr.msk.bf16.mxu1 %vm7305_vm2, %v7304_v44 }
0x14ed   :  { %6496 = vmatpush3.bf16.xpose.msra.mxu1 %v2969_v0 }
0x14ee   :  { %6501 = vmatprep.subr.bf16.mxu1 %v7304_v44 }
0x15ba   :  { %v2948_v19 = vpop.f32.mrb[64].mxu1 }
0x15bb   :  { %v8055_v38 = vpack.c.bf16 %v2948_v19, %v2948_v19  ;;  %v6494_v43 = vpop.f32.mrb[65].mxu1  ;;  %v3011_v49 = vmul.f32 %v2948_v19, %v2948_v19 }
0x15bd   :  { %6498 = vmatmul.mubr.msk.bf16.vlgmr.msra.gmra.mrb[68].mxu1 %vm693_vm0, %v8055_v38  ;;  %v8063_v16 = vpack.c.bf16 %v3011_v49, %v3011_v49 }
0x15be   :  { %6502 = vmatpush3.bf16.xpose.msra.mxu1 %v3019_v55  ;;  %6503 = vmatprep.mubr.msk.bf16.mxu1 %vm7305_vm2, %v7304_v44 }
0x15bf   :  { %6507 = vmatprep.subr.bf16.mxu1 %v7304_v44 }
0x15c5   :  { %6504 = vmatmul.mubr.msk.bf16.vlgmr.msra.gmra.mrb[72].mxu1 %vm693_vm0, %v8063_v16 }
0x15c6   :  { %6509 = vmatprep.mubr.msk.bf16.mxu1 %vm7305_vm2, %v7304_v44  ;;  %6508 = vmatpush3.bf16.msra.mxu1 %v3078_v22 }
0x15c7   :  { %6519 = vmatprep.subr.bf16.mxu1 %v7304_v44 }
0x1690   :  { %v3005_v61 = vpop.f32.mrb[68].mxu1 }
0x1691   :  { %v6499_v37 = vpop.f32.mrb[69].mxu1 }
0x1692   :  { %v3008_v5 = vpop.f32.mrb[70].mxu1 }
0x1693   :  { %v6500_v7 = vpop.f32.mrb[71].mxu1 }
0x1698   :  { %v3055_v1 = vpop.f32.mrb[72].mxu1 }
0x1699   :  { %7068 = vrsqrt.f32 %v3055_v1  ;;  %v6505_v51 = vpop.f32.mrb[73].mxu1  ;;  %vm3063_vm7 = vcmp.eq.f32.partialorder %v3055_v1, inf  ;;  %v3066_v18 = vand.u32 2147483648, %v3055_v1  ;;  %vm3065_vm8 = vcmp.eq.f32.partialorder %v3055_v1, 0.0 }
0x169a   :  { %v3058_v45 = vpop.f32.mrb[74].mxu1 }
0x169b   :  { %v6506_v56 = vpop.f32.mrb[75].mxu1 }
0x16a3   :  { %v7069_v33 = vpop.eup %7068 }
0x16a4   :  { %v3062_v2 = vmul.f32 %v7069_v33, %v3055_v1 }
0x16a6   :  { %v3064_v23 = vsel %vm3063_vm7, %v3055_v1, %v3062_v2 }
0x16a7   :  { %v3067_v46 = vsel %vm3065_vm8, %v3066_v18, %v3064_v23 }
0x16a8   :  { %v3068_v50 = vmax.f32 %v3067_v46, 1e-12 }
0x16aa   :  { %7070 = vrcp.f32 %v3068_v50 }
0x16b4   :  { %v7071_v62 = vpop.eup %7070 }
0x16b5   :  { %v3070_v32 = vmul.f32 %v7071_v62, %v3005_v61 }
0x16b7   :  { %v3072_v29 = vpack.c.bf16 %v3070_v32, %v3070_v32 }
0x16b9   :  { %6510 = vmatmul.mubr.msk.bf16.vlgmr.msra.gmra.mrb[76].mxu1 %vm3073_vm9, %v3072_v29 }
0x16ba   :  { %6521 = vmatprep.mubr.msk.bf16.mxu1 %vm7305_vm2, %v7304_v44 }
0x178c   :  { %v3114_v17 = vpop.f32.mrb[76].mxu1 }
0x178d   :  { %v3121_v54 = vrot.slane %v3114_v17, 6  ;;  %v6511_v41 = vpop.f32.mrb[77].mxu1 }
0x178e   :  { %v3117_v0 = vpop.f32.mrb[78].mxu1 }
0x178f   :  { %3122 = vrot.lane.b32.xlu1 %v3121_v54, %s7309_s1  ;;  %v6512_v58 = vpop.f32.mrb[79].mxu1  ;;  %v8116_v54 = vpop.permute.xlu0 %3214 }
0x1793   :  { %3401 = vrot.lane.b32.xlu1 %v7581_v10, %s7308_s28 }
0x1801   :  { %v3123_v53 = vpop.permute.xlu1 %3122 }
0x1802   :  { %v8081_v19 = vsel %vm2878_vm4, %v3114_v17, %v3123_v53 }
0x1803   :  { %v3126_v43 = vpack.c.bf16 %v8081_v19, %v8081_v19  ;;  %v3217_v0 = vmul.f32 %v8116_v54, %v8081_v19 }
0x1805   :  { %v8086_v55 = vsel %vm693_vm0, %v3126_v43, 0  ;;  %v8114_v17 = vpop.permute.xlu1 %3401  ;;  %v3219_v53 = vpack.c.bf16 %v3217_v0, %v3217_v0 }
0x1806   :  { %6514 = vmatpush3.bf16.xpose.msra.mxu0 %v8086_v55  ;;  %v3404_v41 = vmul.f32 %v8114_v17, %v8081_v19 }
0x1807   :  { %6531 = vmatprep.subr.bf16.mxu0 %v7304_v44 }
0x1808   :  { %v3406_v58 = vpack.c.bf16 %v3404_v41, %v3404_v41 }
0x180d   :  { %6516 = vmatmul.mubr.msk.bf16.vlgmr.msra.gmra.mrb[60].mxu0 %vm693_vm0, %v7597_v24  ;;  %v8104_v24 = vld [vmem:[%s7460_s27 + $0x8] sm:$0x3] }
0x180e   :  { %6532 = vmatpush3.bf16.xpose.msra.mxu0 %v8086_v55  ;;  %6533 = vmatprep.mubr.msk.bf16.mxu0 %vm7305_vm2, %v7304_v44 }
0x180f   :  { %6537 = vmatprep.subr.bf16.mxu0 %v7304_v44 }
0x1815   :  { %6534 = vmatmul.mubr.msk.bf16.vlgmr.msra.gmra.mrb[64].mxu0 %vm693_vm0, %v7599_v25 }
0x1816   :  { %6539 = vmatprep.mubr.msk.bf16.mxu0 %vm7305_vm2, %v7304_v44 }
0x18e0   :  { %v3164_v49 = vpop.f32.mrb[60].mxu0 }
0x18e1   :  { %v3171_v22 = vmul.f32 0.35355338, %v3164_v49  ;;  %v6517_v61 = vpop.f32.mrb[61].mxu0 }
0x18e2   :  { %v3167_v37 = vpop.f32.mrb[62].mxu0 }
0x18e3   :  { %v3172_v5 = vmul.f32 0.35355338, %v3167_v37  ;;  %v6518_v7 = vpop.f32.mrb[63].mxu0  ;;  %v3173_v1 = vadd.f32 %v3171_v22, %v8101_v40 }
0x18e5   :  { %v3175_v51 = vsel %vm3073_vm9, %v3173_v1, -inf  ;;  %v3174_v25 = vadd.f32 %v3172_v5, %v8104_v24 }
0x18e6   :  { %3176 = vmax.xlane.f32.xlu1 %v3175_v51 }
0x18e7   :  { %v3179_v45 = vsel %vm3178_vm10, %v3174_v25, -inf }
0x18e8   :  { %3180 = vmax.xlane.f32.xlu0 %v3179_v45  ;;  %v3352_v56 = vpop.f32.mrb[64].mxu0 }
0x18e9   :  { %v3359_v33 = vmul.f32 0.35355338, %v3352_v56  ;;  %v6535_v2 = vpop.f32.mrb[65].mxu0 }
0x18ea   :  { %v3355_v18 = vpop.f32.mrb[66].mxu0 }
0x18eb   :  { %v3360_v23 = vmul.f32 0.35355338, %v3355_v18  ;;  %v6536_v46 = vpop.f32.mrb[67].mxu0  ;;  %v3361_v50 = vadd.f32 %v3359_v33, %v8101_v40 }
0x18ed   :  { %v3363_v62 = vsel %vm3073_vm9, %v3361_v50, -inf  ;;  %v3362_v32 = vadd.f32 %v3360_v23, %v8104_v24 }
0x18ee   :  { %3364 = vmax.xlane.f32.xlu0 %v3363_v62 }
0x18ef   :  { %v3366_v29 = vsel %vm3178_vm10, %v3362_v32, -inf }
0x18f0   :  { %3367 = vmax.xlane.f32.xlu1 %v3366_v29 }
0x1901   :  { %3408 = vrot.lane.b32.xlu1 %v3406_v58, %s7308_s28 }
0x1904   :  { %3221 = vrot.lane.b32.xlu0 %v3219_v53, %s7308_s28 }
0x1905   :  { %3588 = vrot.lane.b32.xlu1 %v7584_v11, %s7308_s28 }
0x1909   :  { %3775 = vrot.lane.b32.xlu1 %v7587_v12, %s7308_s28 }
0x1973   :  { %v3177_v43 = vpop.xlane.xlu1 %3176 }
0x1974   :  { %v3182_v49 = vmax.f32 %v7662_v13, %v3177_v43 }
0x1975   :  { %v3181_v22 = vpop.xlane.xlu0 %3180 }
0x1976   :  { %v3190_v61 = vsub.f32 %v3173_v1, %v3182_v49  ;;  %v3183_v37 = vmax.f32 %v7666_v15, %v3181_v22  ;;  %v3184_v1 = vsub.f32 %v7653_v3, %v3182_v49 }
0x1978   :  { %v3192_v5 = vmul.f32 1.442695, %v3190_v61  ;;  %v3191_v7 = vsub.f32 %v3174_v25, %v3183_v37  ;;  %v3185_v23 = vsub.f32 %v7656_v6, %v3183_v37  ;;  %v3186_v6 = vmul.f32 1.442695, %v3184_v1 }
0x197a   :  { %v3194_v51 = vmul.f32 1.442695, %v3191_v7  ;;  %7072 = vpow2.f32 %v3192_v5 }
0x197b   :  { %v3365_v45 = vpop.xlane.xlu0 %3364 }
0x197c   :  { %v3369_v56 = vmax.f32 %v7727_v21, %v3365_v45  ;;  %7074 = vpow2.f32 %v3194_v51  ;;  %v3188_v21 = vmul.f32 1.442695, %v3185_v23 }
0x197d   :  { %v3368_v33 = vpop.xlane.xlu1 %3367 }
0x197e   :  { %v3377_v2 = vsub.f32 %v3361_v50, %v3369_v56  ;;  %v3370_v18 = vmax.f32 %v7731_v31, %v3368_v33  ;;  %v3371_v0 = vsub.f32 %v7696_v36, %v3369_v56 }
0x197f   :  { %v3222_v46 = vpop.permute.xlu0 %3221 }
0x1980   :  { %v3379_v13 = vmul.f32 1.442695, %v3377_v2  ;;  %v3378_v62 = vsub.f32 %v3362_v32, %v3370_v18  ;;  %v3227_v15 = vsel %vm2878_vm4, %v3222_v46, 0  ;;  %v3372_v3 = vsub.f32 %v7699_v39, %v3370_v18 }
0x1981   :  { %v3409_v25 = vpop.permute.xlu1 %3408  ;;  %6520 = vmatpush3.bf16.msra.mxu1 %v3227_v15  ;;  %v3373_v53 = vmul.f32 1.442695, %v3371_v0 }
0x1982   :  { %v3381_v29 = vmul.f32 1.442695, %v3378_v62  ;;  %v3414_v41 = vsel %vm2878_vm4, %v3409_v25, 0  ;;  %6525 = vmatprep.subr.bf16.mxu1 %v7304_v44  ;;  %7076 = vpow2.f32 %v3379_v13  ;;  %v3375_v58 = vmul.f32 1.442695, %v3372_v3 }
0x1983   :  { %6538 = vmatpush3.bf16.msra.mxu0 %v3414_v41 }
0x1984   :  { %6543 = vmatprep.subr.bf16.mxu0 %v7304_v44  ;;  %7078 = vpow2.f32 %v3381_v29  ;;  %v8138_v31 = vpop.eup %7072 }
0x1985   :  { %7080 = vpow2.f32 %v3188_v21 }
0x1986   :  { %v8140_v50 = vpop.eup %7074  ;;  %7082 = vpow2.f32 %v3186_v6  ;;  %v8195_v6 = vpop.permute.xlu1 %3588 }
0x1987   :  { %v3218_v32 = vpack.c.bf16 %v8140_v50, %v8138_v31  ;;  %7084 = vpow2.f32 %v3375_v58 }
0x1988   :  { %7086 = vpow2.f32 %v3373_v53 }
0x1989   :  { %6522 = vmatmul.mubr.msk.bf16.vlgmr.msra.gmra.mrb[80].mxu1 %vm3073_vm9, %v3218_v32 }
0x198a   :  { %6526 = vmatpush3.bf16.msra.mxu1 %v7637_v59  ;;  %6527 = vmatprep.mubr.msk.bf16.mxu1 %vm7305_vm2, %v7304_v44 }
0x198b   :  { %6549 = vmatprep.subr.bf16.mxu1 %v7304_v44 }
0x198c   :  { %v8151_v43 = vpop.eup %7076 }
0x198e   :  { %v8153_v39 = vpop.eup %7078 }
0x198f   :  { %v3405_v49 = vpack.c.bf16 %v8153_v39, %v8151_v43  ;;  %v8157_v36 = vpop.eup %7080 }
0x1990   :  { %v7083_v59 = vpop.eup %7082 }
0x1991   :  { %6540 = vmatmul.mubr.msk.bf16.vlgmr.msra.gmra.mrb[68].mxu0 %vm3073_vm9, %v3405_v49  ;;  %v3212_v22 = vpack.c.bf16 %v8157_v36, %v7083_v59  ;;  %v7085_v61 = vpop.eup %7084 }
0x1992   :  { %6544 = vmatpush3.bf16.msra.mxu0 %v7640_v60  ;;  %6545 = vmatprep.mubr.msk.bf16.mxu0 %vm7305_vm2, %v7304_v44  ;;  %v7087_v37 = vpop.eup %7086 }
0x1993   :  { %6567 = vmatprep.subr.bf16.mxu0 %v7304_v44  ;;  %v3399_v5 = vpack.c.bf16 %v7085_v61, %v7087_v37 }
0x1995   :  { %6528 = vmatmul.mubr.msk.bf16.vlgmr.msra.gmra.mrb[80].mxu1 %vm989_vm14, %v3212_v22  ;;  %v8200_v22 = vpop.permute.xlu1 %3775 }
0x1996   :  { %6550 = vmatpush3.bf16.xpose.msra.mxu1 %v8086_v55  ;;  %6551 = vmatprep.mubr.msk.bf16.mxu1 %vm7305_vm2, %v7304_v44 }
0x1997   :  { %6555 = vmatprep.subr.bf16.mxu1 %v7304_v44 }
0x199d   :  { %6546 = vmatmul.mubr.msk.bf16.vlgmr.msra.gmra.mrb[68].mxu0 %vm989_vm14, %v3399_v5  ;;  %6552 = vmatmul.mubr.msk.bf16.vlgmr.msra.gmra.mrb[84].mxu1 %vm693_vm0, %v7601_v26 }
0x199e   :  { %6568 = vmatpush3.bf16.xpose.msra.mxu0 %v8086_v55  ;;  %6569 = vmatprep.mubr.msk.bf16.mxu0 %vm7305_vm2, %v7304_v44 }
0x199f   :  { %6573 = vmatprep.subr.bf16.mxu0 %v7304_v44  ;;  %6557 = vmatprep.mubr.msk.bf16.mxu1 %vm7305_vm2, %v7304_v44 }
0x19a5   :  { %6570 = vmatmul.mubr.msk.bf16.vlgmr.msra.gmra.mrb[72].mxu0 %vm693_vm0, %v7603_v27 }
0x19a6   :  { %6575 = vmatprep.mubr.msk.bf16.mxu0 %vm7305_vm2, %v7304_v44 }
0x1a68   :  { %v8183_v60 = vpop.f32.mrb[80].mxu1 }
0x1a69   :  { %v6529_v7 = vpop.f32.mrb[81].mxu1 }
0x1a6a   :  { %v8185_v26 = vpop.f32.mrb[82].mxu1  ;;  %v3778_v7 = vmul.f32 %v8200_v22, %v8081_v19 }
0x1a6b   :  { %v6530_v55 = vpop.f32.mrb[83].mxu1 }
0x1a6c   :  { %v3780_v55 = vpack.c.bf16 %v3778_v7, %v3778_v7 }
0x1a70   :  { %v8187_v51 = vpop.f32.mrb[68].mxu0  ;;  %v3539_v45 = vpop.f32.mrb[84].mxu1 }
0x1a71   :  { %v3546_v56 = vmul.f32 0.35355338, %v3539_v45  ;;  %v6547_v33 = vpop.f32.mrb[69].mxu0  ;;  %v6553_v2 = vpop.f32.mrb[85].mxu1  ;;  %v3591_v45 = vmul.f32 %v8195_v6, %v8081_v19  ;;  %v3392_v19 = vsel %vm3178_vm10, %v8153_v39, 0.0 }
0x1a72   :  { %v8189_v18 = vpop.f32.mrb[70].mxu0  ;;  %v3542_v23 = vpop.f32.mrb[86].mxu1  ;;  %v3386_v33 = vsel %vm993_vm15, %v7085_v61, 0.0  ;;  %v3199_v2 = vsel %vm993_vm15, %v8157_v36, 0.0 }
0x1a73   :  { %v3547_v46 = vmul.f32 0.35355338, %v3542_v23  ;;  %v6548_v27 = vpop.f32.mrb[71].mxu0  ;;  %v6554_v13 = vpop.f32.mrb[87].mxu1  ;;  %v3548_v62 = vadd.f32 %v3546_v56, %v8101_v40  ;;  %v3205_v56 = vsel %vm3178_vm10, %v8140_v50, 0.0  ;;  %v3202_v23 = vsel %vm3073_vm9, %v8138_v31, 0.0 }
0x1a74   :  { %v3389_v50 = vsel %vm3073_vm9, %v8151_v43, 0.0 }
0x1a75   :  { %v3550_v1 = vsel %vm3073_vm9, %v3548_v62, -inf  ;;  %v3549_v15 = vadd.f32 %v3547_v46, %v8104_v24 }
0x1a76   :  { %3551 = vmax.xlane.f32.xlu0 %v3550_v1 }
0x1a77   :  { %v3553_v25 = vsel %vm3178_vm10, %v3549_v15, -inf }
0x1a78   :  { %v3726_v29 = vpop.f32.mrb[72].mxu0  ;;  %3554 = vmax.xlane.f32.xlu1 %v3553_v25 }
0x1a79   :  { %v3733_v41 = vmul.f32 0.35355338, %v3726_v29  ;;  %v6571_v21 = vpop.f32.mrb[73].mxu0 }
0x1a7a   :  { %v3729_v3 = vpop.f32.mrb[74].mxu0 }
0x1a7b   :  { %v3734_v32 = vmul.f32 0.35355338, %v3729_v3  ;;  %v6572_v0 = vpop.f32.mrb[75].mxu0  ;;  %v3735_v58 = vadd.f32 %v3733_v41, %v8101_v40  ;;  %v3593_v40 = vpack.c.bf16 %v3591_v45, %v3591_v45 }
0x1a7d   :  { %v3737_v53 = vsel %vm3073_vm9, %v3735_v58, -inf  ;;  %v3736_v49 = vadd.f32 %v3734_v32, %v8104_v24  ;;  %v3196_v24 = vsel %vm989_vm14, %v7083_v59, 0.0  ;;  %v3383_v59 = vsel %vm989_vm14, %v7087_v37, 0.0 }
0x1a7e   :  { %3738 = vmax.xlane.f32.xlu0 %v3737_v53 }
0x1a7f   :  { %v3740_v5 = vsel %vm3178_vm10, %v3736_v49, -inf }
0x1a82   :  { %3741 = vmax.xlane.f32.xlu0 %v3740_v5 }
0x1a89   :  { %3782 = vrot.lane.b32.xlu1 %v3780_v55, %s7308_s28 }
0x1a98   :  { %3595 = vrot.lane.b32.xlu0 %v3593_v40, %s7308_s28 }
0x1aad   :  { %3197 = vadd.xlane.f32.xlu1 %v3196_v24 }
0x1ab1   :  { %3206 = vadd.xlane.f32.xlu1 %v3205_v56 }
0x1ab5   :  { %3387 = vadd.xlane.f32.xlu1 %v3386_v33 }
0x1ab7   :  { %3200 = vadd.xlane.f32.xlu0 %v3199_v2 }
0x1ab9   :  { %3393 = vadd.xlane.f32.xlu1 %v3392_v19 }
0x1abb   :  { %3203 = vadd.xlane.f32.xlu0 %v3202_v23 }
0x1abf   :  { %3384 = vadd.xlane.f32.xlu0 %v3383_v59 }
0x1ac3   :  { %3390 = vadd.xlane.f32.xlu0 %v3389_v50 }
0x1b03   :  { %v3552_v61 = vpop.xlane.xlu0 %3551 }
0x1b04   :  { %v3556_v46 = vmax.f32 %v7735_v35, %v3552_v61 }
0x1b05   :  { %v3555_v36 = vpop.xlane.xlu1 %3554 }
0x1b06   :  { %v3558_v27 = vsub.f32 %v7706_v47, %v3556_v46  ;;  %v3564_v13 = vsub.f32 %v3548_v62, %v3556_v46  ;;  %v3557_v39 = vmax.f32 %v7739_v20, %v3555_v36 }
0x1b08   :  { %v3560_v1 = vmul.f32 1.442695, %v3558_v27  ;;  %v3566_v25 = vmul.f32 1.442695, %v3564_v13  ;;  %v3559_v31 = vsub.f32 %v7709_v52, %v3557_v39  ;;  %v3565_v29 = vsub.f32 %v3549_v15, %v3557_v39  ;;  %v7198_v27 = vld [vmem:[%s7380_s30] sm:$0xff]  }
0x1b09   :  { %v3783_v37 = vpop.permute.xlu1 %3782  ;;  %v7200_v39 = vld [vmem:[%s8745_s5] sm:$0xff]  }
0x1b0a   :  { %7088 = vpow2.f32 %v3560_v1  ;;  %v3562_v41 = vmul.f32 1.442695, %v3559_v31  ;;  %v3568_v21 = vmul.f32 1.442695, %v3565_v29  ;;  %v3788_v43 = vsel %vm2878_vm4, %v3783_v37, 0  ;;  %v7201_v1 = vld [vmem:[%s8745_s5 + $0x8] sm:$0xff]  }
0x1b0b   :  { %7090 = vpow2.f32 %v3566_v25  ;;  %v3739_v3 = vpop.xlane.xlu0 %3738  ;;  %6574 = vmatpush3.bf16.msra.mxu0 %v3788_v43  ;;  %v7202_v25 = vld [vmem:[%s8745_s5 + $0x10] sm:$0xff]   ;;  %v7203_v29 = vld [vmem:[%s8745_s5 + $0x18] sm:$0xff]  }
0x1b0c   :  { %7092 = vpow2.f32 %v3562_v41  ;;  %v3743_v47 = vmax.f32 %v7743_v42, %v3739_v3  ;;  %6579 = vmatprep.subr.bf16.mxu0 %v7304_v44  ;;  %v7204_v41 = vld [vmem:[%s8745_s5 + $0x20] sm:$0xff]  }
0x1b0d   :  { %7094 = vpow2.f32 %v3568_v21 }
0x1b0e   :  { %v3745_v35 = vsub.f32 %v7716_v4, %v3743_v47  ;;  %v3751_v20 = vsub.f32 %v3735_v58, %v3743_v47  ;;  %v7205_v47 = vld [vmem:[%s8745_s5 + $0x28] sm:$0xff]  }
0x1b0f   :  { %v3742_v52 = vpop.xlane.xlu0 %3741 }
0x1b10   :  { %v3747_v62 = vmul.f32 1.442695, %v3745_v35  ;;  %v3753_v15 = vmul.f32 1.442695, %v3751_v20  ;;  %v3744_v32 = vmax.f32 %v7748_v48, %v3742_v52 }
0x1b12   :  { %7096 = vpow2.f32 %v3747_v62  ;;  %v3746_v0 = vsub.f32 %v7719_v8, %v3744_v32  ;;  %v3752_v53 = vsub.f32 %v3736_v49, %v3744_v32  ;;  %v7206_v62 = vld [vmem:[%s8745_s5 + $0x30] sm:$0xff]  }
0x1b13   :  { %v3596_v5 = vpop.permute.xlu0 %3595  ;;  %7098 = vpow2.f32 %v3753_v15 }
0x1b14   :  { %v7089_v7 = vpop.eup %7088  ;;  %v3749_v55 = vmul.f32 1.442695, %v3746_v0  ;;  %v3755_v42 = vmul.f32 1.442695, %v3752_v53  ;;  %v3601_v45 = vsel %vm2878_vm4, %v3596_v5, 0  ;;  %v7207_v0 = vld [vmem:[%s8745_s5 + $0x38] sm:$0xff]  }
0x1b15   :  { %v7091_v40 = vpop.eup %7090  ;;  %6556 = vmatpush3.bf16.msra.mxu1 %v3601_v45  ;;  %v3570_v4 = vsel %vm989_vm14, %v7089_v7, 0.0 }
0x1b16   :  { %v7093_v58 = vpop.eup %7092  ;;  %7100 = vpow2.f32 %v3749_v55  ;;  %3571 = vadd.xlane.f32.xlu0 %v3570_v4  ;;  %6561 = vmatprep.subr.bf16.mxu1 %v7304_v44  ;;  %v3576_v24 = vsel %vm3073_vm9, %v7091_v40, 0.0 }
0x1b17   :  { %v7095_v48 = vpop.eup %7094  ;;  %7102 = vpow2.f32 %v3755_v42  ;;  %v3573_v8 = vsel %vm993_vm15, %v7093_v58, 0.0  ;;  %v3586_v46 = vpack.c.bf16 %v7093_v58, %v7089_v7 }
0x1b18   :  { %3574 = vadd.xlane.f32.xlu1 %v3573_v8  ;;  %v3592_v49 = vpack.c.bf16 %v7095_v48, %v7091_v40  ;;  %v3579_v56 = vsel %vm3178_vm10, %v7095_v48, 0.0 }
0x1b1a   :  { %6558 = vmatmul.mubr.msk.bf16.vlgmr.msra.gmra.mrb[88].mxu1 %vm3073_vm9, %v3592_v49  ;;  %3577 = vadd.xlane.f32.xlu0 %v3576_v24 }
0x1b1b   :  { %6562 = vmatpush3.bf16.msra.mxu1 %v7758_v63  ;;  %6563 = vmatprep.mubr.msk.bf16.mxu1 %vm7305_vm2, %v7304_v44 }
0x1b1c   :  { %v7097_v33 = vpop.eup %7096  ;;  %3580 = vadd.xlane.f32.xlu1 %v3579_v56  ;;  %6585 = vmatprep.subr.bf16.mxu1 %v7304_v44 }
0x1b1d   :  { %v3757_v2 = vsel %vm989_vm14, %v7097_v33, 0.0  ;;  %v7099_v19 = vpop.eup %7098 }
0x1b1e   :  { %3758 = vadd.xlane.f32.xlu0 %v3757_v2  ;;  %v3763_v50 = vsel %vm3073_vm9, %v7099_v19, 0.0 }
0x1b20   :  { %v7101_v23 = vpop.eup %7100 }
0x1b21   :  { %v7103_v59 = vpop.eup %7102  ;;  %v3760_v63 = vsel %vm993_vm15, %v7101_v23, 0.0  ;;  %v3773_v13 = vpack.c.bf16 %v7101_v23, %v7097_v33 }
0x1b22   :  { %3764 = vadd.xlane.f32.xlu0 %v3763_v50  ;;  %3761 = vadd.xlane.f32.xlu1 %v3760_v63  ;;  %v3779_v61 = vpack.c.bf16 %v7103_v59, %v7099_v19  ;;  %v3766_v36 = vsel %vm3178_vm10, %v7103_v59, 0.0 }
0x1b24   :  { %6576 = vmatmul.mubr.msk.bf16.vlgmr.msra.gmra.mrb[76].mxu0 %vm3073_vm9, %v3779_v61 }
0x1b25   :  { %6580 = vmatpush3.bf16.msra.mxu0 %v7771_v57  ;;  %6581 = vmatprep.mubr.msk.bf16.mxu0 %vm7305_vm2, %v7304_v44  ;;  %v7199_v57 = vld [vmem:[%s7380_s30 + $0x8] sm:$0xff]  }
0x1b26   :  { %6564 = vmatmul.mubr.msk.bf16.vlgmr.msra.gmra.mrb[88].mxu1 %vm989_vm14, %v3586_v46  ;;  %3767 = vadd.xlane.f32.xlu1 %v3766_v36 }
0x1b27   :  { %6586 = vmatpush3.bf16.msra.mxu1 %v7198_v27  ;;  %6589 = vmatprep.mubr.msk.bf16.mxu1 %vm7305_vm2, %v7304_v44 }
0x1b28   :  { %6587 = vmatprep.subr.bf16.mxu1 %v7304_v44  ;;  %6601 = vmatprep.subr.bf16.mxu0 %v7304_v44 }
0x1b2b   :  { %6588 = vmatpush3.bf16.msra.mxu1 %v7199_v57 }
0x1b2c   :  { %6593 = vmatprep.subr.bf16.mxu1 %v7304_v44 }
0x1b30   :  { %6582 = vmatmul.mubr.msk.bf16.vlgmr.msra.gmra.mrb[76].mxu0 %vm989_vm14, %v3773_v13 }
0x1b31   :  { %6602 = vmatpush3.bf16.msra.mxu0 %v7200_v39  ;;  %6617 = vmatprep.mubr.msk.bf16.mxu0 %vm7305_vm2, %v7304_v44 }
0x1b32   :  { %6603 = vmatprep.subr.bf16.mxu0 %v7304_v44 }
0x1b35   :  { %6604 = vmatpush3.bf16.msra.mxu0 %v7201_v1 }
0x1b36   :  { %6605 = vmatprep.subr.bf16.mxu0 %v7304_v44 }
0x1b39   :  { %6606 = vmatpush3.bf16.msra.mxu0 %v7202_v25 }
0x1b3a   :  { %v3198_v31 = vpop.xlane.xlu1 %3197  ;;  %6607 = vmatprep.subr.bf16.mxu0 %v7304_v44 }
0x1b3d   :  { %6608 = vmatpush3.bf16.msra.mxu0 %v7203_v29 }
0x1b3e   :  { %v3207_v37 = vpop.xlane.xlu1 %3206  ;;  %6609 = vmatprep.subr.bf16.mxu0 %v7304_v44 }
0x1b41   :  { %6610 = vmatpush3.bf16.msra.mxu0 %v7204_v41 }
0x1b42   :  { %v3388_v21 = vpop.xlane.xlu1 %3387  ;;  %6611 = vmatprep.subr.bf16.mxu0 %v7304_v44 }
0x1b44   :  { %v3201_v43 = vpop.xlane.xlu0 %3200 }
0x1b45   :  { %v3209_v3 = vadd.f32 %v3207_v37, %v3201_v43  ;;  %6612 = vmatpush3.bf16.msra.mxu0 %v7205_v47 }
0x1b46   :  { %v3394_v35 = vpop.xlane.xlu1 %3393  ;;  %6613 = vmatprep.subr.bf16.mxu0 %v7304_v44 }
0x1b47   :  { %7104 = vrcp.f32 %v3209_v3  ;;  %v3396_v20 = vadd.f32 %v3394_v35, %v3388_v21 }
0x1b48   :  { %v3204_v52 = vpop.xlane.xlu0 %3203 }
0x1b49   :  { %7106 = vrcp.f32 %v3396_v20  ;;  %6614 = vmatpush3.bf16.msra.mxu0 %v7206_v62  ;;  %v3208_v32 = vadd.f32 %v3204_v52, %v3198_v31  ;;  %v7208_v62 = vld [vmem:[%s8744_s0] sm:$0xff]  }
0x1b4a   :  { %6615 = vmatprep.subr.bf16.mxu0 %v7304_v44 }
0x1b4b   :  { %7108 = vrcp.f32 %v3208_v32 }
0x1b4c   :  { %v3385_v15 = vpop.xlane.xlu0 %3384 }
0x1b4d   :  { %6616 = vmatpush3.bf16.msra.mxu0 %v7207_v0 }
0x1b4e   :  { %6647 = vmatprep.subr.bf16.mxu0 %v7304_v44 }
0x1b50   :  { %v3391_v53 = vpop.xlane.xlu0 %3390 }
0x1b51   :  { %v7105_v5 = vpop.eup %7104  ;;  %v3395_v7 = vadd.f32 %v3391_v53, %v3385_v15  ;;  %v7209_v15 = vld [vmem:[%s8744_s0 + $0x8] sm:$0xff]  }
0x1b52   :  { %v3315_v42 = vmul.f32 %v7105_v5, %v8185_v26 }
0x1b53   :  { %v7107_v55 = vpop.eup %7106  ;;  %7110 = vrcp.f32 %v3395_v7  ;;  %v7210_v7 = vld [vmem:[%s7385_s6] ss:$0 sm:$0xff] }
0x1b54   :  { %v3502_v45 = vmul.f32 %v7107_v55, %v8189_v18 }
0x1b55   :  { %v7109_v4 = vpop.eup %7108 }
0x1b56   :  { %v3504_v40 = vadd.f32 %v3502_v45, %v3315_v42  ;;  %v3314_v48 = vmul.f32 %v7109_v4, %v8183_v60 }
0x1b5d   :  { %v7111_v58 = vpop.eup %7110 }
0x1b5e   :  { %v3501_v8 = vmul.f32 %v7111_v58, %v8187_v51 }
0x1b60   :  { %v3503_v49 = vadd.f32 %v3501_v8, %v3314_v48 }
0x1ba3   :  { %v3572_v24 = vpop.xlane.xlu0 %3571 }
0x1ba5   :  { %v3575_v56 = vpop.xlane.xlu1 %3574 }
0x1ba7   :  { %v3578_v33 = vpop.xlane.xlu0 %3577 }
0x1ba8   :  { %v3582_v19 = vadd.f32 %v3578_v33, %v3572_v24 }
0x1ba9   :  { %v3581_v2 = vpop.xlane.xlu1 %3580 }
0x1baa   :  { %v3583_v59 = vadd.f32 %v3581_v2, %v3575_v56  ;;  %7112 = vrcp.f32 %v3582_v19 }
0x1bab   :  { %v3759_v23 = vpop.xlane.xlu0 %3758 }
0x1bac   :  { %7114 = vrcp.f32 %v3583_v59 }
0x1baf   :  { %v3762_v50 = vpop.xlane.xlu1 %3761  ;;  %v3765_v26 = vpop.xlane.xlu0 %3764 }
0x1bb0   :  { %v3769_v63 = vadd.f32 %v3765_v26, %v3759_v23 }
0x1bb2   :  { %7116 = vrcp.f32 %v3769_v63 }
0x1bb3   :  { %v3768_v18 = vpop.xlane.xlu1 %3767 }
0x1bb4   :  { %v3770_v61 = vadd.f32 %v3768_v18, %v3762_v50  ;;  %v7113_v46 = vpop.eup %7112 }
0x1bb6   :  { %v7115_v27 = vpop.eup %7114  ;;  %7118 = vrcp.f32 %v3770_v61 }
0x1bbc   :  { %v7117_v31 = vpop.eup %7116 }
0x1bc0   :  { %v7119_v21 = vpop.eup %7118 }
0x1bf9   :  { %v3681_v60 = vpop.f32.mrb[88].mxu1 }
0x1bfa   :  { %v3688_v36 = vmul.f32 %v7113_v46, %v3681_v60  ;;  %v6565_v51 = vpop.f32.mrb[89].mxu1 }
0x1bfb   :  { %v3684_v57 = vpop.f32.mrb[90].mxu1 }
0x1bfc   :  { %v3690_v13 = vadd.f32 %v3688_v36, %v3503_v49  ;;  %v3689_v39 = vmul.f32 %v7115_v27, %v3684_v57  ;;  %v6566_v1 = vpop.f32.mrb[91].mxu1  ;;  %v5977_v49 = vld [vmem:[%s8752_s16 + $0x4] sm:$0xf] }
0x1bfd   :  { %v4063_v2 = vmul.f32 %v5977_v49, %v5977_v49  ;;  %v7211_v1 = vld [vmem:[%s8746_s9] ss:$0 sm:$0xff] }
0x1bfe   :  { %v3691_v25 = vadd.f32 %v3689_v39, %v3504_v40 }
0x1bff   :  { %v4064_v50 = vsel %vm2955_vm3, %v4063_v2, 0.0 }
0x1c03   :  { %v3868_v29 = vpop.f32.mrb[76].mxu0 }
0x1c04   :  { %v3875_v37 = vmul.f32 %v7117_v31, %v3868_v29  ;;  %v6583_v41 = vpop.f32.mrb[77].mxu0  ;;  %v5978_v29 = vld [vmem:[%s8755_s23 + $0x4] sm:$0xf] }
0x1c05   :  { %v3871_v43 = vpop.f32.mrb[78].mxu0 }
0x1c06   :  { %v3877_v3 = vadd.f32 %v3875_v37, %v3690_v13  ;;  %v3876_v47 = vmul.f32 %v7119_v21, %v3871_v43  ;;  %v6584_v35 = vpop.f32.mrb[79].mxu0  ;;  %v7212_v43 = vld [vmem:[%s8747_s13] ss:$0 sm:$0xff] }
0x1c08   :  { %v3878_v20 = vadd.f32 %v3876_v47, %v3691_v25 }
0x1c0a   :  { %v3879_v52 = vpack.c.bf16 %v3878_v20, %v3877_v3 }
0x1c0c   :  { %6590 = vmatmul.mubr.msk.bf16.vlgmr.msra.gmra.mrb[92].mxu1 %vm693_vm0, %v3879_v52  ;;  %v4115_v52 = vmul.f32 %v5978_v29, %v5978_v29 }
0x1c0d   :  { %6594 = vmatpush3.bf16.msra.mxu1 %v7208_v62  ;;  %6597 = vmatprep.mubr.msk.bf16.mxu1 %vm7305_vm2, %v7304_v44 }
0x1c0e   :  { %6595 = vmatprep.subr.bf16.mxu1 %v7304_v44 }
0x1c11   :  { %6596 = vmatpush3.bf16.msra.mxu1 %v7209_v15  ;;  %v4116_v15 = vpack.c.bf16 %v4115_v52, %v4115_v52 }
0x1c12   :  { %6621 = vmatprep.subr.bf16.mxu1 %v7304_v44 }
0x1cdf   :  { %v3917_v32 = vpop.f32.mrb[92].mxu1 }
0x1ce0   :  { %v3924_v0 = vadd.f32 %v3917_v32, %v7535_v28  ;;  %v6591_v53 = vpop.f32.mrb[93].mxu1  ;;  %v4118_v32 = vsel %vm693_vm0, %v4116_v15, 0 }
0x1ce1   :  { %v3920_v5 = vpop.f32.mrb[94].mxu1 }
0x1ce2   :  { %v8291_v55 = vadd.f32 %v7210_v7, %v3924_v0  ;;  %v3925_v42 = vadd.f32 %v3920_v5, %v7537_v30  ;;  %v6592_v45 = vpop.f32.mrb[95].mxu1  ;;  %v5981_v0 = vld [vmem:[%s8758_s26 + $0x2] sm:$0x3] }
0x1ce3   :  { %v4177_v53 = vsel %vm2878_vm4, %v5981_v0, 0 }
0x1ce4   :  { %v8294_v40 = vadd.f32 %v7210_v7, %v3925_v42  ;;  %v3928_v4 = vsel %vm693_vm0, %v8291_v55, 0.0 }
0x1ce5   :  { %3929 = vadd.xlane.f32.xlu0 %v3928_v4 }
0x1ce6   :  { %v3931_v58 = vsel %vm697_vm1, %v8294_v40, 0.0 }
0x1ce7   :  { %3932 = vadd.xlane.f32.xlu1 %v3931_v58 }
0x1d72   :  { %v3930_v48 = vpop.xlane.xlu0 %3929 }
0x1d73   :  { %v3934_v28 = vmul.f32 0.03125, %v3930_v48 }
0x1d74   :  { %v3933_v8 = vpop.xlane.xlu1 %3932 }
0x1d75   :  { %v3936_v24 = vsub.f32 %v8291_v55, %v3934_v28  ;;  %v3935_v56 = vmul.f32 0.03125, %v3933_v8 }
0x1d77   :  { %v3937_v30 = vsub.f32 %v8294_v40, %v3935_v56  ;;  %v3938_v33 = vmul.f32 %v3936_v24, %v3936_v24 }
0x1d79   :  { %v3940_v19 = vsel %vm693_vm0, %v3938_v33, 0.0  ;;  %v3939_v23 = vmul.f32 %v3937_v30, %v3937_v30 }
0x1d7a   :  { %3941 = vadd.xlane.f32.xlu0 %v3940_v19 }
0x1d7b   :  { %v3943_v59 = vsel %vm697_vm1, %v3939_v23, 0.0 }
0x1d7c   :  { %3944 = vadd.xlane.f32.xlu1 %v3943_v59 }
0x1d7e   :  { %4065 = vadd.xlane.f32.xlu0 %v4064_v50 }
0x1e07   :  { %v3942_v26 = vpop.xlane.xlu0 %3941 }
0x1e08   :  { %v3946_v18 = vmul.f32 0.03125, %v3942_v26 }
0x1e09   :  { %v3945_v63 = vpop.xlane.xlu1 %3944 }
0x1e0a   :  { %v3948_v61 = vadd.f32 1e-06, %v3946_v18  ;;  %v3947_v46 = vmul.f32 0.03125, %v3945_v63 }
0x1e0b   :  { %v4066_v60 = vpop.xlane.xlu0 %4065 }
0x1e0c   :  { %7120 = vrsqrt.f32 %v3948_v61  ;;  %v3949_v36 = vadd.f32 1e-06, %v3947_v46  ;;  %v4067_v51 = vmax.f32 %v4066_v60, 1e-24  ;;  %v7214_v60 = vld [vmem:[%s7360_s8 + $0x10] sm:$0xff]  }
0x1e0e   :  { %7122 = vrsqrt.f32 %v3949_v36 }
0x1e0f   :  { %7124 = vrsqrt.f32 %v4067_v51 }
0x1e16   :  { %v7121_v27 = vpop.eup %7120 }
0x1e17   :  { %v3952_v57 = vmul.f32 %v7121_v27, %v3936_v24 }
0x1e18   :  { %v7123_v13 = vpop.eup %7122 }
0x1e19   :  { %v7125_v39 = vpop.eup %7124  ;;  %v3954_v25 = vmul.f32 %v7211_v1, %v3952_v57  ;;  %v3953_v31 = vmul.f32 %v7123_v13, %v3937_v30  ;;  %v7215_v57 = vld [vmem:[%s7360_s8 + $0x18] sm:$0xff]  }
0x1e1a   :  { %v4069_v37 = vmul.f32 %v7125_v39, %v5977_v49 }
0x1e1b   :  { %v3955_v41 = vmul.f32 %v7211_v1, %v3953_v31  ;;  %v3956_v3 = vadd.f32 %v7212_v43, %v3954_v25 }
0x1e1c   :  { %v4070_v21 = vmul.f32 %v5978_v29, %v4069_v37  ;;  %v7216_v37 = vld [vmem:[%s7350_s29 + $0x10] sm:$0xff]  }
0x1e1d   :  { %v3957_v47 = vadd.f32 %v7212_v43, %v3955_v41  ;;  %v7217_v41 = vld [vmem:[%s7350_s29 + $0x18] sm:$0xff]   ;;  %s7310_s29 = smov 10  }
0x1e1e   :  { %v4071_v35 = vpack.c.bf16 %v4070_v21, %v4070_v21 }
0x1e1f   :  { %v3958_v20 = vpack.c.bf16 %v3957_v47, %v3956_v3 }
0x1e20   :  { %v4073_v62 = vsel %vm693_vm0, %v4071_v35, 0  ;;  %v7218_v35 = vld [vmem:[%s8749_s15] ss:$0 sm:$0xff] }
0x1e21   :  { %6598 = vmatmul.mubr.msk.bf16.vlgmr.msra.gmra.mrb[96].mxu1 %vm693_vm0, %v3958_v20 }
0x1e22   :  { %6622 = vmatpush3.bf16.xpose.msra.mxu1 %v4073_v62  ;;  %6623 = vmatprep.mubr.msk.bf16.mxu1 %vm7305_vm2, %v7304_v44 }
0x1e23   :  { %6627 = vmatprep.subr.bf16.mxu1 %v7304_v44 }
0x1e29   :  { %6624 = vmatmul.mubr.msk.bf16.vlgmr.msra.gmra.mrb[100].mxu1 %vm693_vm0, %v8055_v38  ;;  %v7213_v38 = vld [vmem:[%s8748_s17] ss:$0 sm:$0xff] }
0x1e2a   :  { %6628 = vmatpush3.bf16.xpose.msra.mxu1 %v4118_v32  ;;  %6629 = vmatprep.mubr.msk.bf16.mxu1 %vm7305_vm2, %v7304_v44 }
0x1e2b   :  { %6633 = vmatprep.subr.bf16.mxu1 %v7304_v44 }
0x1e31   :  { %6630 = vmatmul.mubr.msk.bf16.vlgmr.msra.gmra.mrb[104].mxu1 %vm693_vm0, %v8063_v16 }
0x1e32   :  { %6635 = vmatprep.mubr.msk.bf16.mxu1 %vm7305_vm2, %v7304_v44  ;;  %6634 = vmatpush3.bf16.msra.mxu1 %v4177_v53 }
0x1e33   :  { %6639 = vmatprep.subr.bf16.mxu1 %v7304_v44 }
0x1ef4   :  { %v3996_v5 = vpop.f32.mrb[96].mxu1 }
0x1ef5   :  { %v3997_v7 = vadd.f32 %v7213_v38, %v3996_v5  ;;  %v6599_v42 = vpop.f32.mrb[97].mxu1 }
0x1ef6   :  { %v3999_v45 = vpop.f32.mrb[98].mxu1 }
0x1ef7   :  { %v4005_v4 = vmul.f32 0.70710677, %v3997_v7  ;;  %v4000_v58 = vadd.f32 %v7213_v38, %v3999_v45  ;;  %v6600_v48 = vpop.f32.mrb[99].mxu1  ;;  %v4003_v23 = vmul.f32 0.5, %v3997_v7 }
0x1ef9   :  { %7126 = verf.f32 %v4005_v4  ;;  %v4006_v28 = vmul.f32 0.70710677, %v4000_v58  ;;  %v4004_v59 = vmul.f32 0.5, %v4000_v58 }
0x1efb   :  { %7128 = verf.f32 %v4006_v28 }
0x1efc   :  { %v4109_v16 = vpop.f32.mrb[100].mxu1 }
0x1efd   :  { %v6625_v8 = vpop.f32.mrb[101].mxu1 }
0x1efe   :  { %v4112_v49 = vpop.f32.mrb[102].mxu1 }
0x1eff   :  { %v6626_v24 = vpop.f32.mrb[103].mxu1 }
0x1f03   :  { %v7127_v56 = vpop.eup %7126 }
0x1f04   :  { %v4009_v30 = vadd.f32 1.0, %v7127_v56  ;;  %v4154_v33 = vpop.f32.mrb[104].mxu1 }
0x1f05   :  { %v7129_v2 = vpop.eup %7128  ;;  %7130 = vrsqrt.f32 %v4154_v33  ;;  %v6631_v19 = vpop.f32.mrb[105].mxu1  ;;  %vm4162_vm11 = vcmp.eq.f32.partialorder %v4154_v33, inf  ;;  %v4165_v27 = vand.u32 2147483648, %v4154_v33  ;;  %vm4164_vm12 = vcmp.eq.f32.partialorder %v4154_v33, 0.0 }
0x1f06   :  { %v4010_v50 = vadd.f32 1.0, %v7129_v2  ;;  %v4157_v26 = vpop.f32.mrb[106].mxu1  ;;  %v4011_v63 = vmul.f32 %v4009_v30, %v4003_v23 }
0x1f07   :  { %v6632_v18 = vpop.f32.mrb[107].mxu1  ;;  %v7219_v26 = vld [vmem:[%s7340_s21 + $0x1] ss:$0 sm:$0xff]  ;;  %s8759_s21 = sld [smem:[#allocation13_spill]] }
0x1f08   :  { %v4012_v61 = vmul.f32 %v4010_v50, %v4004_v59 }
0x1f0a   :  { %v4013_v46 = vpack.c.bf16 %v4012_v61, %v4011_v63 }
0x1f0c   :  { %6618 = vmatmul.mubr.bf16.vlgmr.msra.gmra.mrb[80].mxu0 %v4013_v46  ;;  %v7220_v46 = vld [vmem:[%s7345_s25 + $0x1] ss:$0 sm:$0xff]  ;;  %s8760_s25 = sld [smem:[#allocation14_spill]] }
0x1f0d   :  { %6648 = vmatpush3.bf16.msra.mxu0 %v7214_v60  ;;  %6651 = vmatprep.mubr.msk.bf16.mxu0 %vm7305_vm2, %v7304_v44 }
0x1f0e   :  { %6649 = vmatprep.subr.bf16.mxu0 %v7304_v44 }
0x1f0f   :  { %v7131_v36 = vpop.eup %7130 }
0x1f10   :  { %v4161_v51 = vmul.f32 %v7131_v36, %v4154_v33 }
0x1f11   :  { %6650 = vmatpush3.bf16.msra.mxu0 %v7215_v57 }
0x1f12   :  { %v4163_v13 = vsel %vm4162_vm11, %v4154_v33, %v4161_v51  ;;  %6663 = vmatprep.subr.bf16.mxu0 %v7304_v44  ;;  %v6006_v34 = vld [vmem:[%s8760_s25] ss:$0 sm:$0xff] }
0x1f13   :  { %v4166_v39 = vsel %vm4164_vm12, %v4165_v27, %v4163_v13  ;;  %v7221_v27 = vld [vmem:[%s7370_s19 + $0x10] sm:$0xff]   ;;  %v7222_v13 = vld [vmem:[%s7370_s19 + $0x18] sm:$0xff]  }
0x1f14   :  { %v4167_v1 = vmax.f32 %v4166_v39, 1e-12 }
0x1f16   :  { %7132 = vrcp.f32 %v4167_v1 }
0x1f20   :  { %v7133_v25 = vpop.eup %7132 }
0x1f21   :  { %v4169_v31 = vmul.f32 %v7133_v25, %v4109_v16 }
0x1f23   :  { %v4172_v29 = vpack.c.bf16 %v4169_v31, %v4169_v31 }
0x1f25   :  { %6636 = vmatmul.mubr.msk.bf16.vlgmr.msra.gmra.mrb[108].mxu1 %vm3073_vm9, %v4172_v29 }
0x1f26   :  { %6640 = vmatpush3.bf16.msra.mxu1 %v7216_v37  ;;  %6643 = vmatprep.mubr.msk.bf16.mxu1 %vm7305_vm2, %v7304_v44  ;;  %v7223_v37 = vld [vmem:[%s7355_s3 + $0x1] ss:$0 sm:$0xff]  ;;  %s7311_s3 = smov [#allocation2]  }
0x1f27   :  { %6641 = vmatprep.subr.bf16.mxu1 %v7304_v44  ;;  %s5737_s8 = sshll.u32 %s7311_s3, 4  ;;  %s5738_s8 = int_to_ptr.vmem [resolvable:$true] %s5737_s8 }
0x1f28   :  { %p7255_p1 = scmp.lt.s32.totalorder %s5738_s8, %s5738_s8 }
0x1f2a   :  { %6642 = vmatpush3.bf16.msra.mxu1 %v7217_v41 }
0x1f2b   :  { %6655 = vmatprep.subr.bf16.mxu1 %v7304_v44 }
0x1fdf   :  { %v4048_v21 = vpop.f32.mrb[80].mxu0 }
0x1fe0   :  { %v4055_v43 = vadd.f32 %v4048_v21, %v8291_v55  ;;  %v6619_v3 = vpop.f32.mrb[81].mxu0 }
0x1fe1   :  { %v4051_v47 = vpop.f32.mrb[82].mxu0 }
0x1fe2   :  { %v8343_v20 = vadd.f32 %v7218_v35, %v4055_v43  ;;  %v4056_v52 = vadd.f32 %v4051_v47, %v8294_v40  ;;  %v6620_v62 = vpop.f32.mrb[83].mxu0 }
0x1fe3   :  { %v7224_v62 = vld [vmem:[%s7365_s14 + $0x1] ss:$0 sm:$0xff]  ;;  %s7250_s14 = scalar_lea.vmem %s5738_s8, 32 }
0x1fe4   :  { %v8346_v15 = vadd.f32 %v7218_v35, %v4056_v52  ;;  %v4225_v32 = vsel %vm693_vm0, %v8343_v20, 0.0  ;;  %p7251_p0 = scmp.ne.s32.totalorder %s5738_s8, %s7250_s14  ;;  %p7256_p2 = scmp.lt.s32.totalorder %s7250_s14, %s7250_s14 }
0x1fe5   :  { %4226 = vadd.xlane.f32.xlu1 %v4225_v32 }
0x1fe6   :  { %v4228_v0 = vsel %vm697_vm1, %v8346_v15, 0.0  ;;  %p7257_p3 = por %p7256_p2, %p7255_p1 }
0x1fe7   :  { %4229 = vadd.xlane.f32.xlu0 %v4228_v0 }
0x1fe8   :  { %p7258_p4 = pnand %p7257_p3, %p7251_p0 }
0x1ff8   :  { %v4213_v53 = vpop.f32.mrb[108].mxu1 }
0x1ff9   :  { %v6637_v55 = vpop.f32.mrb[109].mxu1  ;;  %v4220_v49 = vrot.slane %v4213_v53, 6 }
0x1ffa   :  { %v4216_v5 = vpop.f32.mrb[110].mxu1 }
0x1ffb   :  { %v6638_v38 = vpop.f32.mrb[111].mxu1 }
0x2072   :  { %v4227_v7 = vpop.xlane.xlu1 %4226 }
0x2073   :  { %v4231_v42 = vmul.f32 0.03125, %v4227_v7 }
0x2074   :  { %v4230_v45 = vpop.xlane.xlu0 %4229 }
0x2075   :  { %v4233_v40 = vsub.f32 %v8343_v20, %v4231_v42  ;;  %v4232_v4 = vmul.f32 0.03125, %v4230_v45 }
0x2077   :  { %v4234_v58 = vsub.f32 %v8346_v15, %v4232_v4  ;;  %v4235_v48 = vmul.f32 %v4233_v40, %v4233_v40 }
0x2079   :  { %v4237_v28 = vsel %vm693_vm0, %v4235_v48, 0.0  ;;  %v4236_v16 = vmul.f32 %v4234_v58, %v4234_v58 }
0x207a   :  { %4238 = vadd.xlane.f32.xlu1 %v4237_v28 }
0x207b   :  { %v4240_v8 = vsel %vm697_vm1, %v4236_v16, 0.0 }
0x207c   :  { %4241 = vadd.xlane.f32.xlu0 %v4240_v8 }
0x208b   :  { %4221 = vrot.lane.b32.xlu1 %v4220_v49, %s7309_s1 }
0x2107   :  { %v4239_v24 = vpop.xlane.xlu1 %4238 }
0x2108   :  { %v4243_v56 = vmul.f32 0.03125, %v4239_v24  ;;  %v7225_v24 = vld [vmem:[%s7375_s24 + $0x1] ss:$0 sm:$0xff] }
0x2109   :  { %v4242_v30 = vpop.xlane.xlu0 %4241 }
0x210a   :  { %v4245_v33 = vadd.f32 1e-06, %v4243_v56  ;;  %v4244_v2 = vmul.f32 0.03125, %v4242_v30 }
0x210b   :  { %v4222_v57 = vpop.permute.xlu1 %4221 }
0x210c   :  { %7134 = vrsqrt.f32 %v4245_v33  ;;  %v4246_v19 = vadd.f32 1e-06, %v4244_v2  ;;  %v8369_v39 = vsel %vm2878_vm4, %v4213_v53, %v4222_v57 }
0x210d   :  { %v4437_v1 = vpack.c.bf16 %v8369_v39, %v8369_v39 }
0x210e   :  { %7136 = vrsqrt.f32 %v4246_v19 }
0x210f   :  { %v8378_v25 = vsel %vm693_vm0, %v4437_v1, 0 }
0x2116   :  { %v7135_v23 = vpop.eup %7134 }
0x2117   :  { %v4249_v59 = vmul.f32 %v7135_v23, %v4233_v40 }
0x2118   :  { %v7137_v50 = vpop.eup %7136 }
0x2119   :  { %v4251_v18 = vmul.f32 %v7219_v26, %v4249_v59  ;;  %v4250_v63 = vmul.f32 %v7137_v50, %v4234_v58 }
0x211b   :  { %v4252_v61 = vmul.f32 %v7219_v26, %v4250_v63  ;;  %v4253_v60 = vadd.f32 %v7220_v46, %v4251_v18 }
0x211d   :  { %v4254_v36 = vadd.f32 %v7220_v46, %v4252_v61 }
0x211f   :  { %v4255_v51 = vpack.c.bf16 %v4254_v36, %v4253_v60 }
0x2121   :  { %6644 = vmatmul.mubr.msk.bf16.vlgmr.msra.gmra.mrb[112].mxu1 %vm693_vm0, %v4255_v51  ;;  %6652 = vmatmul.mubr.msk.bf16.vlgmr.msra.gmra.mrb[84].mxu0 %vm693_vm0, %v4255_v51 }
0x2122   :  { %6656 = vmatpush3.bf16.msra.mxu1 %v7221_v27  ;;  %6659 = vmatprep.mubr.msk.bf16.mxu1 %vm7305_vm2, %v7304_v44 }
0x2123   :  { %6657 = vmatprep.subr.bf16.mxu1 %v7304_v44  ;;  %6665 = vmatprep.mubr.msk.bf16.mxu0 %vm7305_vm2, %v7304_v44 }
0x2126   :  { %6658 = vmatpush3.bf16.msra.mxu1 %v7222_v13 }
0x2127   :  { %6669 = vmatprep.subr.bf16.mxu1 %v7304_v44 }
0x2129   :  { %6660 = vmatmul.mubr.msk.bf16.vlgmr.msra.gmra.mrb[116].mxu1 %vm693_vm0, %v4255_v51 }
0x212a   :  { %6671 = vmatprep.mubr.msk.bf16.mxu1 %vm7305_vm2, %v7304_v44 }
0x212f   :  { %6670 = vmatpush3.bf16.xpose.msra.mxu1 %v8378_v25 }
0x2130   :  { %6687 = vmatprep.subr.bf16.mxu1 %v7304_v44 }
0x21f4   :  { %v4293_v31 = vpop.f32.mrb[112].mxu1  ;;  %v4334_v29 = vpop.f32.mrb[84].mxu0 }
0x21f5   :  { %v4294_v41 = vadd.f32 %v7223_v37, %v4293_v31  ;;  %v6645_v21 = vpop.f32.mrb[113].mxu1  ;;  %v6653_v43 = vpop.f32.mrb[85].mxu0  ;;  %v4335_v32 = vadd.f32 %v7224_v62, %v4334_v29  ;;  %v8465_v29 = vld [vmem:[%s7460_s27] sm:$0xff] }
0x21f6   :  { %v4296_v3 = vpop.f32.mrb[114].mxu1  ;;  %v4337_v47 = vpop.f32.mrb[86].mxu0 }
0x21f7   :  { %v6646_v35 = vpop.f32.mrb[115].mxu1  ;;  %v6654_v52 = vpop.f32.mrb[87].mxu0  ;;  %v4297_v0 = vadd.f32 %v7223_v37, %v4296_v3  ;;  %v4338_v53 = vadd.f32 %v7224_v62, %v4337_v47  ;;  %v4382_v55 = vmul.f32 %v7578_v9, %v4294_v41  ;;  %v4636_v5 = vmul.f32 %v7581_v10, %v4294_v41 }
0x21f8   :  { %v4882_v38 = vmul.f32 %v7584_v11, %v4294_v41  ;;  %v5128_v7 = vmul.f32 %v7587_v12, %v4294_v41  ;;  %v8471_v41 = vld [vmem:[%s7460_s27 + $0x8] sm:$0x3] }
0x21f9   :  { %v4383_v42 = vmul.f32 %v7578_v9, %v4297_v0  ;;  %v4637_v45 = vmul.f32 %v7581_v10, %v4297_v0  ;;  %v4883_v40 = vmul.f32 %v7584_v11, %v4297_v0  ;;  %v5129_v4 = vmul.f32 %v7587_v12, %v4297_v0 }
0x21fa   :  { %v4385_v58 = vpack.c.bf16 %v4338_v53, %v4335_v32 }
0x21fb   :  { %v4384_v48 = vpack.c.bf16 %v4383_v42, %v4382_v55  ;;  %v4638_v28 = vpack.c.bf16 %v4637_v45, %v4636_v5  ;;  %v4884_v16 = vpack.c.bf16 %v4883_v40, %v4882_v38  ;;  %v5130_v8 = vpack.c.bf16 %v5129_v4, %v5128_v7  ;;  %v8481_v55 = vld [vmem:[%s7455_s20] sm:$0xff]  ;;  %v7231_v4 = vld [vmem:[%s7455_s20 + $0x8] sm:$0x3] }
0x21fc   :  { %v4375_v49 = vpop.f32.mrb[116].mxu1  ;;  %v4390_v30 = vsel %vm693_vm0, %v4385_v58, 0 }
0x21fd   :  { %v4376_v56 = vadd.f32 %v7225_v24, %v4375_v49  ;;  %v6661_v33 = vpop.f32.mrb[117].mxu1  ;;  %6664 = vmatpush3.bf16.xpose.msra.mxu0 %v4390_v30  ;;  %6672 = vmatmul.mubr.msk.bf16.vlgmr.msra.gmra.mrb[120].mxu1 %vm693_vm0, %v4384_v48 }
0x21fe   :  { %v4378_v2 = vpop.f32.mrb[118].mxu1  ;;  %6688 = vmatpush3.bf16.xpose.msra.mxu1 %v4390_v30  ;;  %6689 = vmatprep.mubr.msk.bf16.mxu1 %vm7305_vm2, %v7304_v44 }
0x21ff   :  { %v4379_v19 = vadd.f32 %v7225_v24, %v4378_v2  ;;  %v6662_v23 = vpop.f32.mrb[119].mxu1  ;;  %v8398_v59 = vmul.f32 %v7578_v9, %v4376_v56  ;;  %6693 = vmatprep.subr.bf16.mxu1 %v7304_v44  ;;  %6675 = vmatprep.subr.bf16.mxu0 %v7304_v44  ;;  %v8403_v50 = vmul.f32 %v7581_v10, %v4376_v56 }
0x2200   :  { %v8406_v26 = vmul.f32 %v7584_v11, %v4376_v56  ;;  %v8409_v18 = vmul.f32 %v7587_v12, %v4376_v56 }
0x2201   :  { %v8412_v63 = vmul.f32 %v7578_v9, %v4379_v19  ;;  %v8415_v61 = vmul.f32 %v7581_v10, %v4379_v19  ;;  %v8418_v46 = vmul.f32 %v7584_v11, %v4379_v19  ;;  %v8421_v60 = vmul.f32 %v7587_v12, %v4379_v19  ;;  %v7226_v10 = vld [vmem:[%s7380_s30 + $0x10] sm:$0xff]   ;;  %v7227_v11 = vld [vmem:[%s7380_s30 + $0x18] sm:$0xff]  }
0x2203   :  { %v4531_v36 = vpack.c.bf16 %v8412_v63, %v8398_v59  ;;  %v4777_v51 = vpack.c.bf16 %v8415_v61, %v8403_v50  ;;  %v5023_v27 = vpack.c.bf16 %v8418_v46, %v8406_v26  ;;  %v5269_v9 = vpack.c.bf16 %v8421_v60, %v8409_v18  ;;  %v7233_v18 = vld [vmem:[%s8745_s5 + $0x48] sm:$0xff]   ;;  %v7234_v60 = vld [vmem:[%s8745_s5 + $0x50] sm:$0xff]  }
0x2204   :  { %6666 = vmatmul.mubr.msk.bf16.vlgmr.msra.gmra.mrb[88].mxu0 %vm693_vm0, %v4384_v48 }
0x2205   :  { %6690 = vmatmul.mubr.msk.bf16.vlgmr.msra.gmra.mrb[124].mxu1 %vm693_vm0, %v4638_v28  ;;  %6677 = vmatprep.mubr.msk.bf16.mxu0 %vm7305_vm2, %v7304_v44 }
0x2206   :  { %6694 = vmatpush3.bf16.xpose.msra.mxu1 %v8378_v25  ;;  %6695 = vmatprep.mubr.msk.bf16.mxu1 %vm7305_vm2, %v7304_v44 }
0x2207   :  { %6711 = vmatprep.subr.bf16.mxu1 %v7304_v44 }
0x220d   :  { %6696 = vmatmul.mubr.msk.bf16.vlgmr.msra.gmra.mrb[128].mxu1 %vm693_vm0, %v4638_v28 }
0x220e   :  { %6712 = vmatpush3.bf16.xpose.msra.mxu1 %v4390_v30  ;;  %6713 = vmatprep.mubr.msk.bf16.mxu1 %vm7305_vm2, %v7304_v44 }
0x220f   :  { %6717 = vmatprep.subr.bf16.mxu1 %v7304_v44 }
0x2215   :  { %6714 = vmatmul.mubr.msk.bf16.vlgmr.msra.gmra.mrb[132].mxu1 %vm693_vm0, %v4884_v16 }
0x2216   :  { %6718 = vmatpush3.bf16.xpose.msra.mxu1 %v8378_v25  ;;  %6719 = vmatprep.mubr.msk.bf16.mxu1 %vm7305_vm2, %v7304_v44 }
0x2217   :  { %6735 = vmatprep.subr.bf16.mxu1 %v7304_v44 }
0x221d   :  { %6720 = vmatmul.mubr.msk.bf16.vlgmr.msra.gmra.mrb[136].mxu1 %vm693_vm0, %v4884_v16 }
0x221e   :  { %6736 = vmatpush3.bf16.xpose.msra.mxu1 %v4390_v30  ;;  %6737 = vmatprep.mubr.msk.bf16.mxu1 %vm7305_vm2, %v7304_v44 }
0x221f   :  { %6741 = vmatprep.subr.bf16.mxu1 %v7304_v44 }
0x2225   :  { %6738 = vmatmul.mubr.msk.bf16.vlgmr.msra.gmra.mrb[140].mxu1 %vm693_vm0, %v5130_v8 }
0x2226   :  { %6742 = vmatpush3.bf16.xpose.msra.mxu1 %v8378_v25  ;;  %6743 = vmatprep.mubr.msk.bf16.mxu1 %vm7305_vm2, %v7304_v44 }
0x2227   :  { %6759 = vmatprep.subr.bf16.mxu1 %v7304_v44 }
0x222d   :  { %6744 = vmatmul.mubr.msk.bf16.vlgmr.msra.gmra.mrb[144].mxu1 %vm693_vm0, %v5130_v8 }
0x222e   :  { %6760 = vmatpush3.bf16.msra.mxu1 %v7226_v10  ;;  %6763 = vmatprep.mubr.msk.bf16.mxu1 %vm7305_vm2, %v7304_v44 }
0x222f   :  { %6761 = vmatprep.subr.bf16.mxu1 %v7304_v44 }
0x2232   :  { %6762 = vmatpush3.bf16.msra.mxu1 %v7227_v11 }
0x2233   :  { %6767 = vmatprep.subr.bf16.mxu1 %v7304_v44 }
0x22d0   :  { %v4475_v12 = vpop.f32.mrb[120].mxu1 }
0x22d1   :  { %v4482_v57 = vmul.f32 0.35355338, %v4475_v12  ;;  %v6673_v13 = vpop.f32.mrb[121].mxu1 }
0x22d2   :  { %v4478_v1 = vpop.f32.mrb[122].mxu1 }
0x22d3   :  { %v4483_v25 = vmul.f32 0.35355338, %v4478_v1  ;;  %v6674_v31 = vpop.f32.mrb[123].mxu1  ;;  %v8468_v37 = vadd.f32 %v8465_v29, %v4482_v57 }
0x22d5   :  { %v8474_v21 = vadd.f32 %v8471_v41, %v4483_v25  ;;  %v4492_v43 = vsel %vm3073_vm9, %v8468_v37, -inf }
0x22d6   :  { %4493 = vmax.xlane.f32.xlu0 %v4492_v43 }
0x22d7   :  { %v4426_v3 = vpop.f32.mrb[88].mxu0  ;;  %v4495_v53 = vsel %vm3178_vm10, %v8474_v21, -inf }
0x22d8   :  { %v4433_v47 = vmul.f32 0.35355338, %v4426_v3  ;;  %v6667_v35 = vpop.f32.mrb[89].mxu0  ;;  %v4676_v52 = vpop.f32.mrb[124].mxu1 }
0x22d9   :  { %v4429_v62 = vpop.f32.mrb[90].mxu0  ;;  %v4683_v32 = vmul.f32 0.35355338, %v4676_v52  ;;  %v6691_v0 = vpop.f32.mrb[125].mxu1 }
0x22da   :  { %v8484_v5 = vadd.f32 %v8481_v55, %v4433_v47  ;;  %v4434_v38 = vmul.f32 0.35355338, %v4429_v62  ;;  %v6668_v7 = vpop.f32.mrb[91].mxu0  ;;  %4496 = vmax.xlane.f32.xlu0 %v4495_v53  ;;  %v4679_v42 = vpop.f32.mrb[126].mxu1 }
0x22db   :  { %v6692_v45 = vpop.f32.mrb[127].mxu1  ;;  %v8487_v40 = vadd.f32 %v8481_v55, %v4683_v32  ;;  %v4684_v48 = vmul.f32 0.35355338, %v4679_v42 }
0x22dc   :  { %v8490_v58 = vadd.f32 %v7231_v4, %v4434_v38  ;;  %v4486_v28 = vsel %vm989_vm14, %v8484_v5, -inf }
0x22dd   :  { %v4732_v16 = vsel %vm989_vm14, %v8487_v40, -inf  ;;  %v8496_v49 = vadd.f32 %v7231_v4, %v4684_v48 }
0x22de   :  { %4487 = vmax.xlane.f32.xlu0 %v4486_v28  ;;  %4733 = vmax.xlane.f32.xlu1 %v4732_v16  ;;  %v4489_v30 = vsel %vm993_vm15, %v8490_v58, -inf }
0x22df   :  { %v4735_v10 = vsel %vm993_vm15, %v8496_v49, -inf }
0x22e0   :  { %v4721_v8 = vpop.f32.mrb[128].mxu1 }
0x22e1   :  { %v4728_v24 = vmul.f32 0.35355338, %v4721_v8  ;;  %v6697_v56 = vpop.f32.mrb[129].mxu1 }
0x22e2   :  { %4490 = vmax.xlane.f32.xlu0 %v4489_v30  ;;  %v4724_v33 = vpop.f32.mrb[130].mxu1 }
0x22e3   :  { %v6698_v2 = vpop.f32.mrb[131].mxu1  ;;  %v8501_v19 = vadd.f32 %v8465_v29, %v4728_v24  ;;  %v4729_v23 = vmul.f32 0.35355338, %v4724_v33  ;;  %v4532_v24 = vmul.f32 %v8369_v39, %v8116_v54 }
0x22e5   :  { %v8506_v12 = vadd.f32 %v8471_v41, %v4729_v23  ;;  %v4738_v1 = vsel %vm3073_vm9, %v8501_v19, -inf  ;;  %v4534_v2 = vpack.c.bf16 %v4532_v24, %v4532_v24 }
0x22e6   :  { %4736 = vmax.xlane.f32.xlu0 %v4735_v10  ;;  %v4778_v10 = vmul.f32 %v8369_v39, %v8114_v17 }
0x22e7   :  { %v4741_v3 = vsel %vm3178_vm10, %v8506_v12, -inf }
0x22e8   :  { %v4922_v11 = vpop.f32.mrb[132].mxu1 }
0x22e9   :  { %v4929_v57 = vmul.f32 0.35355338, %v4922_v11  ;;  %v6715_v13 = vpop.f32.mrb[133].mxu1  ;;  %v4780_v11 = vpack.c.bf16 %v4778_v10, %v4778_v10 }
0x22ea   :  { %4739 = vmax.xlane.f32.xlu0 %v4738_v1  ;;  %v4925_v25 = vpop.f32.mrb[134].mxu1 }
0x22eb   :  { %v8511_v31 = vadd.f32 %v8481_v55, %v4929_v57  ;;  %v6716_v43 = vpop.f32.mrb[135].mxu1  ;;  %v4930_v57 = vmul.f32 0.35355338, %v4925_v25 }
0x22ed   :  { %v4978_v47 = vsel %vm989_vm14, %v8511_v31, -inf  ;;  %v8533_v13 = vadd.f32 %v7231_v4, %v4930_v57 }
0x22ee   :  { %4742 = vmax.xlane.f32.xlu0 %v4741_v3  ;;  %4979 = vmax.xlane.f32.xlu1 %v4978_v47 }
0x22ef   :  { %v4981_v3 = vsel %vm993_vm15, %v8533_v13, -inf }
0x22f0   :  { %v4967_v35 = vpop.f32.mrb[136].mxu1 }
0x22f1   :  { %v4974_v52 = vmul.f32 0.35355338, %v4967_v35  ;;  %v6721_v62 = vpop.f32.mrb[137].mxu1 }
0x22f2   :  { %v4970_v32 = vpop.f32.mrb[138].mxu1 }
0x22f3   :  { %v8518_v0 = vadd.f32 %v8465_v29, %v4974_v52  ;;  %v4975_v53 = vmul.f32 0.35355338, %v4970_v32  ;;  %v6722_v38 = vpop.f32.mrb[139].mxu1 }
0x22f5   :  { %v8521_v7 = vadd.f32 %v8471_v41, %v4975_v53  ;;  %v4984_v42 = vsel %vm3073_vm9, %v8518_v0, -inf  ;;  %v5270_v53 = vmul.f32 %v8369_v39, %v8200_v22 }
0x22f6   :  { %4985 = vmax.xlane.f32.xlu1 %v4984_v42 }
0x22f7   :  { %v4987_v28 = vsel %vm3178_vm10, %v8521_v7, -inf }
0x22f8   :  { %v5168_v45 = vpop.f32.mrb[140].mxu1 }
0x22f9   :  { %v6739_v48 = vpop.f32.mrb[141].mxu1  ;;  %v5175_v47 = vmul.f32 0.35355338, %v5168_v45 }
0x22fa   :  { %4988 = vmax.xlane.f32.xlu1 %v4987_v28  ;;  %v5171_v16 = vpop.f32.mrb[142].mxu1 }
0x22fb   :  { %v6740_v8 = vpop.f32.mrb[143].mxu1  ;;  %v5176_v1 = vmul.f32 0.35355338, %v5171_v16  ;;  %v8545_v25 = vadd.f32 %v8481_v55, %v5175_v47  ;;  %v5272_v55 = vpack.c.bf16 %v5270_v53, %v5270_v53 }
0x22fd   :  { %v8535_v43 = vadd.f32 %v7231_v4, %v5176_v1  ;;  %v5224_v32 = vsel %vm989_vm14, %v8545_v25, -inf }
0x22ff   :  { %v5227_v17 = vsel %vm993_vm15, %v8535_v43, -inf }
0x2300   :  { %v5213_v56 = vpop.f32.mrb[144].mxu1 }
0x2301   :  { %v6745_v30 = vpop.f32.mrb[145].mxu1  ;;  %v5220_v54 = vmul.f32 0.35355338, %v5213_v56 }
0x2302   :  { %v5216_v33 = vpop.f32.mrb[146].mxu1 }
0x2303   :  { %v6746_v23 = vpop.f32.mrb[147].mxu1  ;;  %v8540_v35 = vadd.f32 %v8465_v29, %v5220_v54  ;;  %v5221_v52 = vmul.f32 0.35355338, %v5216_v33 }
0x2304   :  { %4536 = vrot.lane.b32.xlu0 %v4534_v2, %s7308_s28 }
0x2305   :  { %v8548_v4 = vadd.f32 %v8471_v41, %v5221_v52  ;;  %v5230_v62 = vsel %vm3073_vm9, %v8540_v35, -inf  ;;  %v5024_v41 = vmul.f32 %v8369_v39, %v8195_v6 }
0x2307   :  { %v5233_v29 = vsel %vm3178_vm10, %v8548_v4, -inf  ;;  %v5026_v38 = vpack.c.bf16 %v5024_v41, %v5024_v41 }
0x230b   :  { %4782 = vrot.lane.b32.xlu1 %v4780_v11, %s7308_s28 }
0x2323   :  { %4982 = vmax.xlane.f32.xlu0 %v4981_v3 }
0x2327   :  { %5228 = vmax.xlane.f32.xlu0 %v5227_v17 }
0x232b   :  { %5231 = vmax.xlane.f32.xlu0 %v5230_v62 }
0x232f   :  { %5225 = vmax.xlane.f32.xlu1 %v5224_v32  ;;  %5234 = vmax.xlane.f32.xlu0 %v5233_v29 }
0x2340   :  { %5274 = vrot.lane.b32.xlu1 %v5272_v55, %s7308_s28 }
0x2345   :  { %5028 = vrot.lane.b32.xlu0 %v5026_v38, %s7308_s28 }
0x2363   :  { %v4494_v42 = vpop.xlane.xlu0 %4493 }
0x2367   :  { %v4497_v45 = vpop.xlane.xlu0 %4496 }
0x236b   :  { %v4488_v48 = vpop.xlane.xlu0 %4487  ;;  %v4734_v10 = vpop.xlane.xlu1 %4733 }
0x236c   :  { %v4498_v28 = vmax.f32 %v4488_v48, %v4494_v42 }
0x236e   :  { %v4500_v16 = vsub.f32 %v8484_v5, %v4498_v28  ;;  %v4506_v8 = vsub.f32 %v8468_v37, %v4498_v28 }
0x236f   :  { %v4491_v24 = vpop.xlane.xlu0 %4490 }
0x2370   :  { %v4502_v56 = vmul.f32 1.442695, %v4500_v16  ;;  %v4508_v22 = vmul.f32 1.442695, %v4506_v8  ;;  %v4499_v30 = vmax.f32 %v4491_v24, %v4497_v45 }
0x2372   :  { %7138 = vpow2.f32 %v4502_v56  ;;  %v4501_v6 = vsub.f32 %v8490_v58, %v4499_v30  ;;  %v4507_v39 = vsub.f32 %v8474_v21, %v4499_v30 }
0x2373   :  { %v4737_v33 = vpop.xlane.xlu0 %4736  ;;  %7140 = vpow2.f32 %v4508_v22 }
0x2374   :  { %v4504_v2 = vmul.f32 1.442695, %v4501_v6  ;;  %v4510_v23 = vmul.f32 1.442695, %v4507_v39 }
0x2376   :  { %7142 = vpow2.f32 %v4504_v2 }
0x2377   :  { %7144 = vpow2.f32 %v4510_v23  ;;  %v4740_v11 = vpop.xlane.xlu0 %4739 }
0x2378   :  { %v4744_v5 = vmax.f32 %v4734_v10, %v4740_v11 }
0x237a   :  { %v4746_v37 = vsub.f32 %v8487_v40, %v4744_v5  ;;  %v4752_v57 = vsub.f32 %v8501_v19, %v4744_v5 }
0x237b   :  { %v4743_v1 = vpop.xlane.xlu0 %4742  ;;  %v4980_v62 = vpop.xlane.xlu1 %4979 }
0x237c   :  { %v7139_v54 = vpop.eup %7138  ;;  %v4748_v3 = vmul.f32 1.442695, %v4746_v37  ;;  %v4754_v47 = vmul.f32 1.442695, %v4752_v57  ;;  %v4745_v58 = vmax.f32 %v4737_v33, %v4743_v1  ;;  %v4835_v57 = vsel %vm1018_vm13, %v4777_v51, 0 }
0x237d   :  { %v4512_v21 = vsel %vm989_vm14, %v7139_v54, 0.0  ;;  %v7141_v52 = vpop.eup %7140 }
0x237e   :  { %7146 = vpow2.f32 %v4748_v3  ;;  %v4747_v17 = vsub.f32 %v8496_v49, %v4745_v58  ;;  %4513 = vadd.xlane.f32.xlu0 %v4512_v21  ;;  %v4753_v40 = vsub.f32 %v8506_v12, %v4745_v58  ;;  %v4518_v38 = vsel %vm3073_vm9, %v7141_v52, 0.0 }
0x237f   :  { %v4537_v32 = vpop.permute.xlu0 %4536  ;;  %7148 = vpow2.f32 %v4754_v47  ;;  %v4589_v12 = vsel %vm1018_vm13, %v4531_v36, 0 }
0x2380   :  { %v7143_v29 = vpop.eup %7142  ;;  %v4750_v53 = vmul.f32 1.442695, %v4747_v17  ;;  %v4542_v19 = vsel %vm2878_vm4, %v4537_v32, 0  ;;  %v4756_v45 = vmul.f32 1.442695, %v4753_v40 }
0x2381   :  { %v7145_v55 = vpop.eup %7144  ;;  %6676 = vmatpush3.bf16.msra.mxu0 %v4542_v19  ;;  %v4515_v41 = vsel %vm993_vm15, %v7143_v29, 0.0 }
0x2382   :  { %4516 = vadd.xlane.f32.xlu1 %v4515_v41  ;;  %4519 = vadd.xlane.f32.xlu0 %v4518_v38  ;;  %v4533_v42 = vpack.c.bf16 %v7145_v55, %v7141_v52  ;;  %7150 = vpow2.f32 %v4750_v53  ;;  %v4521_v28 = vsel %vm3178_vm10, %v7145_v55, 0.0 }
0x2383   :  { %v4986_v49 = vpop.xlane.xlu1 %4985  ;;  %6681 = vmatprep.subr.bf16.mxu0 %v7304_v44  ;;  %7152 = vpow2.f32 %v4756_v45 }
0x2384   :  { %v4990_v48 = vmax.f32 %v4980_v62, %v4986_v49  ;;  %6678 = vmatmul.mubr.msk.bf16.vlgmr.msra.gmra.mrb[92].mxu0 %vm3073_vm9, %v4533_v42 }
0x2385   :  { %6682 = vmatpush3.bf16.msra.mxu0 %v4589_v12  ;;  %6683 = vmatprep.mubr.msk.bf16.mxu0 %vm7305_vm2, %v7304_v44 }
0x2386   :  { %v4992_v16 = vsub.f32 %v8511_v31, %v4990_v48  ;;  %v4998_v8 = vsub.f32 %v8518_v0, %v4990_v48  ;;  %4522 = vadd.xlane.f32.xlu0 %v4521_v28  ;;  %6699 = vmatprep.subr.bf16.mxu0 %v7304_v44  ;;  %v4530_v0 = vpack.c.bf16 %v7143_v29, %v7139_v54 }
0x2387   :  { %v4989_v24 = vpop.xlane.xlu1 %4988 }
0x2388   :  { %v7147_v56 = vpop.eup %7146  ;;  %v4994_v22 = vmul.f32 1.442695, %v4992_v16  ;;  %v5000_v59 = vmul.f32 1.442695, %v4998_v8 }
0x2389   :  { %v4758_v63 = vsel %vm989_vm14, %v7147_v56, 0.0  ;;  %v7149_v36 = vpop.eup %7148 }
0x238a   :  { %7154 = vpow2.f32 %v4994_v22  ;;  %4759 = vadd.xlane.f32.xlu0 %v4758_v63  ;;  %v4764_v6 = vsel %vm3073_vm9, %v7149_v36, 0.0 }
0x238b   :  { %7156 = vpow2.f32 %v5000_v59  ;;  %v4783_v30 = vpop.permute.xlu1 %4782 }
0x238c   :  { %v7151_v31 = vpop.eup %7150  ;;  %v4788_v39 = vsel %vm2878_vm4, %v4783_v30, 0 }
0x238d   :  { %v4761_v33 = vsel %vm993_vm15, %v7151_v31, 0.0  ;;  %v7153_v2 = vpop.eup %7152  ;;  %v4776_v54 = vpack.c.bf16 %v7151_v31, %v7147_v56  ;;  %v7236_v31 = vld [vmem:[%s8745_s5 + $0x60] sm:$0xff]  }
0x238e   :  { %4765 = vadd.xlane.f32.xlu0 %v4764_v6  ;;  %v4767_v11 = vsel %vm3178_vm10, %v7153_v2, 0.0  ;;  %v4779_v37 = vpack.c.bf16 %v7153_v2, %v7149_v36  ;;  %v5327_v36 = vsel %vm1018_vm13, %v5269_v9, 0  ;;  %v7232_v6 = vld [vmem:[%s8745_s5 + $0x40] sm:$0xff]   ;;  %v7235_v9 = vld [vmem:[%s8745_s5 + $0x58] sm:$0xff]  }
0x2390   :  { %6684 = vmatmul.mubr.msk.bf16.vlgmr.msra.gmra.mrb[92].mxu0 %vm989_vm14, %v4530_v0  ;;  %v7237_v0 = vld [vmem:[%s8745_s5 + $0x68] sm:$0xff]  }
0x2391   :  { %6700 = vmatpush3.bf16.msra.mxu0 %v4788_v39  ;;  %6701 = vmatprep.mubr.msk.bf16.mxu0 %vm7305_vm2, %v7304_v44  ;;  %v7238_v39 = vld [vmem:[%s8745_s5 + $0x70] sm:$0xff]  }
0x2392   :  { %4762 = vadd.xlane.f32.xlu0 %v4761_v33  ;;  %6705 = vmatprep.subr.bf16.mxu0 %v7304_v44  ;;  %v7239_v33 = vld [vmem:[%s8745_s5 + $0x78] sm:$0xff]  }
0x2394   :  { %v8594_v23 = vpop.eup %7154 }
0x2395   :  { %v5004_v10 = vsel %vm989_vm14, %v8594_v23, 0.0  ;;  %v7157_v5 = vpop.eup %7156 }
0x2396   :  { %5005 = vadd.xlane.f32.xlu1 %v5004_v10  ;;  %4768 = vadd.xlane.f32.xlu0 %v4767_v11  ;;  %v5010_v1 = vsel %vm3073_vm9, %v7157_v5, 0.0 }
0x2398   :  { %6702 = vmatmul.mubr.msk.bf16.vlgmr.msra.gmra.mrb[96].mxu0 %vm3073_vm9, %v4779_v37 }
0x2399   :  { %6706 = vmatpush3.bf16.msra.mxu0 %v4835_v57  ;;  %6707 = vmatprep.mubr.msk.bf16.mxu0 %vm7305_vm2, %v7304_v44 }
0x239a   :  { %5011 = vadd.xlane.f32.xlu1 %v5010_v1  ;;  %6723 = vmatprep.subr.bf16.mxu0 %v7304_v44 }
0x23a4   :  { %6708 = vmatmul.mubr.msk.bf16.vlgmr.msra.gmra.mrb[96].mxu0 %vm989_vm14, %v4776_v54 }
0x23a5   :  { %6725 = vmatprep.mubr.msk.bf16.mxu0 %vm7305_vm2, %v7304_v44 }
0x23b0   :  { %v4983_v3 = vpop.xlane.xlu0 %4982 }
0x23b1   :  { %v4991_v47 = vmax.f32 %v4983_v3, %v4989_v24 }
0x23b3   :  { %v4993_v50 = vsub.f32 %v8533_v13, %v4991_v47  ;;  %v4999_v61 = vsub.f32 %v8521_v7, %v4991_v47 }
0x23b4   :  { %v5229_v51 = vpop.xlane.xlu0 %5228 }
0x23b5   :  { %v4996_v58 = vmul.f32 1.442695, %v4993_v50  ;;  %v5002_v21 = vmul.f32 1.442695, %v4999_v61 }
0x23b7   :  { %7158 = vpow2.f32 %v4996_v58 }
0x23b8   :  { %7160 = vpow2.f32 %v5002_v21  ;;  %v5232_v52 = vpop.xlane.xlu0 %5231 }
0x23bc   :  { %v5226_v17 = vpop.xlane.xlu1 %5225  ;;  %v5235_v62 = vpop.xlane.xlu0 %5234 }
0x23bd   :  { %v5236_v32 = vmax.f32 %v5226_v17, %v5232_v52  ;;  %v5237_v29 = vmax.f32 %v5229_v51, %v5235_v62 }
0x23bf   :  { %v5238_v53 = vsub.f32 %v8545_v25, %v5236_v32  ;;  %v5244_v40 = vsub.f32 %v8540_v35, %v5236_v32  ;;  %v5239_v19 = vsub.f32 %v8535_v43, %v5237_v29  ;;  %v5245_v13 = vsub.f32 %v8548_v4, %v5237_v29 }
0x23c0   :  { %v5029_v55 = vpop.permute.xlu0 %5028  ;;  %v5081_v43 = vsel %vm1018_vm13, %v5023_v27, 0  ;;  %v5275_v24 = vpop.permute.xlu1 %5274 }
0x23c1   :  { %v7159_v7 = vpop.eup %7158  ;;  %v5240_v41 = vmul.f32 1.442695, %v5238_v53  ;;  %v5246_v38 = vmul.f32 1.442695, %v5244_v40  ;;  %v5242_v42 = vmul.f32 1.442695, %v5239_v19 }
0x23c2   :  { %v7161_v49 = vpop.eup %7160  ;;  %v5034_v45 = vsel %vm2878_vm4, %v5029_v55, 0  ;;  %v5007_v48 = vsel %vm993_vm15, %v7159_v7, 0.0  ;;  %v5248_v12 = vmul.f32 1.442695, %v5245_v13  ;;  %v5022_v46 = vpack.c.bf16 %v7159_v7, %v8594_v23 }
0x23c3   :  { %7162 = vpow2.f32 %v5240_v41  ;;  %6724 = vmatpush3.bf16.msra.mxu0 %v5034_v45  ;;  %5008 = vadd.xlane.f32.xlu0 %v5007_v48  ;;  %v5025_v25 = vpack.c.bf16 %v7161_v49, %v7157_v5  ;;  %v5013_v35 = vsel %vm3178_vm10, %v7161_v49, 0.0  ;;  %v5280_v56 = vsel %vm2878_vm4, %v5275_v24, 0 }
0x23c4   :  { %7164 = vpow2.f32 %v5246_v38  ;;  %6729 = vmatprep.subr.bf16.mxu0 %v7304_v44 }
0x23c5   :  { %7166 = vpow2.f32 %v5242_v42 }
0x23c6   :  { %6726 = vmatmul.mubr.msk.bf16.vlgmr.msra.gmra.mrb[100].mxu0 %vm3073_vm9, %v5025_v25  ;;  %7168 = vpow2.f32 %v5248_v12 }
0x23c7   :  { %6730 = vmatpush3.bf16.msra.mxu0 %v5081_v43  ;;  %5014 = vadd.xlane.f32.xlu0 %v5013_v35 }
0x23c8   :  { %6731 = vmatprep.mubr.msk.bf16.mxu0 %vm7305_vm2, %v7304_v44  ;;  %6747 = vmatprep.subr.bf16.mxu0 %v7304_v44 }
0x23cd   :  { %v7163_v4 = vpop.eup %7162 }
0x23ce   :  { %v7165_v28 = vpop.eup %7164  ;;  %v5250_v16 = vsel %vm989_vm14, %v7163_v4, 0.0 }
0x23cf   :  { %v7167_v8 = vpop.eup %7166  ;;  %5251 = vadd.xlane.f32.xlu1 %v5250_v16  ;;  %v5256_v22 = vsel %vm3073_vm9, %v7165_v28, 0.0 }
0x23d0   :  { %v5253_v26 = vsel %vm993_vm15, %v7167_v8, 0.0  ;;  %v7169_v27 = vpop.eup %7168  ;;  %v5268_v30 = vpack.c.bf16 %v7167_v8, %v7163_v4 }
0x23d1   :  { %5254 = vadd.xlane.f32.xlu0 %v5253_v26  ;;  %v5259_v59 = vsel %vm3178_vm10, %v7169_v27, 0.0  ;;  %v5271_v63 = vpack.c.bf16 %v7169_v27, %v7165_v28 }
0x23d2   :  { %6732 = vmatmul.mubr.msk.bf16.vlgmr.msra.gmra.mrb[100].mxu0 %vm989_vm14, %v5022_v46 }
0x23d3   :  { %6748 = vmatpush3.bf16.msra.mxu0 %v5280_v56  ;;  %5257 = vadd.xlane.f32.xlu1 %v5256_v22 }
0x23d4   :  { %6749 = vmatprep.mubr.msk.bf16.mxu0 %vm7305_vm2, %v7304_v44  ;;  %6753 = vmatprep.subr.bf16.mxu0 %v7304_v44 }
0x23d5   :  { %5260 = vadd.xlane.f32.xlu0 %v5259_v59 }
0x23da   :  { %6750 = vmatmul.mubr.msk.bf16.vlgmr.msra.gmra.mrb[104].mxu0 %vm3073_vm9, %v5271_v63 }
0x23db   :  { %6754 = vmatpush3.bf16.msra.mxu0 %v5327_v36  ;;  %6755 = vmatprep.mubr.msk.bf16.mxu0 %vm7305_vm2, %v7304_v44 }
0x23dc   :  { %6775 = vmatprep.subr.bf16.mxu0 %v7304_v44 }
0x23e6   :  { %6756 = vmatmul.mubr.msk.bf16.vlgmr.msra.gmra.mrb[104].mxu0 %vm989_vm14, %v5268_v30 }
0x23e7   :  { %6776 = vmatpush3.bf16.msra.mxu0 %v7232_v6  ;;  %6791 = vmatprep.mubr.msk.bf16.mxu0 %vm7305_vm2, %v7304_v44 }
0x23e8   :  { %6777 = vmatprep.subr.bf16.mxu0 %v7304_v44 }
0x23eb   :  { %6778 = vmatpush3.bf16.msra.mxu0 %v7233_v18 }
0x23ec   :  { %6779 = vmatprep.subr.bf16.mxu0 %v7304_v44 }
0x23ef   :  { %6780 = vmatpush3.bf16.msra.mxu0 %v7234_v60 }
0x23f0   :  { %6781 = vmatprep.subr.bf16.mxu0 %v7304_v44 }
0x23f3   :  { %6782 = vmatpush3.bf16.msra.mxu0 %v7235_v9 }
0x23f4   :  { %6783 = vmatprep.subr.bf16.mxu0 %v7304_v44 }
0x23f7   :  { %6784 = vmatpush3.bf16.msra.mxu0 %v7236_v31 }
0x23f8   :  { %6785 = vmatprep.subr.bf16.mxu0 %v7304_v44 }
0x23fb   :  { %6786 = vmatpush3.bf16.msra.mxu0 %v7237_v0 }
0x23fc   :  { %6787 = vmatprep.subr.bf16.mxu0 %v7304_v44 }
0x23ff   :  { %6788 = vmatpush3.bf16.msra.mxu0 %v7238_v39 }
0x2400   :  { %6789 = vmatprep.subr.bf16.mxu0 %v7304_v44 }
0x2403   :  { %6790 = vmatpush3.bf16.msra.mxu0 %v7239_v33 }
0x240b   :  { %v4514_v2 = vpop.xlane.xlu0 %4513 }
0x240f   :  { %v4520_v23 = vpop.xlane.xlu0 %4519  ;;  %v4517_v61 = vpop.xlane.xlu1 %4516 }
0x2410   :  { %v4524_v47 = vadd.f32 %v4520_v23, %v4514_v2 }
0x2412   :  { %7170 = vrcp.f32 %v4524_v47  ;;  %v7242_v47 = vld [vmem:[%s7385_s6 + $0x1] ss:$0 sm:$0xff] }
0x2413   :  { %v4523_v10 = vpop.xlane.xlu0 %4522 }
0x2414   :  { %v4525_v58 = vadd.f32 %v4523_v10, %v4517_v61 }
0x2417   :  { %v4760_v11 = vpop.xlane.xlu0 %4759 }
0x241b   :  { %v4766_v5 = vpop.xlane.xlu0 %4765 }
0x241c   :  { %v4770_v51 = vadd.f32 %v4766_v5, %v4760_v11  ;;  %v7171_v52 = vpop.eup %7170  ;;  %v7240_v5 = vld [vmem:[%s8744_s0 + $0x10] sm:$0xff]  }
0x241e   :  { %7172 = vrcp.f32 %v4770_v51 }
0x241f   :  { %v4763_v37 = vpop.xlane.xlu0 %4762  ;;  %7174 = vrcp.f32 %v4525_v58 }
0x2423   :  { %v4769_v50 = vpop.xlane.xlu0 %4768  ;;  %v5006_v49 = vpop.xlane.xlu1 %5005 }
0x2424   :  { %v4771_v21 = vadd.f32 %v4769_v50, %v4763_v37  ;;  %v7241_v37 = vld [vmem:[%s8744_s0 + $0x18] sm:$0xff]  }
0x2426   :  { %7176 = vrcp.f32 %v4771_v21 }
0x2427   :  { %v5012_v48 = vpop.xlane.xlu1 %5011 }
0x2428   :  { %v7173_v17 = vpop.eup %7172  ;;  %v5016_v25 = vadd.f32 %v5012_v48, %v5006_v49 }
0x2429   :  { %v7175_v32 = vpop.eup %7174 }
0x242a   :  { %7178 = vrcp.f32 %v5016_v25 }
0x2430   :  { %v7177_v19 = vpop.eup %7176 }
0x2434   :  { %v7179_v28 = vpop.eup %7178 }
0x2450   :  { %v5009_v45 = vpop.xlane.xlu0 %5008 }
0x2454   :  { %v5015_v12 = vpop.xlane.xlu0 %5014 }
0x2455   :  { %v5017_v43 = vadd.f32 %v5015_v12, %v5009_v45  ;;  %v7243_v12 = vld [vmem:[%s8746_s9 + $0x1] ss:$0 sm:$0xff] }
0x2457   :  { %7180 = vrcp.f32 %v5017_v43 }
0x245c   :  { %v5252_v35 = vpop.xlane.xlu1 %5251 }
0x245e   :  { %v5255_v4 = vpop.xlane.xlu0 %5254 }
0x2460   :  { %v5258_v27 = vpop.xlane.xlu1 %5257 }
0x2461   :  { %v7181_v26 = vpop.eup %7180  ;;  %v5262_v30 = vadd.f32 %v5258_v27, %v5252_v35 }
0x2462   :  { %v5261_v63 = vpop.xlane.xlu0 %5260 }
0x2463   :  { %v4625_v57 = vpop.f32.mrb[92].mxu0  ;;  %v5263_v6 = vadd.f32 %v5261_v63, %v5255_v4  ;;  %7182 = vrcp.f32 %v5262_v30  ;;  %v7244_v4 = vld [vmem:[%s8747_s13 + $0x1] ss:$0 sm:$0xff] }
0x2464   :  { %v6685_v1 = vpop.f32.mrb[93].mxu0  ;;  %v4632_v29 = vmul.f32 %v7171_v52, %v4625_v57 }
0x2465   :  { %v4628_v54 = vpop.f32.mrb[94].mxu0  ;;  %7184 = vrcp.f32 %v5263_v6 }
0x2466   :  { %v6686_v3 = vpop.f32.mrb[95].mxu0  ;;  %v4633_v55 = vmul.f32 %v7175_v32, %v4628_v54 }
0x246d   :  { %v7183_v18 = vpop.eup %7182 }
0x246f   :  { %v7185_v0 = vpop.eup %7184 }
0x2477   :  { %v4871_v62 = vpop.f32.mrb[96].mxu0 }
0x2478   :  { %v4878_v53 = vmul.f32 %v7173_v17, %v4871_v62  ;;  %v6709_v40 = vpop.f32.mrb[97].mxu0 }
0x2479   :  { %v4874_v13 = vpop.f32.mrb[98].mxu0 }
0x247a   :  { %v4880_v7 = vadd.f32 %v4878_v53, %v4632_v29  ;;  %v4879_v41 = vmul.f32 %v7177_v19, %v4874_v13  ;;  %v6710_v38 = vpop.f32.mrb[99].mxu0 }
0x247c   :  { %v4881_v42 = vadd.f32 %v4879_v41, %v4633_v55 }
0x24a5   :  { %v5117_v16 = vpop.f32.mrb[100].mxu0 }
0x24a6   :  { %v5124_v8 = vmul.f32 %v7179_v28, %v5117_v16  ;;  %v6733_v24 = vpop.f32.mrb[101].mxu0 }
0x24a7   :  { %v5120_v46 = vpop.f32.mrb[102].mxu0 }
0x24a8   :  { %v5126_v56 = vadd.f32 %v5124_v8, %v4880_v7  ;;  %v5125_v22 = vmul.f32 %v7181_v26, %v5120_v46  ;;  %v6734_v59 = vpop.f32.mrb[103].mxu0  ;;  %v7245_v26 = vld [vmem:[%s8748_s17 + $0x1] ss:$0 sm:$0xff] }
0x24aa   :  { %v5127_v36 = vadd.f32 %v5125_v22, %v4881_v42 }
0x24b9   :  { %v5363_v60 = vpop.f32.mrb[104].mxu0 }
0x24ba   :  { %v5370_v9 = vmul.f32 %v7183_v18, %v5363_v60  ;;  %v6757_v31 = vpop.f32.mrb[105].mxu0 }
0x24bb   :  { %v5366_v39 = vpop.f32.mrb[106].mxu0 }
0x24bc   :  { %v5372_v33 = vadd.f32 %v5370_v9, %v5126_v56  ;;  %v5371_v2 = vmul.f32 %v7185_v0, %v5366_v39  ;;  %v6758_v23 = vpop.f32.mrb[107].mxu0 }
0x24be   :  { %v5373_v10 = vadd.f32 %v5371_v2, %v5127_v36 }
0x24c0   :  { %v5374_v11 = vpack.c.bf16 %v5373_v10, %v5372_v33 }
0x24c2   :  { %6764 = vmatmul.mubr.msk.bf16.vlgmr.msra.gmra.mrb[148].mxu1 %vm693_vm0, %v5374_v11 }
0x24c3   :  { %6768 = vmatpush3.bf16.msra.mxu1 %v7240_v5  ;;  %6771 = vmatprep.mubr.msk.bf16.mxu1 %vm7305_vm2, %v7304_v44  ;;  %v7246_v5 = vld [vmem:[%s8749_s15 + $0x1] ss:$0 sm:$0xff] }
0x24c4   :  { %6769 = vmatprep.subr.bf16.mxu1 %v7304_v44 }
0x24c7   :  { %6770 = vmatpush3.bf16.msra.mxu1 %v7241_v37 }
0x24c8   :  { %6814 = vmatprep.subr.bf16.mxu1 %v7306_v14 }
0x2595   :  { %v5412_v57 = vpop.f32.mrb[148].mxu1 }
0x2596   :  { %v5419_v1 = vadd.f32 %v5412_v57, %v8343_v20  ;;  %v6765_v54 = vpop.f32.mrb[149].mxu1 }
0x2597   :  { %v5415_v3 = vpop.f32.mrb[150].mxu1 }
0x2598   :  { %v8674_v50 = vadd.f32 %v7242_v47, %v5419_v1  ;;  %v5420_v61 = vadd.f32 %v5415_v3, %v8346_v15  ;;  %v6766_v51 = vpop.f32.mrb[151].mxu1 }
0x259a   :  { %v8677_v58 = vadd.f32 %v7242_v47, %v5420_v61  ;;  %v5423_v21 = vsel %vm693_vm0, %v8674_v50, 0.0 }
0x259b   :  { %5424 = vadd.xlane.f32.xlu1 %v5423_v21 }
0x259c   :  { %v5426_v14 = vsel %vm697_vm1, %v8677_v58, 0.0 }
0x259d   :  { %5427 = vadd.xlane.f32.xlu0 %v5426_v14 }
0x2628   :  { %v5425_v52 = vpop.xlane.xlu1 %5424 }
0x2629   :  { %v5429_v20 = vmul.f32 0.03125, %v5425_v52 }
0x262a   :  { %v5428_v17 = vpop.xlane.xlu0 %5427 }
0x262b   :  { %v5431_v62 = vsub.f32 %v8674_v50, %v5429_v20  ;;  %v5430_v32 = vmul.f32 0.03125, %v5428_v17 }
0x262d   :  { %v5432_v29 = vsub.f32 %v8677_v58, %v5430_v32  ;;  %v5433_v15 = vmul.f32 %v5431_v62, %v5431_v62 }
0x262f   :  { %v5435_v53 = vsel %vm693_vm0, %v5433_v15, 0.0  ;;  %v5434_v40 = vmul.f32 %v5432_v29, %v5432_v29 }
0x2630   :  { %5436 = vadd.xlane.f32.xlu1 %v5435_v53 }
0x2631   :  { %v5438_v19 = vsel %vm697_vm1, %v5434_v40, 0.0 }
0x2632   :  { %5439 = vadd.xlane.f32.xlu0 %v5438_v19 }
0x26bd   :  { %v5437_v13 = vpop.xlane.xlu1 %5436 }
0x26be   :  { %v5441_v55 = vmul.f32 0.03125, %v5437_v13 }
0x26bf   :  { %v5440_v7 = vpop.xlane.xlu0 %5439 }
0x26c0   :  { %v5443_v41 = vadd.f32 1e-06, %v5441_v55  ;;  %v5442_v38 = vmul.f32 0.03125, %v5440_v7 }
0x26c2   :  { %7186 = vrsqrt.f32 %v5443_v41  ;;  %v5444_v42 = vadd.f32 1e-06, %v5442_v38  ;;  %v7247_v41 = vld [vmem:[%s8753_s18] ss:$0 sm:$0xff] }
0x26c4   :  { %7188 = vrsqrt.f32 %v5444_v42 }
0x26cc   :  { %v7187_v49 = vpop.eup %7186 }
0x26cd   :  { %v5447_v45 = vmul.f32 %v7187_v49, %v5431_v62 }
0x26ce   :  { %v7189_v48 = vpop.eup %7188 }
0x26cf   :  { %v5449_v25 = vmul.f32 %v7243_v12, %v5447_v45  ;;  %v5448_v43 = vmul.f32 %v7189_v48, %v5432_v29  ;;  %v7248_v45 = vld [vmem:[%s8754_s22] ss:$0 sm:$0xff] }
0x26d1   :  { %v5450_v35 = vmul.f32 %v7243_v12, %v5448_v43  ;;  %v5451_v28 = vadd.f32 %v7244_v4, %v5449_v25  ;;  %v6972_v43 = vld [vmem:[%s8759_s21] sm:$0xff]  }
0x26d3   :  { %v5452_v16 = vadd.f32 %v7244_v4, %v5450_v35  ;;  %v7249_v35 = vld [vmem:[%s7465_s4] sm:$0x3]  ;;  %v6973_v4 = vld [vmem:[%s8759_s21 + $0x8] sm:$0xff]  }
0x26d5   :  { %v5453_v8 = vpack.c.bf16 %v5452_v16, %v5451_v28 }
0x26d7   :  { %6772 = vmatmul.mubr.msk.bf16.vlgmr.msra.gmra.mrb[152].mxu1 %vm693_vm0, %v5453_v8 }
0x26d8   :  { %6799 = vmatprep.mubr.msk.f32.mxu1 %vm7305_vm2, %v7304_v44 }
0x27aa   :  { %v5491_v24 = vpop.f32.mrb[152].mxu1 }
0x27ab   :  { %v5492_v46 = vadd.f32 %v7245_v26, %v5491_v24  ;;  %v6773_v27 = vpop.f32.mrb[153].mxu1 }
0x27ac   :  { %v5494_v56 = vpop.f32.mrb[154].mxu1 }
0x27ad   :  { %v5500_v22 = vmul.f32 0.70710677, %v5492_v46  ;;  %v5495_v59 = vadd.f32 %v7245_v26, %v5494_v56  ;;  %v6774_v63 = vpop.f32.mrb[155].mxu1  ;;  %v5498_v60 = vmul.f32 0.5, %v5492_v46 }
0x27af   :  { %7190 = verf.f32 %v5500_v22  ;;  %v5501_v36 = vmul.f32 0.70710677, %v5495_v59  ;;  %v5499_v9 = vmul.f32 0.5, %v5495_v59 }
0x27b1   :  { %7192 = verf.f32 %v5501_v36 }
0x27b9   :  { %v7191_v30 = vpop.eup %7190 }
0x27ba   :  { %v5504_v6 = vadd.f32 1.0, %v7191_v30 }
0x27bb   :  { %v7193_v18 = vpop.eup %7192 }
0x27bc   :  { %v5505_v31 = vadd.f32 1.0, %v7193_v18  ;;  %v5506_v0 = vmul.f32 %v5504_v6, %v5498_v60 }
0x27be   :  { %v5507_v39 = vmul.f32 %v5505_v31, %v5499_v9 }
0x27c0   :  { %v5508_v33 = vpack.c.bf16 %v5507_v39, %v5506_v0 }
0x27c2   :  { %6792 = vmatmul.mubr.bf16.vlgmr.msra.gmra.mrb[108].mxu0 %v5508_v33 }
0x2895   :  { %v5543_v2 = vpop.f32.mrb[108].mxu0 }
0x2896   :  { %v5550_v23 = vadd.f32 %v5543_v2, %v8674_v50  ;;  %v6793_v10 = vpop.f32.mrb[109].mxu0 }
0x2897   :  { %v5546_v11 = vpop.f32.mrb[110].mxu0 }
0x2898   :  { %v5552_v37 = vadd.f32 %v7246_v5, %v5550_v23  ;;  %v5551_v57 = vadd.f32 %v5546_v11, %v8677_v58  ;;  %v6794_v1 = vpop.f32.mrb[111].mxu0 }
0x289a   :  { %v5553_v54 = vadd.f32 %v7246_v5, %v5551_v57  ;;  %v5554_v3 = vsel %vm693_vm0, %v5552_v37, 0.0 }
0x289b   :  { %5555 = vadd.xlane.f32.xlu1 %v5554_v3 }
0x289c   :  { %v5557_v47 = vsel %vm697_vm1, %v5553_v54, 0.0 }
0x289d   :  { %5558 = vadd.xlane.f32.xlu0 %v5557_v47 }
0x2928   :  { %v5556_v61 = vpop.xlane.xlu1 %5555 }
0x2929   :  { %v5560_v51 = vmul.f32 0.03125, %v5556_v61 }
0x292a   :  { %v5559_v21 = vpop.xlane.xlu0 %5558 }
0x292b   :  { %v5562_v14 = vsub.f32 %v5552_v37, %v5560_v51  ;;  %v5561_v52 = vmul.f32 0.03125, %v5559_v21 }
0x292d   :  { %v5563_v50 = vsub.f32 %v5553_v54, %v5561_v52  ;;  %v5564_v20 = vmul.f32 %v5562_v14, %v5562_v14 }
0x292f   :  { %v5566_v17 = vsel %vm693_vm0, %v5564_v20, 0.0  ;;  %v5565_v62 = vmul.f32 %v5563_v50, %v5563_v50 }
0x2930   :  { %5567 = vadd.xlane.f32.xlu1 %v5566_v17 }
0x2931   :  { %v5569_v58 = vsel %vm697_vm1, %v5565_v62, 0.0  ;;  %vm5729_vm1 = vcmask 336976  }
0x2932   :  { %5570 = vadd.xlane.f32.xlu0 %v5569_v58 }
0x29bd   :  { %v5568_v32 = vpop.xlane.xlu1 %5567 }
0x29be   :  { %v5572_v29 = vmul.f32 0.03125, %v5568_v32 }
0x29bf   :  { %v5571_v15 = vpop.xlane.xlu0 %5570 }
0x29c0   :  { %v5574_v53 = vadd.f32 1e-06, %v5572_v29  ;;  %v5573_v40 = vmul.f32 0.03125, %v5571_v15 }
0x29c2   :  { %7194 = vrsqrt.f32 %v5574_v53  ;;  %v5575_v19 = vadd.f32 1e-06, %v5573_v40 }
0x29c4   :  { %7196 = vrsqrt.f32 %v5575_v19 }
0x29cc   :  { %v7195_v13 = vpop.eup %7194 }
0x29cd   :  { %v5578_v55 = vmul.f32 %v7195_v13, %v5562_v14 }
0x29ce   :  { %v7197_v7 = vpop.eup %7196 }
0x29cf   :  { %v5580_v38 = vmul.f32 %v7247_v41, %v5578_v55  ;;  %v5579_v42 = vmul.f32 %v7197_v7, %v5563_v50 }
0x29d1   :  { %v5581_v49 = vmul.f32 %v7247_v41, %v5579_v42  ;;  %v5582_v48 = vadd.f32 %v7248_v45, %v5580_v38 }
0x29d3   :  { %v5583_v12 = vadd.f32 %v7248_v45, %v5581_v49 }
0x29d5   :  { %v6815_v25 = vpack.c.bf16 %v5583_v12, %v5582_v48 }
0x29d7   :  { %6817 = vmatpush3.bf16.msk.msra.mxu1 %vm8041_vm6, %v6815_v25 }
0x29d8   :  { %6802 = vmatprep.subr.bf16.mxu1 %v7304_v44 }
0x29da   :  { %6800 = vmatmul.mubr.msk.f32.vlgmr.msra.gmra.mrb[66].mxu1 %vm989_vm14, %v7249_v35 }
0x29db   :  { %6803 = vmatpush3.bf16.msra.mxu1 %v6972_v43  ;;  %6806 = vmatprep.mubr.msk.bf16.mxu1 %vm7305_vm2, %v7304_v44 }
0x29dc   :  { %6804 = vmatprep.subr.bf16.mxu1 %v7304_v44 }
0x29df   :  { %6805 = vmatpush3.bf16.msra.mxu1 %v6973_v4 }
0x2aad   :  { %v5653_v28 = vpop.f32.mrb[66].mxu1 }
0x2aae   :  { %v5661_v16 = vpack.c.bf16 %v5653_v28, %v5653_v28  ;;  %v6801_v8 = vpop.f32.mrb[67].mxu1  ;;  %5726 = vrot.lane.b32.xlu1 %v5653_v28, %s7310_s29 }
0x2ab0   :  { %6807 = vmatmul.mubr.msk.bf16.vlgmr.msra.gmra.mrb[156].mxu1 %vm693_vm0, %v5661_v16 }
0x2b20   :  { %v5727_v56 = vpop.permute.xlu1 %5726 }
0x2b83   :  { %v5718_v24 = vpop.f32.mrb[156].mxu1 }
0x2b84   :  { %v5719_v26 = vadd.f32 %v6006_v34, %v5718_v24  ;;  %v6808_v46 = vpop.f32.mrb[157].mxu1 }
0x2b85   :  { %v5721_v27 = vpop.f32.mrb[158].mxu1 }
0x2b86   :  { %5724 = vst [vmem:[#allocation2] sm:$0x3] %v5719_v26  ;;  %v6809_v44 = vpop.f32.mrb[159].mxu1 }
0x2b87   :  { %5730 = vst.msk [vmem:[#allocation2] sm:$0x3] %vm5729_vm1, %v5727_v56 }
0x2b88   :  { %7261 = shalt.err (!%p7258_p4)
}
0x2b89   :  { %s7262_s19 = scalar_lea.hbm %s7470_s12, 32 }
0x2b8a   :  { %p7263_p5 = scmp.ne.s32.totalorder %s7470_s12, %s7262_s19  ;;  %p7266_p6 = scmp.lt.u32.totalorder %s7262_s19, %s7470_s12 }
0x2b8c   :  { %p7268_p7 = pnand %p7266_p6, %p7263_p5 }
0x2b8e   :  { %7271 = shalt.err (!%p7268_p7)
}
0x2b8f   :  { %5740 = dma.vmem_to_hbm [thread:$0]  %s5738_s8, 32, %s7470_s12, [#allocation3]  }
0x2b90   :  { %7272 = dma.done.wait [#allocation3], 32  }
0x2b91   :  { %7273 = vsyncadd [#allocation3], 4294967264 }
0x2b92   :  { %5744 = vsyncpa [#allocation3], 1 }

</bundles_post_ra>
